<compile_context>
chip_gen: v7x
topology: tpu7x:2x2x1
jax: 0.10.0
libtpu: 0.0.40
codegen_flags: <defaults>
</compile_context>

<pallas_src>
import functools

import jax
import jax.numpy as jnp
from jax.experimental import pallas as pl
from jax.experimental.pallas import tpu as pltpu


# ----------------------------- in-kernel helpers ----------------------------

def _layernorm(x, w, b, eps=1e-5):
    # PyTorch nn.LayerNorm: biased variance, eps inside rsqrt.
    mu = jnp.mean(x, axis=-1, keepdims=True)
    var = jnp.mean((x - mu) ** 2, axis=-1, keepdims=True)
    return (x - mu) * jax.lax.rsqrt(var + eps) * w + b


def _erf(x):
    # Abramowitz & Stegun 7.1.26 (max abs err ~1.5e-7); only exp/abs/where.
    p = 0.3275911
    a1, a2, a3, a4, a5 = (0.254829592, -0.284496736, 1.421413741,
                          -1.453152027, 1.061405429)
    ax = jnp.abs(x)
    t = 1.0 / (1.0 + p * ax)
    poly = t * (a1 + t * (a2 + t * (a3 + t * (a4 + t * a5))))
    y = 1.0 - poly * jnp.exp(-ax * ax)
    return jnp.where(x >= 0, y, -y)


def _gelu_exact(x):
    # nn.GELU() (exact erf form).
    return 0.5 * x * (1.0 + _erf(x * 0.7071067811865476))


def _mm(a, b):
    return jnp.dot(a, b, preferred_element_type=jnp.float32)


def _mm_t(a, b):
    # a @ b.T without materializing a transpose: contract last dims.
    return jax.lax.dot_general(a, b, (((1,), (1,)), ((), ())),
                               preferred_element_type=jnp.float32)


# ------------------------------ fused kernel --------------------------------

def _fused_decoder_kernel(
        x_ref, cls_ref, decw_ref, decb_ref,
        ln1w_ref, ln1b_ref, ln2w_ref, ln2b_ref,
        qkvw_ref, qkvb_ref, pw_ref, pjb_ref,
        fc1w_ref, fc1b_ref, fc2w_ref, fc2b_ref,
        dnw_ref, dnb_ref, pp_ref, pc_ref, mnw_ref, mnb_ref,
        out_ref, act_ref, *, n_heads, n_patches):
    layer = pl.program_id(1)
    n_layers = pl.num_programs(1)

    # ---- layer 0: proj_dec + append class embeddings into resident activation
    @pl.when(layer == 0)
    def _init():
        xb = x_ref[0].astype(jnp.bfloat16)                          # (N, d_enc)
        act_ref[:n_patches, :] = _mm(xb, decw_ref[...]) + decb_ref[...]
        act_ref[n_patches:, :] = cls_ref[0]

    x = act_ref[...]                                                # (S, D) f32
    S, D = x.shape
    hd = D // n_heads
    scale = hd ** -0.5

    # ---- pre-norm multi-head self-attention ----
    y = _layernorm(x, ln1w_ref[layer], ln1b_ref[layer])
    # fused QKV projection: one lane-dense matmul (S, D) @ (D, 3D)
    qkv = _mm(y.astype(jnp.bfloat16), qkvw_ref[layer]) + qkvb_ref[layer]
    pw_l = pw_ref[layer]                                            # (D, D) bf16

    attn = None
    for h in range(n_heads):                         # static unroll over heads
        lo = h * hd
        qh = (qkv[:, lo:lo + hd] * scale).astype(jnp.bfloat16)      # (S, hd)
        kh = qkv[:, D + lo:D + lo + hd].astype(jnp.bfloat16)
        vh = qkv[:, 2 * D + lo:2 * D + lo + hd].astype(jnp.bfloat16)
        sc = _mm_t(qh, kh)                                          # (S, S) f32
        sc = sc - jnp.max(sc, axis=-1, keepdims=True)
        es = jnp.exp(sc)
        ph = es * pl.reciprocal(jnp.sum(es, axis=-1, keepdims=True),
                                approx=True)
        oh = _mm(ph.astype(jnp.bfloat16), vh)                       # (S, hd)
        # head-combine folded into the output projection (accumulate (S, D))
        ch = _mm(oh.astype(jnp.bfloat16), pw_l[lo:lo + hd, :])
        attn = ch if attn is None else attn + ch
    x = x + attn + pjb_ref[layer]

    # ---- pre-norm MLP, exact (erf) GELU ----
    y2 = _layernorm(x, ln2w_ref[layer], ln2b_ref[layer])
    h1 = _mm(y2.astype(jnp.bfloat16), fc1w_ref[layer]) + fc1b_ref[layer]
    h1 = _gelu_exact(h1)
    x = x + _mm(h1.astype(jnp.bfloat16), fc2w_ref[layer]) + fc2b_ref[layer]
    act_ref[...] = x

    # ---- last layer: decoder_norm -> projections -> cosine masks -> mask_norm
    @pl.when(layer == n_layers - 1)
    def _head():
        dn = _layernorm(x, dnw_ref[...], dnb_ref[...])
        patches = _mm(dn[:n_patches].astype(jnp.bfloat16), pp_ref[...])   # (N, D)
        cls_feat = _mm(dn[n_patches:].astype(jnp.bfloat16), pc_ref[...])  # (n_cls, D)
        patches = patches * jax.lax.rsqrt(
            jnp.sum(patches * patches, axis=-1, keepdims=True))
        cls_feat = cls_feat * jax.lax.rsqrt(
            jnp.sum(cls_feat * cls_feat, axis=-1, keepdims=True))
        # lane-dense transposed masks (n_cls, N); contract last dims, no .T
        masks_t = _mm_t(cls_feat, patches)
        # mask_norm == LayerNorm over classes -> axis 0 of the transposed layout
        mu = jnp.mean(masks_t, axis=0, keepdims=True)
        var = jnp.mean((masks_t - mu) ** 2, axis=0, keepdims=True)
        out_ref[0] = ((masks_t - mu) * jax.lax.rsqrt(var + 1e-5)
                      * mnw_ref[...] + mnb_ref[...])


# -------------------------------- wrapper ------------------------------------

def _vmem_limit_bytes():
    # ~3/4 of physical VMEM, capped at 100 MiB (96 MiB on v5e/v6e, 48 MiB on
    # v7x).  Fallback of 64 MiB is safe on every chip.
    try:
        cap = int(pltpu.get_tpu_info().vmem_capacity_bytes)
        return int(min(100 * 1024 * 1024, cap * 3 // 4))
    except Exception:
        return 64 * 1024 * 1024


def mask_transformer_forward(x, params, im_size, patch_size, n_cls, n_heads):
    H, W = im_size
    GS, GW = H // patch_size, W // patch_size
    B, N, d_enc = x.shape
    L, d_model, _ = params["qkv_w"].shape
    d_ff = params["fc1_w"].shape[-1]
    S = N + n_cls

    def const(shape):
        r = len(shape)
        return pl.BlockSpec(shape, lambda b, l, _r=r: (0,) * _r)

    kernel = functools.partial(_fused_decoder_kernel,
                               n_heads=n_heads, n_patches=N)

    masks_t = pl.pallas_call(
        kernel,
        out_shape=jax.ShapeDtypeStruct((B, n_cls, N), jnp.float32),
        grid=(B, L),
        in_specs=[
            pl.BlockSpec((1, N, d_enc), lambda b, l: (b, 0, 0)),          # x
            const((1, n_cls, d_model)),                                   # cls_emb
            const((d_enc, d_model)), const((1, d_model)),                 # proj_dec
            const((L, 1, d_model)), const((L, 1, d_model)),               # ln1 w,b
            const((L, 1, d_model)), const((L, 1, d_model)),               # ln2 w,b
            const((L, d_model, 3 * d_model)), const((L, 1, 3 * d_model)), # qkv W,b
            const((L, d_model, d_model)), const((L, 1, d_model)),         # proj W,b
            const((L, d_model, d_ff)), const((L, 1, d_ff)),               # fc1 W,b
            const((L, d_ff, d_model)), const((L, 1, d_model)),            # fc2 W,b
            const((1, d_model)), const((1, d_model)),                     # decoder_norm
            const((d_model, d_model)), const((d_model, d_model)),         # proj_patch/classes
            const((n_cls, 1)), const((n_cls, 1)),                         # mask_norm (per class)
        ],
        out_specs=pl.BlockSpec((1, n_cls, N), lambda b, l: (b, 0, 0)),
        scratch_shapes=[pltpu.VMEM((S, d_model), jnp.float32)],
        compiler_params=pltpu.CompilerParams(
            dimension_semantics=("parallel", "arbitrary"),
            vmem_limit_bytes=_vmem_limit_bytes()),
    )(x, params["cls_emb"], params["proj_dec_w"], params["proj_dec_b"],
      params["ln1_w"], params["ln1_b"], params["ln2_w"], params["ln2_b"],
      params["qkv_w"], params["qkv_b"], params["proj_w"], params["proj_b"],
      params["fc1_w"], params["fc1_b"], params["fc2_w"], params["fc2_b"],
      params["decoder_norm_w"], params["decoder_norm_b"],
      params["proj_patch"], params["proj_classes"],
      params["mask_norm_w"], params["mask_norm_b"])

    # (B, n_cls, N) is already class-major: NCHW needs only a reshape.
    return masks_t.reshape(B, n_cls, GS, GW)


# ------------------------------ param init -----------------------------------

def init_params(key, n_cls, d_encoder, n_layers, n_heads, d_model, d_ff):
    k = jax.random.split(key, 8)

    def nrm(kk, shape, s=0.02):
        return (s * jax.random.normal(kk, shape)).astype(jnp.float32)

    bf = lambda a: a.astype(jnp.bfloat16)
    scale = d_model ** (-0.5)

    # qkv columns ordered [q | k | v], each head-major over (H, hd); proj rows
    # head-major over (H, hd) -- matching torch's reshape(B, N, 3, H, hd).
    return {
        "cls_emb": jax.random.normal(k[0], (1, n_cls, d_model), jnp.float32),
        "proj_dec_w": bf(nrm(k[1], (d_encoder, d_model))),
        "proj_dec_b": jnp.zeros((1, d_model), jnp.float32),
        "ln1_w": jnp.ones((n_layers, 1, d_model), jnp.float32),
        "ln1_b": jnp.zeros((n_layers, 1, d_model), jnp.float32),
        "ln2_w": jnp.ones((n_layers, 1, d_model), jnp.float32),
        "ln2_b": jnp.zeros((n_layers, 1, d_model), jnp.float32),
        "qkv_w": bf(nrm(k[2], (n_layers, d_model, 3 * d_model))),
        "qkv_b": jnp.zeros((n_layers, 1, 3 * d_model), jnp.float32),
        "proj_w": bf(nrm(k[3], (n_layers, d_model, d_model))),
        "proj_b": jnp.zeros((n_layers, 1, d_model), jnp.float32),
        "fc1_w": bf(nrm(k[4], (n_layers, d_model, d_ff))),
        "fc1_b": jnp.zeros((n_layers, 1, d_ff), jnp.float32),
        "fc2_w": bf(nrm(k[5], (n_layers, d_ff, d_model))),
        "fc2_b": jnp.zeros((n_layers, 1, d_model), jnp.float32),
        "decoder_norm_w": jnp.ones((1, d_model), jnp.float32),
        "decoder_norm_b": jnp.zeros((1, d_model), jnp.float32),
        "proj_patch": bf(scale * jax.random.normal(k[6], (d_model, d_model), jnp.float32)),
        "proj_classes": bf(scale * jax.random.normal(k[7], (d_model, d_model), jnp.float32)),
        "mask_norm_w": jnp.ones((n_cls, 1), jnp.float32),
        "mask_norm_b": jnp.zeros((n_cls, 1), jnp.float32),
    }


# --------------------------------- main ---------------------------------------

if __name__ == "__main__":
    # small config consistent with the module's forward
    n_cls, patch_size, d_encoder = 8, 16, 32
    n_layers, n_heads, d_model, d_ff = 2, 4, 32, 64
    B, H, W = 2, 64, 64
    GS, GW = H // patch_size, W // patch_size
    N = GS * GW                                  # 16 patch tokens

    key = jax.random.PRNGKey(0)
    kx, kp = jax.random.split(key)
    x = jax.random.normal(kx, (B, N, d_encoder), jnp.float32)
    params = init_params(kp, n_cls, d_encoder, n_layers, n_heads, d_model, d_ff)

    masks = mask_transformer_forward(x, params, (H, W), patch_size, n_cls, n_heads)
    masks = jax.block_until_ready(masks)

    assert masks.shape == (B, n_cls, GS, GW), masks.shape
    assert bool(jnp.all(jnp.isfinite(masks)))
    # TODO(synk): get_attention_map (debug-only path) is not implemented.
    print("KERNEL_OK")
</pallas_src>

<mosaic_0001>
module attributes {stable_mosaic.version = 11 : i64} {
  func.func @_fused_decoder_kernel(%arg0: i32, %arg1: i32, %arg2: memref<1x16x32xf32, #tpu.memory_space<vmem>>, %arg3: memref<1x8x32xf32, #tpu.memory_space<vmem>>, %arg4: memref<32x32xbf16, #tpu.memory_space<vmem>>, %arg5: memref<1x32xf32, #tpu.memory_space<vmem>>, %arg6: memref<2x1x32xf32, #tpu.memory_space<vmem>>, %arg7: memref<2x1x32xf32, #tpu.memory_space<vmem>>, %arg8: memref<2x1x32xf32, #tpu.memory_space<vmem>>, %arg9: memref<2x1x32xf32, #tpu.memory_space<vmem>>, %arg10: memref<2x32x96xbf16, #tpu.memory_space<vmem>>, %arg11: memref<2x1x96xf32, #tpu.memory_space<vmem>>, %arg12: memref<2x32x32xbf16, #tpu.memory_space<vmem>>, %arg13: memref<2x1x32xf32, #tpu.memory_space<vmem>>, %arg14: memref<2x32x64xbf16, #tpu.memory_space<vmem>>, %arg15: memref<2x1x64xf32, #tpu.memory_space<vmem>>, %arg16: memref<2x64x32xbf16, #tpu.memory_space<vmem>>, %arg17: memref<2x1x32xf32, #tpu.memory_space<vmem>>, %arg18: memref<1x32xf32, #tpu.memory_space<vmem>>, %arg19: memref<1x32xf32, #tpu.memory_space<vmem>>, %arg20: memref<32x32xbf16, #tpu.memory_space<vmem>>, %arg21: memref<32x32xbf16, #tpu.memory_space<vmem>>, %arg22: memref<8x1xf32, #tpu.memory_space<vmem>>, %arg23: memref<8x1xf32, #tpu.memory_space<vmem>>, %arg24: memref<1x8x16xf32, #tpu.memory_space<vmem>>, %arg25: memref<24x32xf32, #tpu.memory_space<vmem>>) attributes {dimension_semantics = [#tpu.dimension_semantics<parallel>, #tpu.dimension_semantics<arbitrary>], iteration_bounds = array<i64: 2, 2>, scalar_prefetch = 0 : i64, scratch_operands = 1 : i64, tpu.core_type = #tpu.core_type<tc>, window_params = [{transform_indices = @transform_0, window_bounds = array<i64: 1, 16, 32>}, {pipeline_mode = #tpu.pipeline_mode<synchronous>, transform_indices = @transform_1, window_bounds = array<i64: 1, 8, 32>}, {pipeline_mode = #tpu.pipeline_mode<synchronous>, transform_indices = @transform_2, window_bounds = array<i64: 32, 32>}, {pipeline_mode = #tpu.pipeline_mode<synchronous>, transform_indices = @transform_3, window_bounds = array<i64: 1, 32>}, {pipeline_mode = #tpu.pipeline_mode<synchronous>, transform_indices = @transform_4, window_bounds = array<i64: 2, 1, 32>}, {pipeline_mode = #tpu.pipeline_mode<synchronous>, transform_indices = @transform_5, window_bounds = array<i64: 2, 1, 32>}, {pipeline_mode = #tpu.pipeline_mode<synchronous>, transform_indices = @transform_6, window_bounds = array<i64: 2, 1, 32>}, {pipeline_mode = #tpu.pipeline_mode<synchronous>, transform_indices = @transform_7, window_bounds = array<i64: 2, 1, 32>}, {pipeline_mode = #tpu.pipeline_mode<synchronous>, transform_indices = @transform_8, window_bounds = array<i64: 2, 32, 96>}, {pipeline_mode = #tpu.pipeline_mode<synchronous>, transform_indices = @transform_9, window_bounds = array<i64: 2, 1, 96>}, {pipeline_mode = #tpu.pipeline_mode<synchronous>, transform_indices = @transform_10, window_bounds = array<i64: 2, 32, 32>}, {pipeline_mode = #tpu.pipeline_mode<synchronous>, transform_indices = @transform_11, window_bounds = array<i64: 2, 1, 32>}, {pipeline_mode = #tpu.pipeline_mode<synchronous>, transform_indices = @transform_12, window_bounds = array<i64: 2, 32, 64>}, {pipeline_mode = #tpu.pipeline_mode<synchronous>, transform_indices = @transform_13, window_bounds = array<i64: 2, 1, 64>}, {pipeline_mode = #tpu.pipeline_mode<synchronous>, transform_indices = @transform_14, window_bounds = array<i64: 2, 64, 32>}, {pipeline_mode = #tpu.pipeline_mode<synchronous>, transform_indices = @transform_15, window_bounds = array<i64: 2, 1, 32>}, {pipeline_mode = #tpu.pipeline_mode<synchronous>, transform_indices = @transform_16, window_bounds = array<i64: 1, 32>}, {pipeline_mode = #tpu.pipeline_mode<synchronous>, transform_indices = @transform_17, window_bounds = array<i64: 1, 32>}, {pipeline_mode = #tpu.pipeline_mode<synchronous>, transform_indices = @transform_18, window_bounds = array<i64: 32, 32>}, {pipeline_mode = #tpu.pipeline_mode<synchronous>, transform_indices = @transform_19, window_bounds = array<i64: 32, 32>}, {pipeline_mode = #tpu.pipeline_mode<synchronous>, transform_indices = @transform_20, window_bounds = array<i64: 8, 1>}, {pipeline_mode = #tpu.pipeline_mode<synchronous>, transform_indices = @transform_21, window_bounds = array<i64: 8, 1>}, {transform_indices = @transform_22, window_bounds = array<i64: 1, 8, 16>}]} {
    %c0_i32 = arith.constant 0 : i32
    %0 = arith.cmpi eq, %arg1, %c0_i32 : i32
    %1 = arith.extui %0 : i1 to i32
    %c0_i32_0 = arith.constant 0 : i32
    %2 = arith.cmpi ne, %1, %c0_i32_0 : i32
    scf.if %2 {
      %c0_80 = arith.constant 0 : index
      %c0_81 = arith.constant 0 : index
      %c0_82 = arith.constant 0 : index
      %243 = vector.load %arg2[%c0_80, %c0_81, %c0_82] : memref<1x16x32xf32, #tpu.memory_space<vmem>>, vector<1x16x32xf32>
      %244 = vector.shape_cast %243 : vector<1x16x32xf32> to vector<16x32xf32>
      %245 = arith.truncf %244 : vector<16x32xf32> to vector<16x32xbf16>
      %c0_83 = arith.constant 0 : index
      %c0_84 = arith.constant 0 : index
      %246 = vector.load %arg4[%c0_83, %c0_84] : memref<32x32xbf16, #tpu.memory_space<vmem>>, vector<32x32xbf16>
      %cst_85 = arith.constant dense<0.000000e+00> : vector<16x32xf32>
      %247 = tpu.matmul %245, %246, %cst_85 {dimension_numbers = #tpu.dot_dimension_numbers<[1], [0], [0], [1], [0, 0, 1, 1], [], []>} : vector<16x32xbf16>, vector<32x32xbf16>, vector<16x32xf32> -> vector<16x32xf32>
      %c0_86 = arith.constant 0 : index
      %c0_87 = arith.constant 0 : index
      %248 = vector.load %arg5[%c0_86, %c0_87] : memref<1x32xf32, #tpu.memory_space<vmem>>, vector<1x32xf32>
      %249 = vector.broadcast %248 : vector<1x32xf32> to vector<16x32xf32>
      %250 = arith.addf %247, %249 : vector<16x32xf32>
      %c0_88 = arith.constant 0 : index
      %c0_89 = arith.constant 0 : index
      %251 = vector.load %arg25[%c0_88, %c0_89] : memref<24x32xf32, #tpu.memory_space<vmem>>, vector<16x32xf32>
      tpu.vector_store %arg25[%c0_88, %c0_89], %250 {strides = array<i32>} : memref<24x32xf32, #tpu.memory_space<vmem>>, vector<16x32xf32>,
      %c0_90 = arith.constant 0 : index
      %c0_91 = arith.constant 0 : index
      %c0_92 = arith.constant 0 : index
      %252 = vector.load %arg3[%c0_90, %c0_91, %c0_92] : memref<1x8x32xf32, #tpu.memory_space<vmem>>, vector<1x8x32xf32>
      %253 = vector.shape_cast %252 : vector<1x8x32xf32> to vector<8x32xf32>
      %c16 = arith.constant 16 : index
      %c0_93 = arith.constant 0 : index
      %254 = vector.load %arg25[%c16, %c0_93] : memref<24x32xf32, #tpu.memory_space<vmem>>, vector<8x32xf32>
      tpu.vector_store %arg25[%c16, %c0_93], %253 {strides = array<i32>} : memref<24x32xf32, #tpu.memory_space<vmem>>, vector<8x32xf32>,
    } else {
    }
    %c0 = arith.constant 0 : index
    %c0_1 = arith.constant 0 : index
    %3 = vector.load %arg25[%c0, %c0_1] : memref<24x32xf32, #tpu.memory_space<vmem>>, vector<24x32xf32>
    %4 = arith.index_cast %arg1 : i32 to index
    %c0_2 = arith.constant 0 : index
    %c0_3 = arith.constant 0 : index
    %5 = vector.load %arg6[%4, %c0_2, %c0_3] : memref<2x1x32xf32, #tpu.memory_space<vmem>>, vector<1x1x32xf32>
    %6 = vector.shape_cast %5 : vector<1x1x32xf32> to vector<1x32xf32>
    %7 = arith.index_cast %arg1 : i32 to index
    %c0_4 = arith.constant 0 : index
    %c0_5 = arith.constant 0 : index
    %8 = vector.load %arg7[%7, %c0_4, %c0_5] : memref<2x1x32xf32, #tpu.memory_space<vmem>>, vector<1x1x32xf32>
    %9 = vector.shape_cast %8 : vector<1x1x32xf32> to vector<1x32xf32>
    %cst = arith.constant dense<0.000000e+00> : vector<24xf32>
    %10 = vector.multi_reduction <add>, %3, %cst [1] : vector<24x32xf32> to vector<24xf32>
    %11 = vector.shape_cast %10 : vector<24xf32> to vector<24x1xf32>
    %cst_6 = arith.constant 3.200000e+01 : f32
    %12 = vector.broadcast %cst_6 : f32 to vector<24x1xf32>
    %13 = arith.divf %11, %12 : vector<24x1xf32>
    %14 = vector.broadcast %13 : vector<24x1xf32> to vector<24x32xf32>
    %15 = arith.subf %3, %14 : vector<24x32xf32>
    %16 = arith.mulf %15, %15 : vector<24x32xf32>
    %cst_7 = arith.constant dense<0.000000e+00> : vector<24xf32>
    %17 = vector.multi_reduction <add>, %16, %cst_7 [1] : vector<24x32xf32> to vector<24xf32>
    %18 = vector.shape_cast %17 : vector<24xf32> to vector<24x1xf32>
    %cst_8 = arith.constant 3.200000e+01 : f32
    %19 = vector.broadcast %cst_8 : f32 to vector<24x1xf32>
    %20 = arith.divf %18, %19 : vector<24x1xf32>
    %21 = vector.broadcast %13 : vector<24x1xf32> to vector<24x32xf32>
    %22 = arith.subf %3, %21 : vector<24x32xf32>
    %cst_9 = arith.constant 9.99999974E-6 : f32
    %23 = vector.broadcast %cst_9 : f32 to vector<24x1xf32>
    %24 = arith.addf %20, %23 : vector<24x1xf32>
    %25 = math.rsqrt %24 : vector<24x1xf32>
    %26 = vector.broadcast %25 : vector<24x1xf32> to vector<24x32xf32>
    %27 = arith.mulf %22, %26 : vector<24x32xf32>
    %28 = vector.broadcast %6 : vector<1x32xf32> to vector<24x32xf32>
    %29 = arith.mulf %27, %28 : vector<24x32xf32>
    %30 = vector.broadcast %9 : vector<1x32xf32> to vector<24x32xf32>
    %31 = arith.addf %29, %30 : vector<24x32xf32>
    %32 = arith.truncf %31 : vector<24x32xf32> to vector<24x32xbf16>
    %33 = arith.index_cast %arg1 : i32 to index
    %c0_10 = arith.constant 0 : index
    %c0_11 = arith.constant 0 : index
    %34 = vector.load %arg10[%33, %c0_10, %c0_11] : memref<2x32x96xbf16, #tpu.memory_space<vmem>>, vector<1x32x96xbf16>
    %35 = vector.shape_cast %34 : vector<1x32x96xbf16> to vector<32x96xbf16>
    %cst_12 = arith.constant dense<0.000000e+00> : vector<24x96xf32>
    %36 = tpu.matmul %32, %35, %cst_12 {dimension_numbers = #tpu.dot_dimension_numbers<[1], [0], [0], [1], [0, 0, 1, 1], [], []>} : vector<24x32xbf16>, vector<32x96xbf16>, vector<24x96xf32> -> vector<24x96xf32>
    %37 = arith.index_cast %arg1 : i32 to index
    %c0_13 = arith.constant 0 : index
    %c0_14 = arith.constant 0 : index
    %38 = vector.load %arg11[%37, %c0_13, %c0_14] : memref<2x1x96xf32, #tpu.memory_space<vmem>>, vector<1x1x96xf32>
    %39 = vector.shape_cast %38 : vector<1x1x96xf32> to vector<1x96xf32>
    %40 = vector.broadcast %39 : vector<1x96xf32> to vector<24x96xf32>
    %41 = arith.addf %36, %40 : vector<24x96xf32>
    %42 = arith.index_cast %arg1 : i32 to index
    %c0_15 = arith.constant 0 : index
    %c0_16 = arith.constant 0 : index
    %43 = vector.load %arg12[%42, %c0_15, %c0_16] : memref<2x32x32xbf16, #tpu.memory_space<vmem>>, vector<1x32x32xbf16>
    %44 = vector.shape_cast %43 : vector<1x32x32xbf16> to vector<32x32xbf16>
    %45 = vector.extract_strided_slice %41 {offsets = [0, 0], sizes = [24, 8], strides = [1, 1]} : vector<24x96xf32> to vector<24x8xf32>
    %cst_17 = arith.constant 0.353553385 : f32
    %46 = vector.broadcast %cst_17 : f32 to vector<24x8xf32>
    %47 = arith.mulf %45, %46 : vector<24x8xf32>
    %48 = arith.truncf %47 : vector<24x8xf32> to vector<24x8xbf16>
    %49 = vector.extract_strided_slice %41 {offsets = [0, 32], sizes = [24, 8], strides = [1, 1]} : vector<24x96xf32> to vector<24x8xf32>
    %50 = arith.truncf %49 : vector<24x8xf32> to vector<24x8xbf16>
    %51 = vector.extract_strided_slice %41 {offsets = [0, 64], sizes = [24, 8], strides = [1, 1]} : vector<24x96xf32> to vector<24x8xf32>
    %52 = arith.truncf %51 : vector<24x8xf32> to vector<24x8xbf16>
    %cst_18 = arith.constant dense<0.000000e+00> : vector<24x24xf32>
    %53 = tpu.matmul %48, %50, %cst_18 {dimension_numbers = #tpu.dot_dimension_numbers<[1], [1], [0], [0], [0, 0, 1, 0], [], []>} : vector<24x8xbf16>, vector<24x8xbf16>, vector<24x24xf32> -> vector<24x24xf32>
    %cst_19 = arith.constant dense<0xFF800000> : vector<24xf32>
    %54 = vector.multi_reduction <maximumf>, %53, %cst_19 [1] : vector<24x24xf32> to vector<24xf32>
    %55 = vector.shape_cast %54 : vector<24xf32> to vector<24x1xf32>
    %56 = vector.broadcast %55 : vector<24x1xf32> to vector<24x24xf32>
    %57 = arith.subf %53, %56 : vector<24x24xf32>
    %58 = math.exp %57 : vector<24x24xf32>
    %cst_20 = arith.constant dense<0.000000e+00> : vector<24xf32>
    %59 = vector.multi_reduction <add>, %58, %cst_20 [1] : vector<24x24xf32> to vector<24xf32>
    %60 = vector.shape_cast %59 : vector<24xf32> to vector<24x1xf32>
    %61 = tpu.reciprocal %60 {approx = true} : vector<24x1xf32> -> vector<24x1xf32>
    %62 = vector.broadcast %61 : vector<24x1xf32> to vector<24x24xf32>
    %63 = arith.mulf %58, %62 : vector<24x24xf32>
    %64 = arith.truncf %63 : vector<24x24xf32> to vector<24x24xbf16>
    %cst_21 = arith.constant dense<0.000000e+00> : vector<24x8xf32>
    %65 = tpu.matmul %64, %52, %cst_21 {dimension_numbers = #tpu.dot_dimension_numbers<[1], [0], [0], [1], [0, 0, 1, 1], [], []>} : vector<24x24xbf16>, vector<24x8xbf16>, vector<24x8xf32> -> vector<24x8xf32>
    %66 = arith.truncf %65 : vector<24x8xf32> to vector<24x8xbf16>
    %67 = vector.extract_strided_slice %44 {offsets = [0, 0], sizes = [8, 32], strides = [1, 1]} : vector<32x32xbf16> to vector<8x32xbf16>
    %cst_22 = arith.constant dense<0.000000e+00> : vector<24x32xf32>
    %68 = tpu.matmul %66, %67, %cst_22 {dimension_numbers = #tpu.dot_dimension_numbers<[1], [0], [0], [1], [0, 0, 1, 1], [], []>} : vector<24x8xbf16>, vector<8x32xbf16>, vector<24x32xf32> -> vector<24x32xf32>
    %69 = vector.extract_strided_slice %41 {offsets = [0, 8], sizes = [24, 8], strides = [1, 1]} : vector<24x96xf32> to vector<24x8xf32>
    %cst_23 = arith.constant 0.353553385 : f32
    %70 = vector.broadcast %cst_23 : f32 to vector<24x8xf32>
    %71 = arith.mulf %69, %70 : vector<24x8xf32>
    %72 = arith.truncf %71 : vector<24x8xf32> to vector<24x8xbf16>
    %73 = vector.extract_strided_slice %41 {offsets = [0, 40], sizes = [24, 8], strides = [1, 1]} : vector<24x96xf32> to vector<24x8xf32>
    %74 = arith.truncf %73 : vector<24x8xf32> to vector<24x8xbf16>
    %75 = vector.extract_strided_slice %41 {offsets = [0, 72], sizes = [24, 8], strides = [1, 1]} : vector<24x96xf32> to vector<24x8xf32>
    %76 = arith.truncf %75 : vector<24x8xf32> to vector<24x8xbf16>
    %cst_24 = arith.constant dense<0.000000e+00> : vector<24x24xf32>
    %77 = tpu.matmul %72, %74, %cst_24 {dimension_numbers = #tpu.dot_dimension_numbers<[1], [1], [0], [0], [0, 0, 1, 0], [], []>} : vector<24x8xbf16>, vector<24x8xbf16>, vector<24x24xf32> -> vector<24x24xf32>
    %cst_25 = arith.constant dense<0xFF800000> : vector<24xf32>
    %78 = vector.multi_reduction <maximumf>, %77, %cst_25 [1] : vector<24x24xf32> to vector<24xf32>
    %79 = vector.shape_cast %78 : vector<24xf32> to vector<24x1xf32>
    %80 = vector.broadcast %79 : vector<24x1xf32> to vector<24x24xf32>
    %81 = arith.subf %77, %80 : vector<24x24xf32>
    %82 = math.exp %81 : vector<24x24xf32>
    %cst_26 = arith.constant dense<0.000000e+00> : vector<24xf32>
    %83 = vector.multi_reduction <add>, %82, %cst_26 [1] : vector<24x24xf32> to vector<24xf32>
    %84 = vector.shape_cast %83 : vector<24xf32> to vector<24x1xf32>
    %85 = tpu.reciprocal %84 {approx = true} : vector<24x1xf32> -> vector<24x1xf32>
    %86 = vector.broadcast %85 : vector<24x1xf32> to vector<24x24xf32>
    %87 = arith.mulf %82, %86 : vector<24x24xf32>
    %88 = arith.truncf %87 : vector<24x24xf32> to vector<24x24xbf16>
    %cst_27 = arith.constant dense<0.000000e+00> : vector<24x8xf32>
    %89 = tpu.matmul %88, %76, %cst_27 {dimension_numbers = #tpu.dot_dimension_numbers<[1], [0], [0], [1], [0, 0, 1, 1], [], []>} : vector<24x24xbf16>, vector<24x8xbf16>, vector<24x8xf32> -> vector<24x8xf32>
    %90 = arith.truncf %89 : vector<24x8xf32> to vector<24x8xbf16>
    %91 = vector.extract_strided_slice %44 {offsets = [8, 0], sizes = [8, 32], strides = [1, 1]} : vector<32x32xbf16> to vector<8x32xbf16>
    %cst_28 = arith.constant dense<0.000000e+00> : vector<24x32xf32>
    %92 = tpu.matmul %90, %91, %cst_28 {dimension_numbers = #tpu.dot_dimension_numbers<[1], [0], [0], [1], [0, 0, 1, 1], [], []>} : vector<24x8xbf16>, vector<8x32xbf16>, vector<24x32xf32> -> vector<24x32xf32>
    %93 = arith.addf %68, %92 : vector<24x32xf32>
    %94 = vector.extract_strided_slice %41 {offsets = [0, 16], sizes = [24, 8], strides = [1, 1]} : vector<24x96xf32> to vector<24x8xf32>
    %cst_29 = arith.constant 0.353553385 : f32
    %95 = vector.broadcast %cst_29 : f32 to vector<24x8xf32>
    %96 = arith.mulf %94, %95 : vector<24x8xf32>
    %97 = arith.truncf %96 : vector<24x8xf32> to vector<24x8xbf16>
    %98 = vector.extract_strided_slice %41 {offsets = [0, 48], sizes = [24, 8], strides = [1, 1]} : vector<24x96xf32> to vector<24x8xf32>
    %99 = arith.truncf %98 : vector<24x8xf32> to vector<24x8xbf16>
    %100 = vector.extract_strided_slice %41 {offsets = [0, 80], sizes = [24, 8], strides = [1, 1]} : vector<24x96xf32> to vector<24x8xf32>
    %101 = arith.truncf %100 : vector<24x8xf32> to vector<24x8xbf16>
    %cst_30 = arith.constant dense<0.000000e+00> : vector<24x24xf32>
    %102 = tpu.matmul %97, %99, %cst_30 {dimension_numbers = #tpu.dot_dimension_numbers<[1], [1], [0], [0], [0, 0, 1, 0], [], []>} : vector<24x8xbf16>, vector<24x8xbf16>, vector<24x24xf32> -> vector<24x24xf32>
    %cst_31 = arith.constant dense<0xFF800000> : vector<24xf32>
    %103 = vector.multi_reduction <maximumf>, %102, %cst_31 [1] : vector<24x24xf32> to vector<24xf32>
    %104 = vector.shape_cast %103 : vector<24xf32> to vector<24x1xf32>
    %105 = vector.broadcast %104 : vector<24x1xf32> to vector<24x24xf32>
    %106 = arith.subf %102, %105 : vector<24x24xf32>
    %107 = math.exp %106 : vector<24x24xf32>
    %cst_32 = arith.constant dense<0.000000e+00> : vector<24xf32>
    %108 = vector.multi_reduction <add>, %107, %cst_32 [1] : vector<24x24xf32> to vector<24xf32>
    %109 = vector.shape_cast %108 : vector<24xf32> to vector<24x1xf32>
    %110 = tpu.reciprocal %109 {approx = true} : vector<24x1xf32> -> vector<24x1xf32>
    %111 = vector.broadcast %110 : vector<24x1xf32> to vector<24x24xf32>
    %112 = arith.mulf %107, %111 : vector<24x24xf32>
    %113 = arith.truncf %112 : vector<24x24xf32> to vector<24x24xbf16>
    %cst_33 = arith.constant dense<0.000000e+00> : vector<24x8xf32>
    %114 = tpu.matmul %113, %101, %cst_33 {dimension_numbers = #tpu.dot_dimension_numbers<[1], [0], [0], [1], [0, 0, 1, 1], [], []>} : vector<24x24xbf16>, vector<24x8xbf16>, vector<24x8xf32> -> vector<24x8xf32>
    %115 = arith.truncf %114 : vector<24x8xf32> to vector<24x8xbf16>
    %116 = vector.extract_strided_slice %44 {offsets = [16, 0], sizes = [8, 32], strides = [1, 1]} : vector<32x32xbf16> to vector<8x32xbf16>
    %cst_34 = arith.constant dense<0.000000e+00> : vector<24x32xf32>
    %117 = tpu.matmul %115, %116, %cst_34 {dimension_numbers = #tpu.dot_dimension_numbers<[1], [0], [0], [1], [0, 0, 1, 1], [], []>} : vector<24x8xbf16>, vector<8x32xbf16>, vector<24x32xf32> -> vector<24x32xf32>
    %118 = arith.addf %93, %117 : vector<24x32xf32>
    %119 = vector.extract_strided_slice %41 {offsets = [0, 24], sizes = [24, 8], strides = [1, 1]} : vector<24x96xf32> to vector<24x8xf32>
    %cst_35 = arith.constant 0.353553385 : f32
    %120 = vector.broadcast %cst_35 : f32 to vector<24x8xf32>
    %121 = arith.mulf %119, %120 : vector<24x8xf32>
    %122 = arith.truncf %121 : vector<24x8xf32> to vector<24x8xbf16>
    %123 = vector.extract_strided_slice %41 {offsets = [0, 56], sizes = [24, 8], strides = [1, 1]} : vector<24x96xf32> to vector<24x8xf32>
    %124 = arith.truncf %123 : vector<24x8xf32> to vector<24x8xbf16>
    %125 = vector.extract_strided_slice %41 {offsets = [0, 88], sizes = [24, 8], strides = [1, 1]} : vector<24x96xf32> to vector<24x8xf32>
    %126 = arith.truncf %125 : vector<24x8xf32> to vector<24x8xbf16>
    %cst_36 = arith.constant dense<0.000000e+00> : vector<24x24xf32>
    %127 = tpu.matmul %122, %124, %cst_36 {dimension_numbers = #tpu.dot_dimension_numbers<[1], [1], [0], [0], [0, 0, 1, 0], [], []>} : vector<24x8xbf16>, vector<24x8xbf16>, vector<24x24xf32> -> vector<24x24xf32>
    %cst_37 = arith.constant dense<0xFF800000> : vector<24xf32>
    %128 = vector.multi_reduction <maximumf>, %127, %cst_37 [1] : vector<24x24xf32> to vector<24xf32>
    %129 = vector.shape_cast %128 : vector<24xf32> to vector<24x1xf32>
    %130 = vector.broadcast %129 : vector<24x1xf32> to vector<24x24xf32>
    %131 = arith.subf %127, %130 : vector<24x24xf32>
    %132 = math.exp %131 : vector<24x24xf32>
    %cst_38 = arith.constant dense<0.000000e+00> : vector<24xf32>
    %133 = vector.multi_reduction <add>, %132, %cst_38 [1] : vector<24x24xf32> to vector<24xf32>
    %134 = vector.shape_cast %133 : vector<24xf32> to vector<24x1xf32>
    %135 = tpu.reciprocal %134 {approx = true} : vector<24x1xf32> -> vector<24x1xf32>
    %136 = vector.broadcast %135 : vector<24x1xf32> to vector<24x24xf32>
    %137 = arith.mulf %132, %136 : vector<24x24xf32>
    %138 = arith.truncf %137 : vector<24x24xf32> to vector<24x24xbf16>
    %cst_39 = arith.constant dense<0.000000e+00> : vector<24x8xf32>
    %139 = tpu.matmul %138, %126, %cst_39 {dimension_numbers = #tpu.dot_dimension_numbers<[1], [0], [0], [1], [0, 0, 1, 1], [], []>} : vector<24x24xbf16>, vector<24x8xbf16>, vector<24x8xf32> -> vector<24x8xf32>
    %140 = arith.truncf %139 : vector<24x8xf32> to vector<24x8xbf16>
    %141 = vector.extract_strided_slice %44 {offsets = [24, 0], sizes = [8, 32], strides = [1, 1]} : vector<32x32xbf16> to vector<8x32xbf16>
    %cst_40 = arith.constant dense<0.000000e+00> : vector<24x32xf32>
    %142 = tpu.matmul %140, %141, %cst_40 {dimension_numbers = #tpu.dot_dimension_numbers<[1], [0], [0], [1], [0, 0, 1, 1], [], []>} : vector<24x8xbf16>, vector<8x32xbf16>, vector<24x32xf32> -> vector<24x32xf32>
    %143 = arith.addf %118, %142 : vector<24x32xf32>
    %144 = arith.addf %3, %143 : vector<24x32xf32>
    %145 = arith.index_cast %arg1 : i32 to index
    %c0_41 = arith.constant 0 : index
    %c0_42 = arith.constant 0 : index
    %146 = vector.load %arg13[%145, %c0_41, %c0_42] : memref<2x1x32xf32, #tpu.memory_space<vmem>>, vector<1x1x32xf32>
    %147 = vector.shape_cast %146 : vector<1x1x32xf32> to vector<1x32xf32>
    %148 = vector.broadcast %147 : vector<1x32xf32> to vector<24x32xf32>
    %149 = arith.addf %144, %148 : vector<24x32xf32>
    %150 = arith.index_cast %arg1 : i32 to index
    %c0_43 = arith.constant 0 : index
    %c0_44 = arith.constant 0 : index
    %151 = vector.load %arg8[%150, %c0_43, %c0_44] : memref<2x1x32xf32, #tpu.memory_space<vmem>>, vector<1x1x32xf32>
    %152 = vector.shape_cast %151 : vector<1x1x32xf32> to vector<1x32xf32>
    %153 = arith.index_cast %arg1 : i32 to index
    %c0_45 = arith.constant 0 : index
    %c0_46 = arith.constant 0 : index
    %154 = vector.load %arg9[%153, %c0_45, %c0_46] : memref<2x1x32xf32, #tpu.memory_space<vmem>>, vector<1x1x32xf32>
    %155 = vector.shape_cast %154 : vector<1x1x32xf32> to vector<1x32xf32>
    %cst_47 = arith.constant dense<0.000000e+00> : vector<24xf32>
    %156 = vector.multi_reduction <add>, %149, %cst_47 [1] : vector<24x32xf32> to vector<24xf32>
    %157 = vector.shape_cast %156 : vector<24xf32> to vector<24x1xf32>
    %cst_48 = arith.constant 3.200000e+01 : f32
    %158 = vector.broadcast %cst_48 : f32 to vector<24x1xf32>
    %159 = arith.divf %157, %158 : vector<24x1xf32>
    %160 = vector.broadcast %159 : vector<24x1xf32> to vector<24x32xf32>
    %161 = arith.subf %149, %160 : vector<24x32xf32>
    %162 = arith.mulf %161, %161 : vector<24x32xf32>
    %cst_49 = arith.constant dense<0.000000e+00> : vector<24xf32>
    %163 = vector.multi_reduction <add>, %162, %cst_49 [1] : vector<24x32xf32> to vector<24xf32>
    %164 = vector.shape_cast %163 : vector<24xf32> to vector<24x1xf32>
    %cst_50 = arith.constant 3.200000e+01 : f32
    %165 = vector.broadcast %cst_50 : f32 to vector<24x1xf32>
    %166 = arith.divf %164, %165 : vector<24x1xf32>
    %167 = vector.broadcast %159 : vector<24x1xf32> to vector<24x32xf32>
    %168 = arith.subf %149, %167 : vector<24x32xf32>
    %cst_51 = arith.constant 9.99999974E-6 : f32
    %169 = vector.broadcast %cst_51 : f32 to vector<24x1xf32>
    %170 = arith.addf %166, %169 : vector<24x1xf32>
    %171 = math.rsqrt %170 : vector<24x1xf32>
    %172 = vector.broadcast %171 : vector<24x1xf32> to vector<24x32xf32>
    %173 = arith.mulf %168, %172 : vector<24x32xf32>
    %174 = vector.broadcast %152 : vector<1x32xf32> to vector<24x32xf32>
    %175 = arith.mulf %173, %174 : vector<24x32xf32>
    %176 = vector.broadcast %155 : vector<1x32xf32> to vector<24x32xf32>
    %177 = arith.addf %175, %176 : vector<24x32xf32>
    %178 = arith.truncf %177 : vector<24x32xf32> to vector<24x32xbf16>
    %179 = arith.index_cast %arg1 : i32 to index
    %c0_52 = arith.constant 0 : index
    %c0_53 = arith.constant 0 : index
    %180 = vector.load %arg14[%179, %c0_52, %c0_53] : memref<2x32x64xbf16, #tpu.memory_space<vmem>>, vector<1x32x64xbf16>
    %181 = vector.shape_cast %180 : vector<1x32x64xbf16> to vector<32x64xbf16>
    %cst_54 = arith.constant dense<0.000000e+00> : vector<24x64xf32>
    %182 = tpu.matmul %178, %181, %cst_54 {dimension_numbers = #tpu.dot_dimension_numbers<[1], [0], [0], [1], [0, 0, 1, 1], [], []>} : vector<24x32xbf16>, vector<32x64xbf16>, vector<24x64xf32> -> vector<24x64xf32>
    %183 = arith.index_cast %arg1 : i32 to index
    %c0_55 = arith.constant 0 : index
    %c0_56 = arith.constant 0 : index
    %184 = vector.load %arg15[%183, %c0_55, %c0_56] : memref<2x1x64xf32, #tpu.memory_space<vmem>>, vector<1x1x64xf32>
    %185 = vector.shape_cast %184 : vector<1x1x64xf32> to vector<1x64xf32>
    %186 = vector.broadcast %185 : vector<1x64xf32> to vector<24x64xf32>
    %187 = arith.addf %182, %186 : vector<24x64xf32>
    %cst_57 = arith.constant 5.000000e-01 : f32
    %188 = vector.broadcast %cst_57 : f32 to vector<24x64xf32>
    %189 = arith.mulf %188, %187 : vector<24x64xf32>
    %cst_58 = arith.constant 0.707106769 : f32
    %190 = vector.broadcast %cst_58 : f32 to vector<24x64xf32>
    %191 = arith.mulf %187, %190 : vector<24x64xf32>
    %192 = math.absf %191 : vector<24x64xf32>
    %cst_59 = arith.constant 0.327591091 : f32
    %193 = vector.broadcast %cst_59 : f32 to vector<24x64xf32>
    %194 = arith.mulf %193, %192 : vector<24x64xf32>
    %cst_60 = arith.constant 1.000000e+00 : f32
    %195 = vector.broadcast %cst_60 : f32 to vector<24x64xf32>
    %196 = arith.addf %195, %194 : vector<24x64xf32>
    %cst_61 = arith.constant 1.000000e+00 : f32
    %197 = vector.broadcast %cst_61 : f32 to vector<24x64xf32>
    %198 = arith.divf %197, %196 : vector<24x64xf32>
    %cst_62 = arith.constant 1.06140542 : f32
    %199 = vector.broadcast %cst_62 : f32 to vector<24x64xf32>
    %200 = arith.mulf %198, %199 : vector<24x64xf32>
    %cst_63 = arith.constant -1.45315206 : f32
    %201 = vector.broadcast %cst_63 : f32 to vector<24x64xf32>
    %202 = arith.addf %201, %200 : vector<24x64xf32>
    %203 = arith.mulf %198, %202 : vector<24x64xf32>
    %cst_64 = arith.constant 1.42141378 : f32
    %204 = vector.broadcast %cst_64 : f32 to vector<24x64xf32>
    %205 = arith.addf %204, %203 : vector<24x64xf32>
    %206 = arith.mulf %198, %205 : vector<24x64xf32>
    %cst_65 = arith.constant -0.284496725 : f32
    %207 = vector.broadcast %cst_65 : f32 to vector<24x64xf32>
    %208 = arith.addf %207, %206 : vector<24x64xf32>
    %209 = arith.mulf %198, %208 : vector<24x64xf32>
    %cst_66 = arith.constant 0.254829586 : f32
    %210 = vector.broadcast %cst_66 : f32 to vector<24x64xf32>
    %211 = arith.addf %210, %209 : vector<24x64xf32>
    %212 = arith.mulf %198, %211 : vector<24x64xf32>
    %cst_67 = arith.constant 0.000000e+00 : f32
    %213 = vector.broadcast %cst_67 : f32 to vector<24x64xf32>
    %214 = arith.subf %213, %192 : vector<24x64xf32>
    %215 = arith.mulf %214, %192 : vector<24x64xf32>
    %216 = math.exp %215 : vector<24x64xf32>
    %217 = arith.mulf %212, %216 : vector<24x64xf32>
    %cst_68 = arith.constant 1.000000e+00 : f32
    %218 = vector.broadcast %cst_68 : f32 to vector<24x64xf32>
    %219 = arith.subf %218, %217 : vector<24x64xf32>
    %cst_69 = arith.constant 0.000000e+00 : f32
    %220 = vector.broadcast %cst_69 : f32 to vector<24x64xf32>
    %221 = arith.cmpf oge, %191, %220 : vector<24x64xf32>
    %cst_70 = arith.constant 0.000000e+00 : f32
    %222 = vector.broadcast %cst_70 : f32 to vector<24x64xf32>
    %223 = arith.subf %222, %219 : vector<24x64xf32>
    %224 = arith.select %221, %219, %223 : vector<24x64xi1>, vector<24x64xf32>
    %cst_71 = arith.constant 1.000000e+00 : f32
    %225 = vector.broadcast %cst_71 : f32 to vector<24x64xf32>
    %226 = arith.addf %225, %224 : vector<24x64xf32>
    %227 = arith.mulf %189, %226 : vector<24x64xf32>
    %228 = arith.truncf %227 : vector<24x64xf32> to vector<24x64xbf16>
    %229 = arith.index_cast %arg1 : i32 to index
    %c0_72 = arith.constant 0 : index
    %c0_73 = arith.constant 0 : index
    %230 = vector.load %arg16[%229, %c0_72, %c0_73] : memref<2x64x32xbf16, #tpu.memory_space<vmem>>, vector<1x64x32xbf16>
    %231 = vector.shape_cast %230 : vector<1x64x32xbf16> to vector<64x32xbf16>
    %cst_74 = arith.constant dense<0.000000e+00> : vector<24x32xf32>
    %232 = tpu.matmul %228, %231, %cst_74 {dimension_numbers = #tpu.dot_dimension_numbers<[1], [0], [0], [1], [0, 0, 1, 1], [], []>} : vector<24x64xbf16>, vector<64x32xbf16>, vector<24x32xf32> -> vector<24x32xf32>
    %233 = arith.addf %149, %232 : vector<24x32xf32>
    %234 = arith.index_cast %arg1 : i32 to index
    %c0_75 = arith.constant 0 : index
    %c0_76 = arith.constant 0 : index
    %235 = vector.load %arg17[%234, %c0_75, %c0_76] : memref<2x1x32xf32, #tpu.memory_space<vmem>>, vector<1x1x32xf32>
    %236 = vector.shape_cast %235 : vector<1x1x32xf32> to vector<1x32xf32>
    %237 = vector.broadcast %236 : vector<1x32xf32> to vector<24x32xf32>
    %238 = arith.addf %233, %237 : vector<24x32xf32>
    %c0_77 = arith.constant 0 : index
    %c0_78 = arith.constant 0 : index
    %239 = vector.load %arg25[%c0_77, %c0_78] : memref<24x32xf32, #tpu.memory_space<vmem>>, vector<24x32xf32>
    tpu.vector_store %arg25[%c0_77, %c0_78], %238 {strides = array<i32>} : memref<24x32xf32, #tpu.memory_space<vmem>>, vector<24x32xf32>,
    %c1_i32 = arith.constant 1 : i32
    %240 = arith.cmpi eq, %arg1, %c1_i32 : i32
    %241 = arith.extui %240 : i1 to i32
    %c0_i32_79 = arith.constant 0 : i32
    %242 = arith.cmpi ne, %241, %c0_i32_79 : i32
    scf.if %242 {
      %c0_80 = arith.constant 0 : index
      %c0_81 = arith.constant 0 : index
      %243 = vector.load %arg18[%c0_80, %c0_81] : memref<1x32xf32, #tpu.memory_space<vmem>>, vector<1x32xf32>
      %c0_82 = arith.constant 0 : index
      %c0_83 = arith.constant 0 : index
      %244 = vector.load %arg19[%c0_82, %c0_83] : memref<1x32xf32, #tpu.memory_space<vmem>>, vector<1x32xf32>
      %cst_84 = arith.constant dense<0.000000e+00> : vector<24xf32>
      %245 = vector.multi_reduction <add>, %238, %cst_84 [1] : vector<24x32xf32> to vector<24xf32>
      %246 = vector.shape_cast %245 : vector<24xf32> to vector<24x1xf32>
      %cst_85 = arith.constant 3.200000e+01 : f32
      %247 = vector.broadcast %cst_85 : f32 to vector<24x1xf32>
      %248 = arith.divf %246, %247 : vector<24x1xf32>
      %249 = vector.broadcast %248 : vector<24x1xf32> to vector<24x32xf32>
      %250 = arith.subf %238, %249 : vector<24x32xf32>
      %251 = arith.mulf %250, %250 : vector<24x32xf32>
      %cst_86 = arith.constant dense<0.000000e+00> : vector<24xf32>
      %252 = vector.multi_reduction <add>, %251, %cst_86 [1] : vector<24x32xf32> to vector<24xf32>
      %253 = vector.shape_cast %252 : vector<24xf32> to vector<24x1xf32>
      %cst_87 = arith.constant 3.200000e+01 : f32
      %254 = vector.broadcast %cst_87 : f32 to vector<24x1xf32>
      %255 = arith.divf %253, %254 : vector<24x1xf32>
      %256 = vector.broadcast %248 : vector<24x1xf32> to vector<24x32xf32>
      %257 = arith.subf %238, %256 : vector<24x32xf32>
      %cst_88 = arith.constant 9.99999974E-6 : f32
      %258 = vector.broadcast %cst_88 : f32 to vector<24x1xf32>
      %259 = arith.addf %255, %258 : vector<24x1xf32>
      %260 = math.rsqrt %259 : vector<24x1xf32>
      %261 = vector.broadcast %260 : vector<24x1xf32> to vector<24x32xf32>
      %262 = arith.mulf %257, %261 : vector<24x32xf32>
      %263 = vector.broadcast %243 : vector<1x32xf32> to vector<24x32xf32>
      %264 = arith.mulf %262, %263 : vector<24x32xf32>
      %265 = vector.broadcast %244 : vector<1x32xf32> to vector<24x32xf32>
      %266 = arith.addf %264, %265 : vector<24x32xf32>
      %267 = vector.extract_strided_slice %266 {offsets = [0, 0], sizes = [16, 32], strides = [1, 1]} : vector<24x32xf32> to vector<16x32xf32>
      %268 = arith.truncf %267 : vector<16x32xf32> to vector<16x32xbf16>
      %c0_89 = arith.constant 0 : index
      %c0_90 = arith.constant 0 : index
      %269 = vector.load %arg20[%c0_89, %c0_90] : memref<32x32xbf16, #tpu.memory_space<vmem>>, vector<32x32xbf16>
      %cst_91 = arith.constant dense<0.000000e+00> : vector<16x32xf32>
      %270 = tpu.matmul %268, %269, %cst_91 {dimension_numbers = #tpu.dot_dimension_numbers<[1], [0], [0], [1], [0, 0, 1, 1], [], []>} : vector<16x32xbf16>, vector<32x32xbf16>, vector<16x32xf32> -> vector<16x32xf32>
      %271 = vector.extract_strided_slice %266 {offsets = [16, 0], sizes = [8, 32], strides = [1, 1]} : vector<24x32xf32> to vector<8x32xf32>
      %272 = arith.truncf %271 : vector<8x32xf32> to vector<8x32xbf16>
      %c0_92 = arith.constant 0 : index
      %c0_93 = arith.constant 0 : index
      %273 = vector.load %arg21[%c0_92, %c0_93] : memref<32x32xbf16, #tpu.memory_space<vmem>>, vector<32x32xbf16>
      %cst_94 = arith.constant dense<0.000000e+00> : vector<8x32xf32>
      %274 = tpu.matmul %272, %273, %cst_94 {dimension_numbers = #tpu.dot_dimension_numbers<[1], [0], [0], [1], [0, 0, 1, 1], [], []>} : vector<8x32xbf16>, vector<32x32xbf16>, vector<8x32xf32> -> vector<8x32xf32>
      %275 = arith.mulf %270, %270 : vector<16x32xf32>
      %cst_95 = arith.constant dense<0.000000e+00> : vector<16xf32>
      %276 = vector.multi_reduction <add>, %275, %cst_95 [1] : vector<16x32xf32> to vector<16xf32>
      %277 = vector.shape_cast %276 : vector<16xf32> to vector<16x1xf32>
      %278 = math.rsqrt %277 : vector<16x1xf32>
      %279 = vector.broadcast %278 : vector<16x1xf32> to vector<16x32xf32>
      %280 = arith.mulf %270, %279 : vector<16x32xf32>
      %281 = arith.mulf %274, %274 : vector<8x32xf32>
      %cst_96 = arith.constant dense<0.000000e+00> : vector<8xf32>
      %282 = vector.multi_reduction <add>, %281, %cst_96 [1] : vector<8x32xf32> to vector<8xf32>
      %283 = vector.shape_cast %282 : vector<8xf32> to vector<8x1xf32>
      %284 = math.rsqrt %283 : vector<8x1xf32>
      %285 = vector.broadcast %284 : vector<8x1xf32> to vector<8x32xf32>
      %286 = arith.mulf %274, %285 : vector<8x32xf32>
      %cst_97 = arith.constant dense<0.000000e+00> : vector<8x16xf32>
      %287 = tpu.matmul %286, %280, %cst_97 {dimension_numbers = #tpu.dot_dimension_numbers<[1], [1], [0], [0], [0, 0, 1, 0], [], []>} : vector<8x32xf32>, vector<16x32xf32>, vector<8x16xf32> -> vector<8x16xf32>
      %cst_98 = arith.constant dense<0.000000e+00> : vector<16xf32>
      %288 = vector.multi_reduction <add>, %287, %cst_98 [0] : vector<8x16xf32> to vector<16xf32>
      %289 = vector.shape_cast %288 : vector<16xf32> to vector<1x16xf32>
      %cst_99 = arith.constant 8.000000e+00 : f32
      %290 = vector.broadcast %cst_99 : f32 to vector<1x16xf32>
      %291 = arith.divf %289, %290 : vector<1x16xf32>
      %292 = vector.broadcast %291 : vector<1x16xf32> to vector<8x16xf32>
      %293 = arith.subf %287, %292 : vector<8x16xf32>
      %294 = arith.mulf %293, %293 : vector<8x16xf32>
      %cst_100 = arith.constant dense<0.000000e+00> : vector<16xf32>
      %295 = vector.multi_reduction <add>, %294, %cst_100 [0] : vector<8x16xf32> to vector<16xf32>
      %296 = vector.shape_cast %295 : vector<16xf32> to vector<1x16xf32>
      %cst_101 = arith.constant 8.000000e+00 : f32
      %297 = vector.broadcast %cst_101 : f32 to vector<1x16xf32>
      %298 = arith.divf %296, %297 : vector<1x16xf32>
      %299 = vector.broadcast %291 : vector<1x16xf32> to vector<8x16xf32>
      %300 = arith.subf %287, %299 : vector<8x16xf32>
      %cst_102 = arith.constant 9.99999974E-6 : f32
      %301 = vector.broadcast %cst_102 : f32 to vector<1x16xf32>
      %302 = arith.addf %298, %301 : vector<1x16xf32>
      %303 = math.rsqrt %302 : vector<1x16xf32>
      %304 = vector.broadcast %303 : vector<1x16xf32> to vector<8x16xf32>
      %305 = arith.mulf %300, %304 : vector<8x16xf32>
      %c0_103 = arith.constant 0 : index
      %c0_104 = arith.constant 0 : index
      %306 = vector.load %arg22[%c0_103, %c0_104] : memref<8x1xf32, #tpu.memory_space<vmem>>, vector<8x1xf32>
      %307 = vector.broadcast %306 : vector<8x1xf32> to vector<8x16xf32>
      %308 = arith.mulf %305, %307 : vector<8x16xf32>
      %c0_105 = arith.constant 0 : index
      %c0_106 = arith.constant 0 : index
      %309 = vector.load %arg23[%c0_105, %c0_106] : memref<8x1xf32, #tpu.memory_space<vmem>>, vector<8x1xf32>
      %310 = vector.broadcast %309 : vector<8x1xf32> to vector<8x16xf32>
      %311 = arith.addf %308, %310 : vector<8x16xf32>
      %c0_107 = arith.constant 0 : index
      %c0_108 = arith.constant 0 : index
      %c0_109 = arith.constant 0 : index
      %312 = vector.load %arg24[%c0_107, %c0_108, %c0_109] : memref<1x8x16xf32, #tpu.memory_space<vmem>>, vector<1x8x16xf32>
      %313 = vector.shape_cast %312 : vector<1x8x16xf32> to vector<8x16xf32>
      %314 = vector.shape_cast %311 : vector<8x16xf32> to vector<1x8x16xf32>
      tpu.vector_store %arg24[%c0_107, %c0_108, %c0_109], %314 {strides = array<i32>} : memref<1x8x16xf32, #tpu.memory_space<vmem>>, vector<1x8x16xf32>,
    } else {
    }
    return
  }
  func.func @transform_0(%arg0: i32, %arg1: i32) -> (i32, i32, i32) {
    %c0_i32 = arith.constant 0 : i32
    %c0_i32_0 = arith.constant 0 : i32
    %c0_i32_1 = arith.constant 0 : i32
    return %arg0, %c0_i32, %c0_i32_0 : i32, i32, i32
  }
  func.func @transform_1(%arg0: i32, %arg1: i32) -> (i32, i32, i32) {
    %c0_i32 = arith.constant 0 : i32
    %c0_i32_0 = arith.constant 0 : i32
    %c0_i32_1 = arith.constant 0 : i32
    %c0_i32_2 = arith.constant 0 : i32
    return %c0_i32, %c0_i32_0, %c0_i32_1 : i32, i32, i32
  }
  func.func @transform_2(%arg0: i32, %arg1: i32) -> (i32, i32) {
    %c0_i32 = arith.constant 0 : i32
    %c0_i32_0 = arith.constant 0 : i32
    %c0_i32_1 = arith.constant 0 : i32
    return %c0_i32, %c0_i32_0 : i32, i32
  }
  func.func @transform_3(%arg0: i32, %arg1: i32) -> (i32, i32) {
    %c0_i32 = arith.constant 0 : i32
    %c0_i32_0 = arith.constant 0 : i32
    %c0_i32_1 = arith.constant 0 : i32
    return %c0_i32, %c0_i32_0 : i32, i32
  }
  func.func @transform_4(%arg0: i32, %arg1: i32) -> (i32, i32, i32) {
    %c0_i32 = arith.constant 0 : i32
    %c0_i32_0 = arith.constant 0 : i32
    %c0_i32_1 = arith.constant 0 : i32
    %c0_i32_2 = arith.constant 0 : i32
    return %c0_i32, %c0_i32_0, %c0_i32_1 : i32, i32, i32
  }
  func.func @transform_5(%arg0: i32, %arg1: i32) -> (i32, i32, i32) {
    %c0_i32 = arith.constant 0 : i32
    %c0_i32_0 = arith.constant 0 : i32
    %c0_i32_1 = arith.constant 0 : i32
    %c0_i32_2 = arith.constant 0 : i32
    return %c0_i32, %c0_i32_0, %c0_i32_1 : i32, i32, i32
  }
  func.func @transform_6(%arg0: i32, %arg1: i32) -> (i32, i32, i32) {
    %c0_i32 = arith.constant 0 : i32
    %c0_i32_0 = arith.constant 0 : i32
    %c0_i32_1 = arith.constant 0 : i32
    %c0_i32_2 = arith.constant 0 : i32
    return %c0_i32, %c0_i32_0, %c0_i32_1 : i32, i32, i32
  }
  func.func @transform_7(%arg0: i32, %arg1: i32) -> (i32, i32, i32) {
    %c0_i32 = arith.constant 0 : i32
    %c0_i32_0 = arith.constant 0 : i32
    %c0_i32_1 = arith.constant 0 : i32
    %c0_i32_2 = arith.constant 0 : i32
    return %c0_i32, %c0_i32_0, %c0_i32_1 : i32, i32, i32
  }
  func.func @transform_8(%arg0: i32, %arg1: i32) -> (i32, i32, i32) {
    %c0_i32 = arith.constant 0 : i32
    %c0_i32_0 = arith.constant 0 : i32
    %c0_i32_1 = arith.constant 0 : i32
    %c0_i32_2 = arith.constant 0 : i32
    return %c0_i32, %c0_i32_0, %c0_i32_1 : i32, i32, i32
  }
  func.func @transform_9(%arg0: i32, %arg1: i32) -> (i32, i32, i32) {
    %c0_i32 = arith.constant 0 : i32
    %c0_i32_0 = arith.constant 0 : i32
    %c0_i32_1 = arith.constant 0 : i32
    %c0_i32_2 = arith.constant 0 : i32
    return %c0_i32, %c0_i32_0, %c0_i32_1 : i32, i32, i32
  }
  func.func @transform_10(%arg0: i32, %arg1: i32) -> (i32, i32, i32) {
    %c0_i32 = arith.constant 0 : i32
    %c0_i32_0 = arith.constant 0 : i32
    %c0_i32_1 = arith.constant 0 : i32
    %c0_i32_2 = arith.constant 0 : i32
    return %c0_i32, %c0_i32_0, %c0_i32_1 : i32, i32, i32
  }
  func.func @transform_11(%arg0: i32, %arg1: i32) -> (i32, i32, i32) {
    %c0_i32 = arith.constant 0 : i32
    %c0_i32_0 = arith.constant 0 : i32
    %c0_i32_1 = arith.constant 0 : i32
    %c0_i32_2 = arith.constant 0 : i32
    return %c0_i32, %c0_i32_0, %c0_i32_1 : i32, i32, i32
  }
  func.func @transform_12(%arg0: i32, %arg1: i32) -> (i32, i32, i32) {
    %c0_i32 = arith.constant 0 : i32
    %c0_i32_0 = arith.constant 0 : i32
    %c0_i32_1 = arith.constant 0 : i32
    %c0_i32_2 = arith.constant 0 : i32
    return %c0_i32, %c0_i32_0, %c0_i32_1 : i32, i32, i32
  }
  func.func @transform_13(%arg0: i32, %arg1: i32) -> (i32, i32, i32) {
    %c0_i32 = arith.constant 0 : i32
    %c0_i32_0 = arith.constant 0 : i32
    %c0_i32_1 = arith.constant 0 : i32
    %c0_i32_2 = arith.constant 0 : i32
    return %c0_i32, %c0_i32_0, %c0_i32_1 : i32, i32, i32
  }
  func.func @transform_14(%arg0: i32, %arg1: i32) -> (i32, i32, i32) {
    %c0_i32 = arith.constant 0 : i32
    %c0_i32_0 = arith.constant 0 : i32
    %c0_i32_1 = arith.constant 0 : i32
    %c0_i32_2 = arith.constant 0 : i32
    return %c0_i32, %c0_i32_0, %c0_i32_1 : i32, i32, i32
  }
  func.func @transform_15(%arg0: i32, %arg1: i32) -> (i32, i32, i32) {
    %c0_i32 = arith.constant 0 : i32
    %c0_i32_0 = arith.constant 0 : i32
    %c0_i32_1 = arith.constant 0 : i32
    %c0_i32_2 = arith.constant 0 : i32
    return %c0_i32, %c0_i32_0, %c0_i32_1 : i32, i32, i32
  }
  func.func @transform_16(%arg0: i32, %arg1: i32) -> (i32, i32) {
    %c0_i32 = arith.constant 0 : i32
    %c0_i32_0 = arith.constant 0 : i32
    %c0_i32_1 = arith.constant 0 : i32
    return %c0_i32, %c0_i32_0 : i32, i32
  }
  func.func @transform_17(%arg0: i32, %arg1: i32) -> (i32, i32) {
    %c0_i32 = arith.constant 0 : i32
    %c0_i32_0 = arith.constant 0 : i32
    %c0_i32_1 = arith.constant 0 : i32
    return %c0_i32, %c0_i32_0 : i32, i32
  }
  func.func @transform_18(%arg0: i32, %arg1: i32) -> (i32, i32) {
    %c0_i32 = arith.constant 0 : i32
    %c0_i32_0 = arith.constant 0 : i32
    %c0_i32_1 = arith.constant 0 : i32
    return %c0_i32, %c0_i32_0 : i32, i32
  }
  func.func @transform_19(%arg0: i32, %arg1: i32) -> (i32, i32) {
    %c0_i32 = arith.constant 0 : i32
    %c0_i32_0 = arith.constant 0 : i32
    %c0_i32_1 = arith.constant 0 : i32
    return %c0_i32, %c0_i32_0 : i32, i32
  }
  func.func @transform_20(%arg0: i32, %arg1: i32) -> (i32, i32) {
    %c0_i32 = arith.constant 0 : i32
    %c0_i32_0 = arith.constant 0 : i32
    %c0_i32_1 = arith.constant 0 : i32
    return %c0_i32, %c0_i32_0 : i32, i32
  }
  func.func @transform_21(%arg0: i32, %arg1: i32) -> (i32, i32) {
    %c0_i32 = arith.constant 0 : i32
    %c0_i32_0 = arith.constant 0 : i32
    %c0_i32_1 = arith.constant 0 : i32
    return %c0_i32, %c0_i32_0 : i32, i32
  }
  func.func @transform_22(%arg0: i32, %arg1: i32) -> (i32, i32, i32) {
    %c0_i32 = arith.constant 0 : i32
    %c0_i32_0 = arith.constant 0 : i32
    %c0_i32_1 = arith.constant 0 : i32
    return %arg0, %c0_i32, %c0_i32_0 : i32, i32, i32
  }
}

</mosaic_0001>

<bundles_post_ra>
// kernel: tpu_custom_call.1
= control target key start
LH: loop header
LB: loop body
LE: loop exit
PB: predicated region body
PF: predicated region fallthrough
CT: control target
= control target key end

     0   :  { %s5789_s0 = inlined_call_operand.hbm [shape: f32[2,16,32], index: 0, kind: input, shape index: {}]   ;;  %s5790_s1 = inlined_call_operand.hbm [shape: f32[1,8,32], index: 1, kind: input, shape index: {}]   ;;  %s5791_s2 = inlined_call_operand.hbm [shape: bf16[32,32], index: 2, kind: input, shape index: {}]   ;;  %s5792_s3 = inlined_call_operand.hbm [shape: f32[1,32], index: 3, kind: input, shape index: {}]   ;;  %s5793_s4 = inlined_call_operand.hbm [shape: f32[2,1,32], index: 4, kind: input, shape index: {}]   ;;  %s5794_s5 = inlined_call_operand.hbm [shape: f32[2,1,32], index: 5, kind: input, shape index: {}]   ;;  %s5795_s6 = inlined_call_operand.hbm [shape: f32[2,1,32], index: 6, kind: input, shape index: {}]   ;;  %s5796_s7 = inlined_call_operand.hbm [shape: f32[2,1,32], index: 7, kind: input, shape index: {}]   ;;  %s5797_s8 = inlined_call_operand.hbm [shape: bf16[2,32,96], index: 8, kind: input, shape index: {}]   ;;  %s5798_s9 = inlined_call_operand.hbm [shape: f32[2,1,96], index: 9, kind: input, shape index: {}]   ;;  %s5799_s10 = inlined_call_operand.hbm [shape: bf16[2,32,32], index: 10, kind: input, shape index: {}]   ;;  %s5800_s11 = inlined_call_operand.hbm [shape: f32[2,1,32], index: 11, kind: input, shape index: {}]   ;;  %s5801_s12 = inlined_call_operand.hbm [shape: bf16[2,32,64], index: 12, kind: input, shape index: {}]   ;;  %s5802_s13 = inlined_call_operand.hbm [shape: f32[2,1,64], index: 13, kind: input, shape index: {}]   ;;  %s5803_s14 = inlined_call_operand.hbm [shape: bf16[2,64,32], index: 14, kind: input, shape index: {}]   ;;  %s5804_s15 = inlined_call_operand.hbm [shape: f32[2,1,32], index: 15, kind: input, shape index: {}]   ;;  %s5805_s16 = inlined_call_operand.hbm [shape: f32[1,32], index: 16, kind: input, shape index: {}]   ;;  %s5806_s17 = inlined_call_operand.hbm [shape: f32[1,32], index: 17, kind: input, shape index: {}]   ;;  %s5807_s18 = inlined_call_operand.hbm [shape: bf16[32,32], index: 18, kind: input, shape index: {}]   ;;  %s5808_s19 = inlined_call_operand.hbm [shape: bf16[32,32], index: 19, kind: input, shape index: {}]   ;;  %s5809_s20 = inlined_call_operand.hbm [shape: f32[8,1], index: 20, kind: input, shape index: {}]   ;;  %s5810_s21 = inlined_call_operand.hbm [shape: f32[8,1], index: 21, kind: input, shape index: {}]   ;;  %s5811_s22 = inlined_call_operand.hbm [shape: f32[2,8,16], index: 22, kind: output, shape index: {}]  }
   0x1   :  { %5851 = sst [smem:[#allocation62_spill]] %s5789_s0 }
   0x2   :  { %5852 = sst [smem:[#allocation63_spill]] %s5790_s1 }
   0x3   :  { %5853 = sst [smem:[#allocation64_spill]] %s5791_s2 }
   0x4   :  { %5854 = sst [smem:[#allocation65_spill]] %s5792_s3 }
   0x5   :  { %5855 = sst [smem:[#allocation66_spill]] %s5793_s4 }
   0x6   :  { %5856 = sst [smem:[#allocation67_spill]] %s5794_s5 }
   0x7   :  { %5857 = sst [smem:[#allocation68_spill]] %s5795_s6 }
   0x8   :  { %5858 = sst [smem:[#allocation69_spill]] %s5796_s7 }
   0x9   :  { %5859 = sst [smem:[#allocation70_spill]] %s5797_s8 }
   0xa   :  { %5860 = sst [smem:[#allocation71_spill]] %s5798_s9 }
   0xb   :  { %5861 = sst [smem:[#allocation72_spill]] %s5799_s10 }
   0xc   :  { %5862 = sst [smem:[#allocation73_spill]] %s5800_s11 }
   0xd   :  { %5863 = sst [smem:[#allocation74_spill]] %s5801_s12 }
   0xe   :  { %5864 = sst [smem:[#allocation75_spill]] %s5807_s18 }
   0xf   :  { %5865 = sst [smem:[#allocation76_spill]] %s5809_s20 }
  0x10   :  { %5866 = sst [smem:[#allocation77_spill]] %s5810_s21 }
  0x11   :  { %5867 = sst [smem:[#allocation78_spill]] %s5811_s22 }
  0x12   :  { %27 = vsyncpa [#allocation4], 0 }
  0x13   :  { %29 = vsyncpa [#allocation4 + $0x1], 0 }
  0x14   :  { %30 = vsyncpa [#allocation7], 0 }
  0x15   :  { %31 = vsyncpa [#allocation10], 0 }
  0x16   :  { %32 = vsyncpa [#allocation13], 0 }
  0x17   :  { %33 = vsyncpa [#allocation16], 0 }
  0x18   :  { %34 = vsyncpa [#allocation19], 0 }
  0x19   :  { %35 = vsyncpa [#allocation22], 0 }
  0x1a   :  { %36 = vsyncpa [#allocation25], 0 }
  0x1b   :  { %37 = vsyncpa [#allocation28], 0 }
  0x1c   :  { %38 = vsyncpa [#allocation31], 0 }
  0x1d   :  { %39 = vsyncpa [#allocation34], 0 }
  0x1e   :  { %40 = vsyncpa [#allocation37], 0 }
  0x1f   :  { %41 = vsyncpa [#allocation5], 0 }
  0x20   :  { %43 = vsyncpa [#allocation5 + $0x1], 0  ;;  %s4835_s3 = smov 0   ;;  %s4837_s28 = smov 0  }
  0x21   :  { %s4839_s29 = smov 0   ;;  %s4841_s30 = smov 0  }
  0x22   :  { %s4843_s4 = smov 0   ;;  %s4845_s0 = smov 0  }
  0x23   :  { %s4847_s23 = smov 0   ;;  %s4849_s1 = smov 0  }
  0x24 LB: > { %5868 = sst [smem:[#allocation52_spill]] %s4644_s3  ;;  %s5819_s5 = sadd.s32 4294967295, %s4672_s1   ;;  %s4672_s1 = sphi %s4849_s1, %s5941_s1   ;;  %s4668_s23 = sphi %s4847_s23, %s5940_s23   ;;  %s4664_s0 = sphi %s4845_s0, %s5939_s0   ;;  %s4660_s4 = sphi %s4843_s4, %s5937_s4   ;;  %s4656_s30 = sphi %s4841_s30, %s5936_s30   ;;  %s4652_s29 = sphi %s4839_s29, %s5938_s29   ;;  %s4648_s28 = sphi %s4837_s28, %s5935_s28   ;;  %s4644_s3 = sphi %s4835_s3, %s5934_s3  }
  0x25   : > { %5869 = sst [smem:[#allocation53_spill]] %s4648_s28  ;;  %p3133_p0 = scmp.ge.s32.totalorder %s4672_s1, 1 }
  0x26   : > { %5870 = sst [smem:[#allocation54_spill]] %s4652_s29  ;;  %p4879_p1 = scmp.eq.s32.totalorder %s5819_s5, 0 }
  0x27   : > { %5871 = sst [smem:[#allocation55_spill]] %s4656_s30  ;;  %p559_p2 = scmp.lt.s32.totalorder %s4672_s1, 5 }
  0x28   : > { %5872 = sst [smem:[#allocation56_spill]] %s4660_s4  ;;  %s4674_s25 = smov [#allocation6]  }
  0x29   : > { %5873 = sst [smem:[#allocation57_spill]] %s4664_s0  ;;  %p4884_p3 = pnand %p3133_p0, %p559_p2 }
  0x2a   : > { %5874 = sst [smem:[#allocation58_spill]] %s4668_s23  ;;  %s572_s26 = sshll.u32 %s4674_s25, 4  ;;  %s573_s26 = int_to_ptr.vmem [resolvable:$true] %s572_s26 }
  0x2b   : > { %5875 = sst [smem:[#allocation59_spill]] %s4672_s1  ;;  %p3586_p4 = pneg %p4884_p3 }
  0x2c   : > { %s5876_s24 = scalar_select %p4879_p1, 1, 0 }
  0x2d   : > { %s5878_s6 = scalar_select %p4884_p3, 1, 0 }
  0x2e   : > { %5877 = sst [smem:[#allocation60_spill]] %s5876_s24  ;;  %s4675_s2 = smov [#allocation9]  }
  0x2f   : > { %5879 = sst [smem:[#allocation61_spill]] %s5878_s6  ;;  %s596_s27 = sshll.u32 %s4675_s2, 4  ;;  %s4896_s27 = int_to_ptr.vmem [resolvable:$true] %s596_s27 }
  0x30   : > { %p4892_p5 = pnand %p3586_p4, %p4879_p1  ;;  %s4676_s22 = smov [#allocation12]  }
  0x31   : > { %s4898_s4 = sshll.u32 %s4676_s22, 4  ;;  %s5881_s28 = sld [smem:[#allocation63_spill]]  ;;  %s620_s4 = int_to_ptr.vmem [resolvable:$true] %s4898_s4 }
  0x32   : > { %p4908_p7 = pneg %p4892_p5 }
  0x37   : > { %s5882_s21 = smov %s5881_s28  ;;  %s3912_s25 = scalar_lea.hbm %s5881_s28, 128 }
  0x38   : > { %p3913_p6 = scmp.ne.s32.totalorder %s5882_s21, %s3912_s25  ;;  %p3919_p10 = scmp.lt.u32.totalorder %s3912_s25, %s5882_s21 }
  0x3a   : > { %p3915_p8 = pnand %p4908_p7, %p3913_p6 }
  0x3c   : > { %p3916_p9 = pneg %p3915_p8 }
  0x3e   : > { %p3921_p11 = pnand %p3919_p10, %p3916_p9 }
  0x40   : > { %3924 = shalt.err (!%p3921_p11)
}
  0x41   : > { %s3925_s3 = scalar_lea.vmem %s573_s26, 128  ;;  %p3933_p2 = scmp.lt.s32.totalorder %s573_s26, %s573_s26 }
  0x42   : > { %p3926_p12 = scmp.ne.s32.totalorder %s573_s26, %s3925_s3  ;;  %p3934_p4 = scmp.lt.s32.totalorder %s3925_s3, %s3925_s3 }
  0x44   : > { %p3928_p13 = pnand %p3926_p12, %p4908_p7  ;;  %p3935_p3 = por %p3934_p4, %p3933_p2 }
  0x46   : > { %p3929_p0 = pneg %p3928_p13 }
  0x48   : > { %p3936_p1 = pnand %p3935_p3, %p3929_p0 }
  0x4a   : > { %3939 = shalt.err (!%p3936_p1)
}
  0x4b   : > { %3589 = dma.hbm_to_vmem [thread:$0]  (!%p4892_p5), %s5882_s21, 128, %s573_s26, [#allocation7]  }
  0x4c   : > { %s5884_s6 = sld [smem:[#allocation65_spill]] }
  0x52   : > { %s3940_s25 = scalar_lea.hbm %s5884_s6, 16 }
  0x53   : > { %p3941_p6 = scmp.ne.s32.totalorder %s5884_s6, %s3940_s25  ;;  %p3947_p1 = scmp.lt.u32.totalorder %s3940_s25, %s5884_s6 }
  0x55   : > { %p3943_p8 = pnand %p3941_p6, %p4908_p7 }
  0x57   : > { %p3944_p9 = pneg %p3943_p8 }
  0x59   : > { %p3949_p3 = pnand %p3947_p1, %p3944_p9 }
  0x5b   : > { %3952 = shalt.err (!%p3949_p3)
}
  0x5c   : > { %s3953_s26 = scalar_lea.vmem %s4896_s27, 16  ;;  %s3960_s23 = scalar_lea.vmem %s4896_s27, 32 }
  0x5d   : > { %p3954_p10 = scmp.ne.s32.totalorder %s4896_s27, %s3953_s26  ;;  %p3961_p13 = scmp.lt.s32.totalorder %s4896_s27, %s4896_s27 }
  0x5e   : > { %p3962_p0 = scmp.lt.s32.totalorder %s3960_s23, %s3953_s26 }
  0x5f   : > { %p3956_p11 = pnand %p3954_p10, %p4908_p7 }
  0x60   : > { %p3963_p2 = por %p3962_p0, %p3961_p13 }
  0x61   : > { %p3957_p12 = pneg %p3956_p11 }
  0x63   : > { %p3964_p4 = pnand %p3963_p2, %p3957_p12 }
  0x65   : > { %3967 = shalt.err (!%p3964_p4)
}
  0x66   : > { %3595 = dma.hbm_to_vmem [thread:$0]  (!%p4892_p5), %s5884_s6, 16, %s4896_s27, [#allocation10]  }
  0x67   : > { %s5885_s24 = sld [smem:[#allocation67_spill]] }
  0x6d   : > { %s3968_s25 = scalar_lea.hbm %s5885_s24, 32 }
  0x6e   : > { %p3969_p6 = scmp.ne.s32.totalorder %s5885_s24, %s3968_s25  ;;  %p3975_p1 = scmp.lt.u32.totalorder %s3968_s25, %s5885_s24 }
  0x70   : > { %p3971_p8 = pnand %p3969_p6, %p4908_p7 }
  0x72   : > { %p3972_p9 = pneg %p3971_p8 }
  0x74   : > { %p3977_p3 = pnand %p3975_p1, %p3972_p9 }
  0x76   : > { %3980 = shalt.err (!%p3977_p3)
}
  0x77   : > { %s3981_s0 = scalar_lea.vmem %s620_s4, 32  ;;  %p3989_p13 = scmp.lt.s32.totalorder %s620_s4, %s620_s4 }
  0x78   : > { %p3982_p10 = scmp.ne.s32.totalorder %s620_s4, %s3981_s0  ;;  %p3990_p0 = scmp.lt.s32.totalorder %s3981_s0, %s3981_s0 }
  0x7a   : > { %p3984_p11 = pnand %p3982_p10, %p4908_p7  ;;  %p3991_p2 = por %p3990_p0, %p3989_p13 }
  0x7c   : > { %p3985_p12 = pneg %p3984_p11 }
  0x7e   : > { %p3992_p4 = pnand %p3991_p2, %p3985_p12 }
  0x80   : > { %3995 = shalt.err (!%p3992_p4)
}
  0x81   : > { %s5839_s27 = smov 16   ;;  %s5841_s28 = smov 1  }
  0x82   : > { %3601 = dma.hbm_to_vmem [thread:$0]  (!%p4892_p5), %s5885_s24, 32, %s620_s4, [#allocation13], %s5839_s27, %s5839_s27, %s5841_s28  }
  0x83   : > { %s4679_s25 = smov [#allocation15]   ;;  %s4680_s3 = smov [#allocation18]  }
  0x84   : > { %s645_s22 = sshll.u32 %s4679_s25, 4  ;;  %s671_s26 = sshll.u32 %s4680_s3, 4  ;;  %s646_s22 = int_to_ptr.vmem [resolvable:$true] %s645_s22  ;;  %s672_s26 = int_to_ptr.vmem [resolvable:$true] %s671_s26 }
  0x85   : > { %s5886_s7 = sld [smem:[#allocation69_spill]] }
  0x8b   : > { %s3996_s6 = scalar_lea.hbm %s5886_s7, 32 }
  0x8c   : > { %p3997_p6 = scmp.ne.s32.totalorder %s5886_s7, %s3996_s6  ;;  %p4003_p1 = scmp.lt.u32.totalorder %s3996_s6, %s5886_s7 }
  0x8e   : > { %p3999_p8 = pnand %p3997_p6, %p4908_p7 }
  0x90   : > { %p4000_p9 = pneg %p3999_p8 }
  0x92   : > { %p4005_p3 = pnand %p4003_p1, %p4000_p9 }
  0x94   : > { %4008 = shalt.err (!%p4005_p3)
}
  0x95   : > { %s4009_s4 = scalar_lea.vmem %s646_s22, 32  ;;  %p4017_p13 = scmp.lt.s32.totalorder %s646_s22, %s646_s22 }
  0x96   : > { %p4010_p10 = scmp.ne.s32.totalorder %s646_s22, %s4009_s4  ;;  %p4018_p0 = scmp.lt.s32.totalorder %s4009_s4, %s4009_s4 }
  0x98   : > { %p4012_p11 = pnand %p4010_p10, %p4908_p7  ;;  %p4019_p2 = por %p4018_p0, %p4017_p13 }
  0x9a   : > { %p4013_p12 = pneg %p4012_p11 }
  0x9c   : > { %p4020_p4 = pnand %p4019_p2, %p4013_p12 }
  0x9e   : > { %4023 = shalt.err (!%p4020_p4)
}
  0x9f   : > { %3607 = dma.hbm_to_vmem [thread:$0]  (!%p4892_p5), %s5886_s7, 32, %s646_s22, [#allocation16], %s5839_s27, %s5839_s27, %s5841_s28  }
  0xa0   : > { %s5887_s9 = sld [smem:[#allocation71_spill]] }
  0xa6   : > { %s4024_s6 = scalar_lea.hbm %s5887_s9, 32 }
  0xa7   : > { %p4025_p6 = scmp.ne.s32.totalorder %s5887_s9, %s4024_s6  ;;  %p4031_p1 = scmp.lt.u32.totalorder %s4024_s6, %s5887_s9 }
  0xa9   : > { %p4027_p8 = pnand %p4025_p6, %p4908_p7 }
  0xab   : > { %p4028_p9 = pneg %p4027_p8 }
  0xad   : > { %p4033_p3 = pnand %p4031_p1, %p4028_p9 }
  0xaf   : > { %4036 = shalt.err (!%p4033_p3)
}
  0xb0   : > { %s4037_s23 = scalar_lea.vmem %s672_s26, 32  ;;  %p4045_p13 = scmp.lt.s32.totalorder %s672_s26, %s672_s26 }
  0xb1   : > { %p4038_p10 = scmp.ne.s32.totalorder %s672_s26, %s4037_s23  ;;  %p4046_p0 = scmp.lt.s32.totalorder %s4037_s23, %s4037_s23 }
  0xb3   : > { %p4040_p11 = pnand %p4038_p10, %p4908_p7  ;;  %p4047_p2 = por %p4046_p0, %p4045_p13 }
  0xb5   : > { %p4041_p12 = pneg %p4040_p11 }
  0xb7   : > { %p4048_p4 = pnand %p4047_p2, %p4041_p12 }
  0xb9   : > { %4051 = shalt.err (!%p4048_p4)
}
  0xba   : > { %3613 = dma.hbm_to_vmem [thread:$0]  (!%p4892_p5), %s5887_s9, 32, %s672_s26, [#allocation19], %s5839_s27, %s5839_s27, %s5841_s28  }
  0xbb   : > { %s4681_s4 = smov [#allocation21]   ;;  %s4682_s20 = smov [#allocation24]  }
  0xbc   : > { %s697_s18 = sshll.u32 %s4681_s4, 4  ;;  %s723_s21 = sshll.u32 %s4682_s20, 4  ;;  %s698_s18 = int_to_ptr.vmem [resolvable:$true] %s697_s18  ;;  %s724_s21 = int_to_ptr.vmem [resolvable:$true] %s723_s21 }
  0xbd   : > { %s5888_s11 = sld [smem:[#allocation73_spill]] }
  0xc3   : > { %s4052_s29 = scalar_lea.hbm %s5888_s11, 32 }
  0xc4   : > { %p4053_p6 = scmp.ne.s32.totalorder %s5888_s11, %s4052_s29  ;;  %p4059_p1 = scmp.lt.u32.totalorder %s4052_s29, %s5888_s11 }
  0xc6   : > { %p4055_p8 = pnand %p4053_p6, %p4908_p7 }
  0xc8   : > { %p4056_p9 = pneg %p4055_p8 }
  0xca   : > { %p4061_p3 = pnand %p4059_p1, %p4056_p9 }
  0xcc   : > { %4064 = shalt.err (!%p4061_p3)
}
  0xcd   : > { %s4065_s26 = scalar_lea.vmem %s698_s18, 32  ;;  %p4073_p13 = scmp.lt.s32.totalorder %s698_s18, %s698_s18 }
  0xce   : > { %p4066_p10 = scmp.ne.s32.totalorder %s698_s18, %s4065_s26  ;;  %p4074_p0 = scmp.lt.s32.totalorder %s4065_s26, %s4065_s26 }
  0xd0   : > { %p4068_p11 = pnand %p4066_p10, %p4908_p7  ;;  %p4075_p2 = por %p4074_p0, %p4073_p13 }
  0xd2   : > { %p4069_p12 = pneg %p4068_p11 }
  0xd4   : > { %p4076_p4 = pnand %p4075_p2, %p4069_p12 }
  0xd6   : > { %4079 = shalt.err (!%p4076_p4)
}
  0xd7   : > { %3619 = dma.hbm_to_vmem [thread:$0]  (!%p4892_p5), %s5888_s11, 32, %s698_s18, [#allocation22], %s5839_s27, %s5839_s27, %s5841_s28  }
  0xd8   : > { %s4080_s1 = scalar_lea.hbm %s5802_s13, 32 }
  0xd9   : > { %p4081_p6 = scmp.ne.s32.totalorder %s5802_s13, %s4080_s1  ;;  %p4087_p1 = scmp.lt.u32.totalorder %s4080_s1, %s5802_s13 }
  0xdb   : > { %p4083_p8 = pnand %p4081_p6, %p4908_p7 }
  0xdd   : > { %p4084_p9 = pneg %p4083_p8 }
  0xdf   : > { %p4089_p3 = pnand %p4087_p1, %p4084_p9 }
  0xe1   : > { %4092 = shalt.err (!%p4089_p3)
}
  0xe2   : > { %s4093_s3 = scalar_lea.vmem %s724_s21, 32  ;;  %p4101_p13 = scmp.lt.s32.totalorder %s724_s21, %s724_s21 }
  0xe3   : > { %p4094_p10 = scmp.ne.s32.totalorder %s724_s21, %s4093_s3  ;;  %p4102_p0 = scmp.lt.s32.totalorder %s4093_s3, %s4093_s3 }
  0xe5   : > { %p4096_p11 = pnand %p4094_p10, %p4908_p7  ;;  %p4103_p2 = por %p4102_p0, %p4101_p13 }
  0xe7   : > { %p4097_p12 = pneg %p4096_p11 }
  0xe9   : > { %p4104_p4 = pnand %p4103_p2, %p4097_p12 }
  0xeb   : > { %4107 = shalt.err (!%p4104_p4)
}
  0xec   : > { %3625 = dma.hbm_to_vmem [thread:$0]  (!%p4892_p5), %s5802_s13, 32, %s724_s21, [#allocation25], %s5839_s27, %s5839_s27, %s5841_s28  }
  0xed   : > { %s4683_s26 = smov [#allocation27]   ;;  %s4684_s0 = smov [#allocation30]  }
  0xee   : > { %s749_s22 = sshll.u32 %s4683_s26, 4  ;;  %s774_s4 = sshll.u32 %s4684_s0, 4  ;;  %s750_s22 = int_to_ptr.vmem [resolvable:$true] %s749_s22  ;;  %s775_s4 = int_to_ptr.vmem [resolvable:$true] %s774_s4 }
  0xef   : > { %s4108_s6 = scalar_lea.hbm %s5804_s15, 32 }
  0xf0   : > { %p4109_p6 = scmp.ne.s32.totalorder %s5804_s15, %s4108_s6  ;;  %p4115_p1 = scmp.lt.u32.totalorder %s4108_s6, %s5804_s15 }
  0xf2   : > { %p4111_p8 = pnand %p4109_p6, %p4908_p7 }
  0xf4   : > { %p4112_p9 = pneg %p4111_p8 }
  0xf6   : > { %p4117_p3 = pnand %p4115_p1, %p4112_p9 }
  0xf8   : > { %4120 = shalt.err (!%p4117_p3)
}
  0xf9   : > { %s4121_s21 = scalar_lea.vmem %s750_s22, 32  ;;  %p4129_p13 = scmp.lt.s32.totalorder %s750_s22, %s750_s22 }
  0xfa   : > { %p4122_p10 = scmp.ne.s32.totalorder %s750_s22, %s4121_s21  ;;  %p4130_p0 = scmp.lt.s32.totalorder %s4121_s21, %s4121_s21 }
  0xfc   : > { %p4124_p11 = pnand %p4122_p10, %p4908_p7  ;;  %p4131_p2 = por %p4130_p0, %p4129_p13 }
  0xfe   : > { %p4125_p12 = pneg %p4124_p11 }
 0x100   : > { %p4132_p4 = pnand %p4131_p2, %p4125_p12 }
 0x102   : > { %4135 = shalt.err (!%p4132_p4)
}
 0x103   : > { %3631 = dma.hbm_to_vmem [thread:$0]  (!%p4892_p5), %s5804_s15, 32, %s750_s22, [#allocation28], %s5839_s27, %s5839_s27, %s5841_s28  }
 0x104   : > { %s4136_s20 = scalar_lea.hbm %s5806_s17, 16 }
 0x105   : > { %p4137_p6 = scmp.ne.s32.totalorder %s5806_s17, %s4136_s20  ;;  %p4143_p1 = scmp.lt.u32.totalorder %s4136_s20, %s5806_s17 }
 0x107   : > { %p4139_p8 = pnand %p4137_p6, %p4908_p7 }
 0x109   : > { %p4140_p9 = pneg %p4139_p8 }
 0x10b   : > { %p4145_p3 = pnand %p4143_p1, %p4140_p9 }
 0x10d   : > { %4148 = shalt.err (!%p4145_p3)
}
 0x10e   : > { %s4149_s25 = scalar_lea.vmem %s775_s4, 16  ;;  %s4156_s22 = scalar_lea.vmem %s775_s4, 32 }
 0x10f   : > { %p4150_p10 = scmp.ne.s32.totalorder %s775_s4, %s4149_s25  ;;  %p4157_p13 = scmp.lt.s32.totalorder %s775_s4, %s775_s4 }
 0x110   : > { %p4158_p0 = scmp.lt.s32.totalorder %s4156_s22, %s4149_s25 }
 0x111   : > { %p4152_p11 = pnand %p4150_p10, %p4908_p7 }
 0x112   : > { %p4159_p2 = por %p4158_p0, %p4157_p13 }
 0x113   : > { %p4153_p12 = pneg %p4152_p11 }
 0x115   : > { %p4160_p4 = pnand %p4159_p2, %p4153_p12 }
 0x117   : > { %4163 = shalt.err (!%p4160_p4)
}
 0x118   : > { %3637 = dma.hbm_to_vmem [thread:$0]  (!%p4892_p5), %s5806_s17, 16, %s775_s4, [#allocation31]  }
 0x119   : > { %s4685_s18 = smov [#allocation33]   ;;  %s4686_s26 = smov [#allocation8]  }
 0x11a   : > { %s797_s23 = sshll.u32 %s4685_s18, 4  ;;  %s582_s0 = sshll.u32 %s4686_s26, 4  ;;  %s798_s23 = int_to_ptr.vmem [resolvable:$true] %s797_s23  ;;  %s583_s0 = int_to_ptr.vmem [resolvable:$true] %s582_s0 }
 0x11b   : > { %s4164_s6 = scalar_lea.hbm %s5808_s19, 256 }
 0x11c   : > { %p4165_p6 = scmp.ne.s32.totalorder %s5808_s19, %s4164_s6  ;;  %p4171_p1 = scmp.lt.u32.totalorder %s4164_s6, %s5808_s19 }
 0x11e   : > { %p4167_p8 = pnand %p4165_p6, %p4908_p7 }
 0x120   : > { %p4168_p9 = pneg %p4167_p8 }
 0x122   : > { %p4173_p3 = pnand %p4171_p1, %p4168_p9 }
 0x124   : > { %4176 = shalt.err (!%p4173_p3)
}
 0x125   : > { %s4177_s4 = scalar_lea.vmem %s798_s23, 256  ;;  %p4185_p13 = scmp.lt.s32.totalorder %s798_s23, %s798_s23 }
 0x126   : > { %p4178_p10 = scmp.ne.s32.totalorder %s798_s23, %s4177_s4  ;;  %p4186_p0 = scmp.lt.s32.totalorder %s4177_s4, %s4177_s4 }
 0x128   : > { %p4180_p11 = pnand %p4178_p10, %p4908_p7  ;;  %p4187_p2 = por %p4186_p0, %p4185_p13 }
 0x12a   : > { %p4181_p12 = pneg %p4180_p11 }
 0x12c   : > { %p4188_p4 = pnand %p4187_p2, %p4181_p12 }
 0x12e   : > { %4191 = shalt.err (!%p4188_p4)
}
 0x12f   : > { %s5843_s3 = smov 64   ;;  %s5845_s21 = smov 4  }
 0x130   : > { %3643 = dma.hbm_to_vmem [thread:$0]  (!%p4892_p5), %s5808_s19, 256, %s798_s23, [#allocation34], %s5843_s3, %s5843_s3, %s5845_s21  }
 0x131   : > { %s5889_s6 = sld [smem:[#allocation64_spill]] }
 0x137   : > { %s4192_s29 = scalar_lea.hbm %s5889_s6, 256 }
 0x138   : > { %p4193_p6 = scmp.ne.s32.totalorder %s5889_s6, %s4192_s29  ;;  %p4199_p1 = scmp.lt.u32.totalorder %s4192_s29, %s5889_s6 }
 0x13a   : > { %p4195_p8 = pnand %p4193_p6, %p4908_p7 }
 0x13c   : > { %p4196_p9 = pneg %p4195_p8 }
 0x13e   : > { %p4201_p3 = pnand %p4199_p1, %p4196_p9 }
 0x140   : > { %4204 = shalt.err (!%p4201_p3)
}
 0x141   : > { %s4205_s18 = scalar_lea.vmem %s583_s0, 256  ;;  %p4213_p13 = scmp.lt.s32.totalorder %s583_s0, %s583_s0 }
 0x142   : > { %p4206_p10 = scmp.ne.s32.totalorder %s583_s0, %s4205_s18  ;;  %p4214_p0 = scmp.lt.s32.totalorder %s4205_s18, %s4205_s18 }
 0x144   : > { %p4208_p11 = pnand %p4206_p10, %p4908_p7  ;;  %p4215_p2 = por %p4214_p0, %p4213_p13 }
 0x146   : > { %p4209_p12 = pneg %p4208_p11 }
 0x148   : > { %p4216_p4 = pnand %p4215_p2, %p4209_p12 }
 0x14a   : > { %4219 = shalt.err (!%p4216_p4)
}
 0x14b   : > { %3592 = dma.hbm_to_vmem [thread:$0]  (!%p4892_p5), %s5889_s6, 256, %s583_s0, [#allocation7], %s5843_s3, %s5843_s3, %s5845_s21  }
 0x14c   : > { %s4689_s20 = smov [#allocation11]   ;;  %s4690_s29 = smov [#allocation14]  }
 0x14d   : > { %s606_s1 = sshll.u32 %s4689_s20, 4  ;;  %s632_s30 = sshll.u32 %s4690_s29, 4  ;;  %s607_s1 = int_to_ptr.vmem [resolvable:$true] %s606_s1  ;;  %s633_s30 = int_to_ptr.vmem [resolvable:$true] %s632_s30 }
 0x14e   : > { %s5890_s4 = sld [smem:[#allocation66_spill]] }
 0x154   : > { %s5891_s18 = smov %s5890_s4  ;;  %s4220_s27 = scalar_lea.hbm %s5890_s4, 32 }
 0x155   : > { %p4221_p6 = scmp.ne.s32.totalorder %s5891_s18, %s4220_s27  ;;  %p4227_p1 = scmp.lt.u32.totalorder %s4220_s27, %s5891_s18 }
 0x157   : > { %p4223_p8 = pnand %p4221_p6, %p4908_p7 }
 0x159   : > { %p4224_p9 = pneg %p4223_p8 }
 0x15b   : > { %p4229_p3 = pnand %p4227_p1, %p4224_p9 }
 0x15d   : > { %4232 = shalt.err (!%p4229_p3)
}
 0x15e   : > { %s4233_s0 = scalar_lea.vmem %s607_s1, 32  ;;  %p4241_p13 = scmp.lt.s32.totalorder %s607_s1, %s607_s1 }
 0x15f   : > { %p4234_p10 = scmp.ne.s32.totalorder %s607_s1, %s4233_s0  ;;  %p4242_p0 = scmp.lt.s32.totalorder %s4233_s0, %s4233_s0 }
 0x161   : > { %p4236_p11 = pnand %p4234_p10, %p4908_p7  ;;  %p4243_p2 = por %p4242_p0, %p4241_p13 }
 0x163   : > { %p4237_p12 = pneg %p4236_p11 }
 0x165   : > { %p4244_p4 = pnand %p4243_p2, %p4237_p12 }
 0x167   : > { %4247 = shalt.err (!%p4244_p4)
}
 0x168   : > { %s5892_s7 = smov 1   ;;  %s5893_s28 = smov 16  }
 0x169   : > { %3598 = dma.hbm_to_vmem [thread:$0]  (!%p4892_p5), %s5891_s18, 32, %s607_s1, [#allocation10], %s5893_s28, %s5893_s28, %s5892_s7  }
 0x16a   : > { %s5894_s29 = sld [smem:[#allocation68_spill]] }
 0x170   : > { %s5895_s25 = smov %s5894_s29  ;;  %s4248_s22 = scalar_lea.hbm %s5894_s29, 32 }
 0x171   : > { %p4249_p6 = scmp.ne.s32.totalorder %s5895_s25, %s4248_s22  ;;  %p4255_p1 = scmp.lt.u32.totalorder %s4248_s22, %s5895_s25 }
 0x173   : > { %p4251_p8 = pnand %p4249_p6, %p4908_p7 }
 0x175   : > { %p4252_p9 = pneg %p4251_p8 }
 0x177   : > { %p4257_p3 = pnand %p4255_p1, %p4252_p9 }
 0x179   : > { %4260 = shalt.err (!%p4257_p3)
}
 0x17a   : > { %s4261_s9 = scalar_lea.vmem %s633_s30, 32  ;;  %p4269_p13 = scmp.lt.s32.totalorder %s633_s30, %s633_s30 }
 0x17b   : > { %p4262_p10 = scmp.ne.s32.totalorder %s633_s30, %s4261_s9  ;;  %p4270_p0 = scmp.lt.s32.totalorder %s4261_s9, %s4261_s9 }
 0x17d   : > { %p4264_p11 = pnand %p4262_p10, %p4908_p7  ;;  %p4271_p2 = por %p4270_p0, %p4269_p13 }
 0x17f   : > { %p4265_p12 = pneg %p4264_p11 }
 0x181   : > { %p4272_p4 = pnand %p4271_p2, %p4265_p12 }
 0x183   : > { %4275 = shalt.err (!%p4272_p4)
}
 0x184   : > { %3604 = dma.hbm_to_vmem [thread:$0]  (!%p4892_p5), %s5895_s25, 32, %s633_s30, [#allocation13], %s5893_s28, %s5893_s28, %s5892_s7  }
 0x185   : > { %s4691_s27 = smov [#allocation17]   ;;  %s4692_s20 = smov [#allocation20]  }
 0x186   : > { %s658_s26 = sshll.u32 %s4691_s27, 4  ;;  %s684_s29 = sshll.u32 %s4692_s20, 4  ;;  %s659_s26 = int_to_ptr.vmem [resolvable:$true] %s658_s26  ;;  %s685_s29 = int_to_ptr.vmem [resolvable:$true] %s684_s29 }
 0x187   : > { %s5896_s8 = sld [smem:[#allocation70_spill]] }
 0x18d   : > { %s4276_s23 = scalar_lea.hbm %s5896_s8, 512 }
 0x18e   : > { %p4277_p6 = scmp.ne.s32.totalorder %s5896_s8, %s4276_s23  ;;  %p4283_p1 = scmp.lt.u32.totalorder %s4276_s23, %s5896_s8 }
 0x190   : > { %p4279_p8 = pnand %p4277_p6, %p4908_p7 }
 0x192   : > { %p4280_p9 = pneg %p4279_p8 }
 0x194   : > { %p4285_p3 = pnand %p4283_p1, %p4280_p9 }
 0x196   : > { %4288 = shalt.err (!%p4285_p3)
}
 0x197   : > { %s4289_s30 = scalar_lea.vmem %s659_s26, 512  ;;  %p4297_p13 = scmp.lt.s32.totalorder %s659_s26, %s659_s26 }
 0x198   : > { %p4290_p10 = scmp.ne.s32.totalorder %s659_s26, %s4289_s30  ;;  %p4298_p0 = scmp.lt.s32.totalorder %s4289_s30, %s4289_s30 }
 0x19a   : > { %p4292_p11 = pnand %p4290_p10, %p4908_p7  ;;  %p4299_p2 = por %p4298_p0, %p4297_p13 }
 0x19c   : > { %p4293_p12 = pneg %p4292_p11 }
 0x19e   : > { %p4300_p4 = pnand %p4299_p2, %p4293_p12 }
 0x1a0   : > { %4303 = shalt.err (!%p4300_p4)
}
 0x1a1   : > { %s5897_s7 = smov 4   ;;  %s5898_s28 = smov 64  }
 0x1a2   : > { %3610 = dma.hbm_to_vmem [thread:$0]  (!%p4892_p5), %s5896_s8, 512, %s659_s26, [#allocation16], %s5898_s28, %s5898_s28, %s5897_s7  }
 0x1a3   : > { %s5899_s10 = sld [smem:[#allocation72_spill]] }
 0x1a9   : > { %s4304_s22 = scalar_lea.hbm %s5899_s10, 512 }
 0x1aa   : > { %p4305_p6 = scmp.ne.s32.totalorder %s5899_s10, %s4304_s22  ;;  %p4311_p1 = scmp.lt.u32.totalorder %s4304_s22, %s5899_s10 }
 0x1ac   : > { %p4307_p8 = pnand %p4305_p6, %p4908_p7 }
 0x1ae   : > { %p4308_p9 = pneg %p4307_p8 }
 0x1b0   : > { %p4313_p3 = pnand %p4311_p1, %p4308_p9 }
 0x1b2   : > { %4316 = shalt.err (!%p4313_p3)
}
 0x1b3   : > { %s4317_s3 = scalar_lea.vmem %s685_s29, 512  ;;  %p4325_p13 = scmp.lt.s32.totalorder %s685_s29, %s685_s29 }
 0x1b4   : > { %p4318_p10 = scmp.ne.s32.totalorder %s685_s29, %s4317_s3  ;;  %p4326_p0 = scmp.lt.s32.totalorder %s4317_s3, %s4317_s3 }
 0x1b6   : > { %p4320_p11 = pnand %p4318_p10, %p4908_p7  ;;  %p4327_p2 = por %p4326_p0, %p4325_p13 }
 0x1b8   : > { %p4321_p12 = pneg %p4320_p11 }
 0x1ba   : > { %p4328_p4 = pnand %p4327_p2, %p4321_p12 }
 0x1bc   : > { %4331 = shalt.err (!%p4328_p4)
}
 0x1bd   : > { %3616 = dma.hbm_to_vmem [thread:$0]  (!%p4892_p5), %s5899_s10, 512, %s685_s29, [#allocation19], %s5898_s28, %s5898_s28, %s5897_s7  }
 0x1be   : > { %s4693_s21 = smov [#allocation23]   ;;  %s4694_s27 = smov [#allocation26]  }
 0x1bf   : > { %s710_s1 = sshll.u32 %s4693_s21, 4  ;;  %s736_s20 = sshll.u32 %s4694_s27, 4  ;;  %s711_s1 = int_to_ptr.vmem [resolvable:$true] %s710_s1  ;;  %s737_s20 = int_to_ptr.vmem [resolvable:$true] %s736_s20 }
 0x1c0   : > { %s5900_s12 = sld [smem:[#allocation74_spill]] }
 0x1c6   : > { %s4332_s23 = scalar_lea.hbm %s5900_s12, 512 }
 0x1c7   : > { %p4333_p6 = scmp.ne.s32.totalorder %s5900_s12, %s4332_s23  ;;  %p4339_p1 = scmp.lt.u32.totalorder %s4332_s23, %s5900_s12 }
 0x1c9   : > { %p4335_p8 = pnand %p4333_p6, %p4908_p7 }
 0x1cb   : > { %p4336_p9 = pneg %p4335_p8 }
 0x1cd   : > { %p4341_p3 = pnand %p4339_p1, %p4336_p9 }
 0x1cf   : > { %4344 = shalt.err (!%p4341_p3)
}
 0x1d0   : > { %s4345_s29 = scalar_lea.vmem %s711_s1, 512  ;;  %p4353_p13 = scmp.lt.s32.totalorder %s711_s1, %s711_s1 }
 0x1d1   : > { %p4346_p10 = scmp.ne.s32.totalorder %s711_s1, %s4345_s29  ;;  %p4354_p0 = scmp.lt.s32.totalorder %s4345_s29, %s4345_s29 }
 0x1d3   : > { %p4348_p11 = pnand %p4346_p10, %p4908_p7  ;;  %p4355_p2 = por %p4354_p0, %p4353_p13 }
 0x1d5   : > { %p4349_p12 = pneg %p4348_p11 }
 0x1d7   : > { %p4356_p4 = pnand %p4355_p2, %p4349_p12 }
 0x1d9   : > { %4359 = shalt.err (!%p4356_p4)
}
 0x1da   : > { %3622 = dma.hbm_to_vmem [thread:$0]  (!%p4892_p5), %s5900_s12, 512, %s711_s1, [#allocation22], %s5898_s28, %s5898_s28, %s5897_s7  }
 0x1db   : > { %s4360_s4 = scalar_lea.hbm %s5803_s14, 1024 }
 0x1dc   : > { %p4361_p6 = scmp.ne.s32.totalorder %s5803_s14, %s4360_s4  ;;  %p4367_p1 = scmp.lt.u32.totalorder %s4360_s4, %s5803_s14 }
 0x1de   : > { %p4363_p8 = pnand %p4361_p6, %p4908_p7 }
 0x1e0   : > { %p4364_p9 = pneg %p4363_p8 }
 0x1e2   : > { %p4369_p3 = pnand %p4367_p1, %p4364_p9 }
 0x1e4   : > { %4372 = shalt.err (!%p4369_p3)
}
 0x1e5   : > { %s4373_s26 = scalar_lea.vmem %s737_s20, 1024  ;;  %p4381_p13 = scmp.lt.s32.totalorder %s737_s20, %s737_s20 }
 0x1e6   : > { %p4374_p10 = scmp.ne.s32.totalorder %s737_s20, %s4373_s26  ;;  %p4382_p0 = scmp.lt.s32.totalorder %s4373_s26, %s4373_s26 }
 0x1e8   : > { %p4376_p11 = pnand %p4374_p10, %p4908_p7  ;;  %p4383_p2 = por %p4382_p0, %p4381_p13 }
 0x1ea   : > { %p4377_p12 = pneg %p4376_p11 }
 0x1ec   : > { %p4384_p4 = pnand %p4383_p2, %p4377_p12 }
 0x1ee   : > { %4387 = shalt.err (!%p4384_p4)
}
 0x1ef   : > { %3628 = dma.hbm_to_vmem [thread:$0]  (!%p4892_p5), %s5803_s14, 1024, %s737_s20, [#allocation25], %s5898_s28, %s5898_s28, %s5897_s7  }
 0x1f0   : > { %s4695_s30 = smov [#allocation29]   ;;  %s4696_s27 = smov [#allocation32]  }
 0x1f1   : > { %s763_s21 = sshll.u32 %s4695_s30, 4  ;;  %s784_s22 = sshll.u32 %s4696_s27, 4  ;;  %s764_s21 = int_to_ptr.vmem [resolvable:$true] %s763_s21  ;;  %s785_s22 = int_to_ptr.vmem [resolvable:$true] %s784_s22 }
 0x1f2   : > { %s4388_s0 = scalar_lea.hbm %s5805_s16, 16 }
 0x1f3   : > { %p4389_p6 = scmp.ne.s32.totalorder %s5805_s16, %s4388_s0  ;;  %p4395_p1 = scmp.lt.u32.totalorder %s4388_s0, %s5805_s16 }
 0x1f5   : > { %p4391_p8 = pnand %p4389_p6, %p4908_p7 }
 0x1f7   : > { %p4392_p9 = pneg %p4391_p8 }
 0x1f9   : > { %p4397_p3 = pnand %p4395_p1, %p4392_p9 }
 0x1fb   : > { %4400 = shalt.err (!%p4397_p3)
}
 0x1fc   : > { %s4401_s20 = scalar_lea.vmem %s764_s21, 16  ;;  %s4408_s29 = scalar_lea.vmem %s764_s21, 32 }
 0x1fd   : > { %p4402_p10 = scmp.ne.s32.totalorder %s764_s21, %s4401_s20  ;;  %p4409_p13 = scmp.lt.s32.totalorder %s764_s21, %s764_s21 }
 0x1fe   : > { %p4410_p0 = scmp.lt.s32.totalorder %s4408_s29, %s4401_s20 }
 0x1ff   : > { %p4404_p11 = pnand %p4402_p10, %p4908_p7 }
 0x200   : > { %p4411_p2 = por %p4410_p0, %p4409_p13 }
 0x201   : > { %p4405_p12 = pneg %p4404_p11 }
 0x203   : > { %p4412_p4 = pnand %p4411_p2, %p4405_p12 }
 0x205   : > { %4415 = shalt.err (!%p4412_p4)
}
 0x206   : > { %3634 = dma.hbm_to_vmem [thread:$0]  (!%p4892_p5), %s5805_s16, 16, %s764_s21, [#allocation28]  }
 0x207   : > { %s5901_s0 = sld [smem:[#allocation75_spill]] }
 0x20d   : > { %s5902_s9 = smov %s5901_s0  ;;  %s4416_s3 = scalar_lea.hbm %s5901_s0, 256 }
 0x20e   : > { %p4417_p6 = scmp.ne.s32.totalorder %s5902_s9, %s4416_s3  ;;  %p4423_p1 = scmp.lt.u32.totalorder %s4416_s3, %s5902_s9 }
 0x210   : > { %p4419_p8 = pnand %p4417_p6, %p4908_p7 }
 0x212   : > { %p4420_p9 = pneg %p4419_p8 }
 0x214   : > { %p4425_p3 = pnand %p4423_p1, %p4420_p9 }
 0x216   : > { %4428 = shalt.err (!%p4425_p3)
}
 0x217   : > { %s4429_s30 = scalar_lea.vmem %s785_s22, 256  ;;  %p4437_p13 = scmp.lt.s32.totalorder %s785_s22, %s785_s22 }
 0x218   : > { %p4430_p10 = scmp.ne.s32.totalorder %s785_s22, %s4429_s30  ;;  %p4438_p0 = scmp.lt.s32.totalorder %s4429_s30, %s4429_s30 }
 0x21a   : > { %p4432_p11 = pnand %p4430_p10, %p4908_p7  ;;  %p4439_p2 = por %p4438_p0, %p4437_p13 }
 0x21c   : > { %p4433_p12 = pneg %p4432_p11 }
 0x21e   : > { %p4440_p4 = pnand %p4439_p2, %p4433_p12 }
 0x220   : > { %4443 = shalt.err (!%p4440_p4)
}
 0x221   : > { %3640 = dma.hbm_to_vmem [thread:$0]  (!%p4892_p5), %s5902_s9, 256, %s785_s22, [#allocation31], %s5898_s28, %s5898_s28, %s5897_s7  }
 0x222   : > { %s4697_s4 = smov [#allocation35]   ;;  %s4698_s0 = smov [#allocation36]  }
 0x223   : > { %s811_s23 = sshll.u32 %s4697_s4, 4  ;;  %s822_s3 = sshll.u32 %s4698_s0, 4  ;;  %s812_s23 = int_to_ptr.vmem [resolvable:$true] %s811_s23  ;;  %s823_s3 = int_to_ptr.vmem [resolvable:$true] %s822_s3 }
 0x224   : > { %s5903_s20 = sld [smem:[#allocation76_spill]] }
 0x22a   : > { %s4444_s29 = scalar_lea.hbm %s5903_s20, 128 }
 0x22b   : > { %p4445_p6 = scmp.ne.s32.totalorder %s5903_s20, %s4444_s29  ;;  %p4451_p1 = scmp.lt.u32.totalorder %s4444_s29, %s5903_s20 }
 0x22d   : > { %p4447_p8 = pnand %p4445_p6, %p4908_p7 }
 0x22f   : > { %p4448_p9 = pneg %p4447_p8 }
 0x231   : > { %p4453_p3 = pnand %p4451_p1, %p4448_p9 }
 0x233   : > { %4456 = shalt.err (!%p4453_p3)
}
 0x234   : > { %s4457_s7 = scalar_lea.vmem %s812_s23, 128  ;;  %p4465_p13 = scmp.lt.s32.totalorder %s812_s23, %s812_s23 }
 0x235   : > { %p4458_p10 = scmp.ne.s32.totalorder %s812_s23, %s4457_s7  ;;  %p4466_p0 = scmp.lt.s32.totalorder %s4457_s7, %s4457_s7 }
 0x237   : > { %p4460_p11 = pnand %p4458_p10, %p4908_p7  ;;  %p4467_p2 = por %p4466_p0, %p4465_p13 }
 0x239   : > { %p4461_p12 = pneg %p4460_p11 }
 0x23b   : > { %p4468_p4 = pnand %p4467_p2, %p4461_p12 }
 0x23d   : > { %4471 = shalt.err (!%p4468_p4)
}
 0x23e   : > { %3646 = dma.hbm_to_vmem [thread:$0]  (!%p4892_p5), %s5903_s20, 128, %s812_s23, [#allocation34]  }
 0x23f   : > { %s5904_s27 = sld [smem:[#allocation77_spill]] }
 0x245   : > { %s4472_s4 = scalar_lea.hbm %s5904_s27, 128 }
 0x246   : > { %p4473_p6 = scmp.ne.s32.totalorder %s5904_s27, %s4472_s4  ;;  %p4479_p1 = scmp.lt.u32.totalorder %s4472_s4, %s5904_s27 }
 0x248   : > { %p4475_p8 = pnand %p4473_p6, %p4908_p7 }
 0x24a   : > { %p4476_p9 = pneg %p4475_p8 }
 0x24c   : > { %p4481_p3 = pnand %p4479_p1, %p4476_p9 }
 0x24e   : > { %4484 = shalt.err (!%p4481_p3)
}
 0x24f   : > { %s4485_s30 = scalar_lea.vmem %s823_s3, 128  ;;  %p4493_p13 = scmp.lt.s32.totalorder %s823_s3, %s823_s3 }
 0x250   : > { %p4486_p10 = scmp.ne.s32.totalorder %s823_s3, %s4485_s30  ;;  %p4494_p0 = scmp.lt.s32.totalorder %s4485_s30, %s4485_s30 }
 0x252   : > { %p4488_p11 = pnand %p4486_p10, %p4908_p7  ;;  %p4495_p2 = por %p4494_p0, %p4493_p13 }
 0x254   : > { %p4489_p12 = pneg %p4488_p11 }
 0x256   : > { %p4496_p4 = pnand %p4495_p2, %p4489_p12 }
 0x258   : > { %4499 = shalt.err (!%p4496_p4)
}
 0x259   : > { %s5905_s7 = sld [smem:[#allocation59_spill]]  ;;  %s5906_s6 = sld [smem:[#allocation57_spill]] }
 0x25a   : > { %s5907_s28 = sld [smem:[#allocation58_spill]]  ;;  %s5908_s8 = sld [smem:[#allocation54_spill]] }
 0x25b   : > { %s5909_s22 = sld [smem:[#allocation53_spill]]  ;;  %s5910_s2 = sld [smem:[#allocation52_spill]] }
 0x25c   : > { %s5911_s4 = sld [smem:[#allocation60_spill]]  ;;  %s5918_s9 = sld [smem:[#allocation62_spill]] }
 0x25d   : > { %3649 = dma.hbm_to_vmem [thread:$0]  (!%p4892_p5), %s5904_s27, 128, %s823_s3, [#allocation37]  }
 0x25f   : > { %s3132_s0 = sadd.s32 4294967294, %s5905_s7   ;;  %s58_s26 = sadd.s32 1, %s5906_s6 }
 0x260   : > { %s61_s1 = sadd.s32 1, %s5907_s28  ;;  %p59_p7 = scmp.ge.s32.totalorder %s58_s26, 2 }
 0x261   : > { %s68_s5 = sadd.s32 1, %s5908_s8  ;;  %p75_p6 = scmp.ne.s32.totalorder %s5908_s8, %s5909_s22 }
 0x262   : > { %p76_p8 = scmp.eq.s32.totalorder %s5905_s7, 0  ;;  %s5943_s26 = smov (%p59_p7, %s58_s26), 0 }
 0x263   : > { %s5945_s1 = smov (!%p59_p7, %s61_s1), %s5907_s28  ;;  %p81_p5 = scmp.ne.s32.totalorder %s5909_s22, %s5910_s2 }
 0x264   : > { %p5346_p9 = por %p76_p8, %p75_p6  ;;  %p63_p1 = scmp.ge.s32.totalorder %s5945_s1, 2 }
 0x265   : > { %s5913_s3 = sadd.s32 4294967295, %s5905_s7   ;;  %p5914_p10 = scmp.ne.s32.totalorder %s5911_s4, 0 }
 0x266   : > { %p546_p3 = scmp.eq.s32.totalorder %s5913_s3, 3  ;;  %p552_p12 = scmp.eq.s32.totalorder %s3132_s0, 3 }
 0x267   : > { %p5356_p11 = por %p5914_p10, %p81_p5  ;;  %s5947_s1 = smov (%p63_p1, %s5945_s1), 0 }
 0x268   : > { %p5362_p13 = por %p546_p3, %p75_p6  ;;  %p5366_p0 = por %p552_p12, %p81_p5 }
 0x269   : > { %s65_s6 = ssub.s32 %s5907_s28, %s5947_s1  ;;  %p3679_p2 = scmp.lt.s32.totalorder %s5905_s7, 4 }
 0x26a   : > { %s5916_s23 = scalar_select %p5362_p13, 1, 0 }
 0x26b   : > { %s5917_s21 = scalar_select %p5366_p0, 1, 0 }
 0x26c   : > { %p66_p4 = scmp.eq.s32.totalorder %s65_s6, 0  ;;  %s833_s22 = sand.u32 1, %s5908_s8  }
 0x26d   : > { %s3156_s2 = sshll.u32 %s833_s22, 4  ;;  %s3256_s4 = sshll.u32 %s5907_s28, 8 }
 0x26e   : > { %s5949_s8 = smov (!%p66_p4, %s5908_s8), %s68_s5  ;;  %s5381_s10 = scalar_lea.hbm %s5918_s9, %s3256_s4 }
 0x26f   : > { %s837_s11 = scalar_lea.vmem [#allocation3], %s3156_s2  ;;  %p5387_p7 = pnand %p3679_p2, %p5346_p9 }
 0x270   : > { %s844_s12 = sshll.u32 %s837_s11, 4  ;;  %s5391_s28 = scalar_lea.sflag [#allocation4], %s833_s22  ;;  %s5383_s12 = int_to_ptr.vmem [resolvable:$true] %s844_s12 }
 0x271   : > { %s4500_s5 = scalar_lea.hbm %s5381_s10, 256  ;;  %p4502_p8 = pneg %p5387_p7 }
 0x272   : > { %p4501_p6 = scmp.ne.s32.totalorder %s5381_s10, %s4500_s5  ;;  %s4505_s29 = scalar_lea.hbm %s5918_s9, 512 }
 0x273   : > { %p4506_p9 = scmp.lt.u32.totalorder %s5381_s10, %s5918_s9  ;;  %p4507_p3 = scmp.lt.u32.totalorder %s4505_s29, %s4500_s5 }
 0x274   : > { %p4503_p5 = pnand %p4502_p8, %p4501_p6  ;;  %p4509_p12 = scmp.lt.u32.totalorder %s4500_s5, %s5381_s10 }
 0x275   : > { %p4508_p10 = por %p4507_p3, %p4506_p9 }
 0x276   : > { %p4504_p1 = pneg %p4503_p5 }
 0x277   : > { %p4510_p2 = por %p4509_p12, %p4508_p10 }
 0x279   : > { %p4511_p4 = pnand %p4510_p2, %p4504_p1 }
 0x27b   : > { %4514 = shalt.err (!%p4511_p4)
}
 0x27c   : > { %s4515_s22 = scalar_lea.vmem %s5383_s12, 256  ;;  %s4699_s0 = smov [#allocation3]  }
 0x27d   : > { %p4516_p6 = scmp.ne.s32.totalorder %s5383_s12, %s4515_s22  ;;  %s4520_s3 = sshll.u32 %s4699_s0, 4  ;;  %s4521_s3 = int_to_ptr.vmem [resolvable:$false] %s4520_s3 }
 0x27e   : > { %s4522_s11 = scalar_lea.vmem %s4521_s3, 512  ;;  %p4523_p13 = scmp.lt.s32.totalorder %s5383_s12, %s4521_s3 }
 0x27f   : > { %p4518_p5 = pnand %p4516_p6, %p4502_p8  ;;  %p4524_p9 = scmp.lt.s32.totalorder %s4522_s11, %s4515_s22 }
 0x281   : > { %p4519_p0 = pneg %p4518_p5  ;;  %p4525_p3 = por %p4524_p9, %p4523_p13 }
 0x283   : > { %p4526_p10 = pnand %p4525_p3, %p4519_p0 }
 0x285   : > { %4529 = shalt.err (!%p4526_p10)
}
 0x286   : > { %s4700_s5 = smov 128   ;;  %s4701_s6 = smov 8  }
 0x287   : > { %3653 = dma.hbm_to_vmem [thread:$0]  (!%p5387_p7), %s5381_s10, 256, %s5383_s12, %s5391_s28, %s4700_s5, %s4700_s5, %s4701_s6  }
 0x288   : > { %s5920_s29 = sld [smem:[#allocation61_spill]] }
 0x28e   : > { %p5921_p8 = scmp.ne.s32.totalorder %s5920_s29, 0 }
 0x28f   : > { %s5922_s2 = sld [smem:[#allocation53_spill]] (!%p5921_p8) }
 0x290   : > { %856 = sbr.rel (%p5921_p8) target bundleno = 5924 (0x1724), region = 108 }
 0x295   : > { %s5422_s4 = sand.u32 (!%p5921_p8), 1, %s5922_s2  }
 0x296   : > { %s3160_s22 = sshll.u32 (!%p5921_p8), %s5422_s4, 4  ;;  %s859_s0 = scalar_lea.sflag (!%p5921_p8), [#allocation4], %s5422_s4 }
 0x297   : > { %s5426_s3 = scalar_lea.vmem [#allocation3], %s3160_s22 }
 0x298   : > { %4591 = dma.done.wait (%p5356_p11), %s859_s0, 256  }
 0x299   : > { %4593 = vsyncadd (%p5356_p11), %s859_s0, 4294967040  ;;  %s5923_s7 = sld [smem:[#allocation60_spill]] }
 0x29f   : > { %p5924_p13 = scmp.ne.s32.totalorder %s5923_s7, 0 }
 0x2a1   : > { %4595 = dma.done.wait (%p5924_p13), [#allocation7], 384  }
 0x2a2   : > { %4597 = vsyncadd (%p5924_p13), [#allocation7], 4294966912 }
 0x2a3   : > { %4599 = dma.done.wait (%p5924_p13), [#allocation10], 48  }
 0x2a4   : > { %4601 = vsyncadd (%p5924_p13), [#allocation10], 4294967248 }
 0x2a5   : > { %4603 = dma.done.wait (%p5924_p13), [#allocation13], 64  }
 0x2a6   : > { %4605 = vsyncadd (%p5924_p13), [#allocation13], 4294967232 }
 0x2a7   : > { %4607 = dma.done.wait (%p5924_p13), [#allocation16], 544  }
 0x2a8   : > { %4609 = vsyncadd (%p5924_p13), [#allocation16], 4294966752 }
 0x2a9   : > { %4611 = dma.done.wait (%p5924_p13), [#allocation19], 544  }
 0x2aa   : > { %4613 = vsyncadd (%p5924_p13), [#allocation19], 4294966752 }
 0x2ab   : > { %4615 = dma.done.wait (%p5924_p13), [#allocation22], 544  }
 0x2ac   : > { %4617 = vsyncadd (%p5924_p13), [#allocation22], 4294966752 }
 0x2ad   : > { %4619 = dma.done.wait (%p5924_p13), [#allocation25], 1056  }
 0x2ae   : > { %4621 = vsyncadd (%p5924_p13), [#allocation25], 4294966240 }
 0x2af   : > { %4623 = dma.done.wait (%p5924_p13), [#allocation28], 48  }
 0x2b0   : > { %4625 = vsyncadd (%p5924_p13), [#allocation28], 4294967248 }
 0x2b1   : > { %4627 = dma.done.wait (%p5924_p13), [#allocation31], 272  }
 0x2b2   : > { %4629 = vsyncadd (%p5924_p13), [#allocation31], 4294967024 }
 0x2b3   : > { %4631 = dma.done.wait (%p5924_p13), [#allocation34], 384  }
 0x2b4   : > { %4633 = vsyncadd (%p5924_p13), [#allocation34], 4294966912 }
 0x2b5   : > { %4635 = dma.done.wait (%p5924_p13), [#allocation37], 128  }
 0x2b6   : > { %4637 = vsyncadd (%p5924_p13), [#allocation37], 4294967168  ;;  %s3182_s10 = sshll.u32 %s5422_s4, 3  ;;  %s5925_s30 = sld [smem:[#allocation55_spill]] }
 0x2b7   : > { %s5477_s12 = scalar_lea.vmem [#allocation38], %s3182_s10 }
 0x2bc   : > { %p3183_p11 = scmp.ne.s32.totalorder %s5925_s30, 0 }
 0x2bd   : > { %v3810_v0 = vld [vmem:[#allocation8] sm:$0xff] (!%p3183_p11)   ;;  %v4702_v1 = vmov (!%p3183_p11), 0.0   ;;  %v3811_v2 = vld [vmem:[#allocation8 + $0x8] sm:$0xff] (!%p3183_p11)   ;;  %vm4703_vm0 = vmmov (!%p3183_p11), 0   ;;  %vm1038_vm1 = vcmask (!%p3183_p11), 261120   ;;  %v1085_v5 = vld [vmem:[#allocation6] sm:$0xff] (!%p3183_p11) }
 0x2be   : > { %1011 = sbr.rel (%p3183_p11) target bundleno = 927 (0x39f), region = 200  ;;  %3331 = vmatprep.subr.bf16.mxu0 (!%p3183_p11), %v4702_v1  ;;  %3335 = vmatprep.mubr.msk.bf16.mxu0 (!%p3183_p11), %vm4703_vm0, %v4702_v1  ;;  %v1012_v3 = vld [vmem:[%s5426_s3] sm:$0xff] (!%p3183_p11)  ;;  %v1013_v4 = vld [vmem:[%s5426_s3 + $0x8] sm:$0xff] (!%p3183_p11)  ;;  %1086 = vst.msk [vmem:[#allocation2 + $0x10] sm:$0xff] (!%p3183_p11), %vm1038_vm1, %v1085_v5 }
 0x2bf   : > { %3332 = vmatpush3.bf16.msra.mxu0 (!%p3183_p11), %v3810_v0  ;;  %v1014_v6 = vpack.c.bf16 (!%p3183_p11), %v1013_v4, %v1012_v3  ;;  %v3184_v7 = vld [vmem:[#allocation9] ss:$0 sm:$0xff] (!%p3183_p11) }
 0x2c0   : > { %3333 = vmatprep.subr.bf16.mxu0 (!%p3183_p11), %v4702_v1 }
 0x2c3   : > { %3334 = vmatpush3.bf16.msra.mxu0 (!%p3183_p11), %v3811_v2 }
 0x2c6   : > { %3336 = vmatmul.mubr.msk.bf16.vlgmr.msra.gmra.mrb[0].mxu0 %vm1038_vm1, %v1014_v6 }
 0x399   : > { %v1076_v8 = vpop.f32.mrb[0].mxu0 }
 0x39a   : > { %v1077_v9 = vadd.f32 %v3184_v7, %v1076_v8  ;;  %v3337_v10 = vpop.f32.mrb[1].mxu0 }
 0x39b   : > { %v1079_v11 = vpop.f32.mrb[2].mxu0 }
 0x39c   : > { %1083 = vst.msk [vmem:[#allocation2] sm:$0xff] %vm1038_vm1, %v1077_v9  ;;  %v1080_v12 = vadd.f32 %v3184_v7, %v1079_v11  ;;  %v3338_v13 = vpop.f32.mrb[3].mxu0 }
 0x39e   : > { %1084 = vst.msk [vmem:[#allocation2 + $0x8] sm:$0xff] %vm1038_vm1, %v1080_v12 }
 0x39f PF: > { %vm1094_vm2 = vcmask 261120   ;;  %v5484_v15 = vld [vmem:[#allocation2 + $0x10] sm:$0xff]  ;;  %s5926_s28 = sld [smem:[#allocation55_spill]]  ;;  %s4704_s22 = smov 96   ;;  %vm1255_vm3 = vcmask 64512   ;;  %vm1316_vm4 = vcmask 195584  }
 0x3a0   : > { %v1101_v18 = vsel %vm1094_vm2, %v5484_v15, 0.0  ;;  %s4705_s0 = smov 64   ;;  %s4706_s3 = smov 120   ;;  %vm1363_vm5 = vcmask 1043456   ;;  %vm2429_vm9 = vcmask 523264  }
 0x3a1   : > { %1102 = vadd.xlane.f32.xlu1 %v1101_v18  ;;  %s4707_s7 = smov 88   ;;  %s4708_s30 = smov 56  }
 0x3a3   : > { %v5482_v14 = vld [vmem:[#allocation2] sm:$0xff] }
 0x3a4   : > { %v1095_v17 = vsel %vm1094_vm2, %v5482_v14, 0.0 }
 0x3a5   : > { %v5486_v16 = vld [vmem:[#allocation2 + $0x8] sm:$0xff]  ;;  %1096 = vadd.xlane.f32.xlu0 %v1095_v17  ;;  %s5501_s11 = sshll.u32 %s5926_s28, 4  ;;  %s1090_s6 = scalar_lea.vmem [#allocation11], %s5926_s28 }
 0x3a6   : > { %v1098_v19 = vsel %vm1094_vm2, %v5486_v16, 0.0  ;;  %s1157_s5 = scalar_lea.vmem [#allocation17], %s5501_s11  ;;  %v3188_v48 = vld [vmem:[%s1090_s6] ss:$0 sm:$0xff]  ;;  %s1092_s29 = scalar_lea.vmem [#allocation12], %s5926_s28 }
 0x3a7   : > { %v3812_v35 = vld [vmem:[%s1157_s5] sm:$0xff]   ;;  %v3813_v36 = vld [vmem:[%s1157_s5 + $0x8] sm:$0xff]   ;;  %s1162_s2 = scalar_lea.vmem [#allocation18], %s5926_s28  ;;  %s5550_s10 = scalar_lea.vmem [#allocation20], %s5501_s11 }
 0x3a8   : > { %3339 = vmatprep.subr.bf16.mxu1 %v3812_v35  ;;  %v3189_v54 = vld [vmem:[%s1092_s29] ss:$0 sm:$0xff]  ;;  %s4709_s5 = smov 80   ;;  %s4710_s6 = smov 112  }
 0x3a9   : > { %1099 = vadd.xlane.f32.xlu0 %v1098_v19  ;;  %3340 = vmatpush3.bf16.msra.mxu1 %v3812_v35  ;;  %v3192_v62 = vld [vmem:[%s1162_s2] ss:$0 sm:$0xff]  ;;  %s4711_s29 = smov 72   ;;  %s4712_s2 = smov 104  }
 0x3aa   : > { %3341 = vmatprep.subr.bf16.mxu1 %v3813_v36  ;;  %p3240_p0 = scmp.ne.s32.totalorder %s5926_s28, 1 }
 0x3ab   : > { %vm4716_vm10 = vmmov (!%p3240_p0), 0   ;;  %vm3480_vm11 = vmpackc.low (!%p3240_p0), %vm1094_vm2, %vm1094_vm2  ;;  %vm2782_vm12 = vcmask (!%p3240_p0), 130048  }
 0x3ad   : > { %3342 = vmatpush3.bf16.msra.mxu1 %v3813_v36 }
 0x42e   : > { %v1103_v21 = vpop.xlane.xlu1 %1102 }
 0x42f   : > { %v1107_v23 = vmul.f32 0.03125, %v1103_v21 }
 0x431   : > { %v1110_v25 = vsub.f32 %v5484_v15, %v1107_v23 }
 0x432   : > { %v1097_v20 = vpop.xlane.xlu0 %1096 }
 0x433   : > { %v1105_v22 = vmul.f32 0.03125, %v1097_v20  ;;  %v1113_v29 = vmul.f32 %v1110_v25, %v1110_v25 }
 0x435   : > { %v1108_v24 = vsub.f32 %v5482_v14, %v1105_v22  ;;  %v1120_v32 = vsel %vm1094_vm2, %v1113_v29, 0.0 }
 0x436   : > { %v1100_v26 = vpop.xlane.xlu0 %1099 }
 0x437   : > { %v1106_v27 = vmul.f32 0.03125, %v1100_v26  ;;  %v1111_v28 = vmul.f32 %v1108_v24, %v1108_v24 }
 0x439   : > { %v1109_v30 = vsub.f32 %v5486_v16, %v1106_v27  ;;  %v1114_v31 = vsel %vm1094_vm2, %v1111_v28, 0.0 }
 0x43a   : > { %1115 = vadd.xlane.f32.xlu1 %v1114_v31 }
 0x43b   : > { %v1112_v33 = vmul.f32 %v1109_v30, %v1109_v30 }
 0x43d   : > { %v1117_v34 = vsel %vm1094_vm2, %v1112_v33, 0.0 }
 0x43e   : > { %1121 = vadd.xlane.f32.xlu1 %v1120_v32  ;;  %1118 = vadd.xlane.f32.xlu0 %v1117_v34 }
 0x4c7   : > { %v1116_v37 = vpop.xlane.xlu1 %1115 }
 0x4c8   : > { %v1123_v38 = vmul.f32 0.03125, %v1116_v37 }
 0x4ca   : > { %v1126_v39 = vadd.f32 1e-05, %v1123_v38 }
 0x4cb   : > { %v1122_v40 = vpop.xlane.xlu1 %1121  ;;  %v1119_v41 = vpop.xlane.xlu0 %1118 }
 0x4cc   : > { %3820 = vrsqrt.f32 %v1126_v39  ;;  %v1125_v42 = vmul.f32 0.03125, %v1122_v40  ;;  %v1124_v43 = vmul.f32 0.03125, %v1119_v41 }
 0x4ce   : > { %v1128_v44 = vadd.f32 1e-05, %v1125_v42  ;;  %v1127_v45 = vadd.f32 1e-05, %v1124_v43 }
 0x4d0   : > { %3822 = vrsqrt.f32 %v1128_v44 }
 0x4d1   : > { %3824 = vrsqrt.f32 %v1127_v45 }
 0x4d6   : > { %v3821_v46 = vpop.eup %3820 }
 0x4d7   : > { %v1132_v47 = vmul.f32 %v3821_v46, %v1108_v24 }
 0x4d9   : > { %v1141_v53 = vmul.f32 %v3188_v48, %v1132_v47 }
 0x4da   : > { %v3823_v49 = vpop.eup %3822 }
 0x4db   : > { %v3825_v50 = vpop.eup %3824  ;;  %v1134_v51 = vmul.f32 %v3823_v49, %v1110_v25  ;;  %v1150_v58 = vadd.f32 %v3189_v54, %v1141_v53 }
 0x4dc   : > { %v1133_v52 = vmul.f32 %v3825_v50, %v1109_v30 }
 0x4dd   : > { %v1143_v55 = vmul.f32 %v3188_v48, %v1134_v51 }
 0x4de   : > { %v1142_v56 = vmul.f32 %v3188_v48, %v1133_v52 }
 0x4df   : > { %v1152_v57 = vadd.f32 %v3189_v54, %v1143_v55 }
 0x4e0   : > { %v1151_v59 = vadd.f32 %v3189_v54, %v1142_v56 }
 0x4e1   : > { %v1154_v60 = vpack.c.bf16 %v1152_v57, %v1152_v57 }
 0x4e2   : > { %v1153_v61 = vpack.c.bf16 %v1151_v59, %v1150_v58 }
 0x4e4   : > { %3343 = vmatprep.mubr.msk.bf16.mxu1 %vm1094_vm2, %v1153_v61 }
 0x4e5   : > { %3344 = vmatmul.mubr.msk.bf16.vlgmr.msra.gmra.mrb[0].mxu1 %vm1094_vm2, %v1154_v60 }
 0x5b8   : > { %v3345_v63 = vpop.f32.mrb[0].mxu1 }
 0x5b9   : > { %v1231_v0 = vadd.f32 %v3345_v63, %v3192_v62  ;;  %v1222_v1 = vpop.f32.mrb[1].mxu1 }
 0x5ba   : > { %v1223_v2 = vadd.f32 %v3192_v62, %v1222_v1  ;;  %v3346_v3 = vpop.f32.mrb[2].mxu1 }
 0x5bb   : > { %v5509_v4 = vpack.c.bf16 %v1231_v0, %v1231_v0  ;;  %v1225_v5 = vpop.f32.mrb[3].mxu1  ;;  %v1244_v18 = vmul.f32 0.35355338, %v1231_v0 }
 0x5bc   : > { %v1226_v6 = vadd.f32 %v3192_v62, %v1225_v5  ;;  %v1242_v7 = vmul.f32 0.35355338, %v1223_v2  ;;  %v1238_v62 = vld [vmem:[%s5550_s10] sm:$0xf] }
 0x5bd   : > { %1253 = vrot.lane.b32.xlu1 %v5509_v4, %s4704_s22  ;;  %v5523_v19 = vpack.c.bf16 %v1244_v18, %v1244_v18  ;;  %v1650_v63 = vsel %vm1363_vm5, %v1238_v62, 0 }
 0x5be   : > { %v1243_v8 = vmul.f32 0.35355338, %v1226_v6  ;;  %v5512_v9 = vpack.c.bf16 %v1226_v6, %v1223_v2 }
 0x5c0   : > { %v5514_v10 = vpack.c.bf16 %v1243_v8, %v1242_v7  ;;  %1251 = vrot.lane.b32.xlu0 %v5512_v9, %s4704_s22  ;;  %s4713_s22 = smov 48  }
 0x5c2   : > { %3351 = vmatprep.mubr.msk.bf16.mxu1 %vm1255_vm3, %v5514_v10 }
 0x62f   : > { %v1254_v13 = vpop.permute.xlu1 %1253 }
 0x630   : > { %v1266_v17 = vsel %vm1255_vm3, %v1254_v13, 0 }
 0x632   : > { %v1252_v11 = vpop.permute.xlu0 %1251 }
 0x633   : > { %v1263_v12 = vsel %vm1255_vm3, %v1252_v11, 0  ;;  %3482 = vmatprep.subr.msk.bf16.mxu1 %vm1255_vm3, %v1252_v11 }
 0x634   : > { %3348 = vmatpush3.bf16.xpose.msra.mxu1 %v1263_v12 }
 0x635   : > { %3483 = vmatprep.subr.msk.bf16.mxu1 %vm1255_vm3, %v1254_v13 }
 0x63c   : > { %3350 = vmatpush3.bf16.xpose.msra.mxu1 %v1266_v17 }
 0x643   : > { %3352 = vmatmul.mubr.msk.bf16.vlgmr.msra.gmra.mrb[4].mxu1 %vm1255_vm3, %v5523_v19 }
 0x716   : > { %v3353_v20 = vpop.f32.mrb[4].mxu1 }
 0x717   : > { %v1302_v21 = vpop.f32.mrb[5].mxu1  ;;  %v1323_v26 = vsel %vm1316_vm4, %v3353_v20, -inf }
 0x718   : > { %v3354_v22 = vpop.f32.mrb[6].mxu1  ;;  %v1317_v23 = vsel %vm1316_vm4, %v1302_v21, -inf }
 0x719   : > { %1318 = vmax.xlane.f32.xlu1 %v1317_v23  ;;  %v1305_v24 = vpop.f32.mrb[7].mxu1 }
 0x71a   : > { %v1320_v25 = vsel %vm1316_vm4, %v1305_v24, -inf }
 0x71b   : > { %1321 = vmax.xlane.f32.xlu0 %v1320_v25 }
 0x71f   : > { %1324 = vmax.xlane.f32.xlu0 %v1323_v26 }
 0x7a6   : > { %v1319_v27 = vpop.xlane.xlu1 %1318 }
 0x7a7   : > { %v1326_v30 = vsub.f32 %v1302_v21, %v1319_v27 }
 0x7a8   : > { %v1322_v28 = vpop.xlane.xlu0 %1321 }
 0x7a9   : > { %v1327_v29 = vsub.f32 %v1305_v24, %v1322_v28  ;;  %v1329_v34 = vmul.f32 1.442695, %v1326_v30 }
 0x7ab   : > { %v1331_v31 = vmul.f32 1.442695, %v1327_v29 }
 0x7ac   : > { %v1325_v32 = vpop.xlane.xlu0 %1324 }
 0x7ad   : > { %3826 = vpow2.f32 %v1331_v31  ;;  %v1328_v33 = vsub.f32 %v3353_v20, %v1325_v32 }
 0x7af   : > { %v1333_v35 = vmul.f32 1.442695, %v1328_v33 }
 0x7b1   : > { %3828 = vpow2.f32 %v1333_v35 }
 0x7b2   : > { %3830 = vpow2.f32 %v1329_v34 }
 0x7b7   : > { %v3827_v36 = vpop.eup %3826 }
 0x7b8   : > { %v1338_v37 = vsel %vm1316_vm4, %v3827_v36, 0.0 }
 0x7b9   : > { %1339 = vadd.xlane.f32.xlu0 %v1338_v37 }
 0x7bb   : > { %v3829_v38 = vpop.eup %3828 }
 0x7bc   : > { %v1341_v39 = vsel %vm1316_vm4, %v3829_v38, 0.0  ;;  %v3831_v40 = vpop.eup %3830 }
 0x7bd   : > { %1342 = vadd.xlane.f32.xlu1 %v1341_v39  ;;  %v1335_v41 = vsel %vm1316_vm4, %v3831_v40, 0.0 }
 0x7c1   : > { %1336 = vadd.xlane.f32.xlu1 %v1335_v41 }
 0x7cf   : > { %1352 = vrot.lane.b32.xlu0 %v5512_v9, %s4705_s0 }
 0x7d2   : > { %1354 = vrot.lane.b32.xlu1 %v5509_v4, %s4705_s0  ;;  %s4714_s0 = smov 40  }
 0x7d3   : > { %1419 = vrot.lane.b32.xlu0 %v5514_v10, %s4706_s3 }
 0x7d6   : > { %1423 = vrot.lane.b32.xlu1 %v5512_v9, %s4707_s7 }
 0x7da   : > { %1425 = vrot.lane.b32.xlu1 %v5509_v4, %s4707_s7  ;;  %s2232_s7 = scalar_lea.vmem [#allocation23], %s5501_s11  ;;  %s2168_s11 = scalar_lea.vmem [#allocation14], %s5926_s28 }
 0x7de   : > { %1421 = vrot.lane.b32.xlu1 %v5523_v19, %s4706_s3  ;;  %s2157_s3 = scalar_lea.vmem [#allocation21], %s5926_s28 }
 0x846   : > { %v1340_v42 = vpop.xlane.xlu0 %1339 }
 0x84a   : > { %v1343_v43 = vpop.xlane.xlu1 %1342  ;;  %v1353_v44 = vpop.permute.xlu0 %1352 }
 0x84b   : > { %3355 = vmatprep.subr.bf16.mxu0 %v1353_v44  ;;  %3832 = vrcp.f32 %v1343_v43 }
 0x84c   : > { %3356 = vmatpush3.bf16.msra.mxu0 %v1353_v44  ;;  %3834 = vrcp.f32 %v1340_v42 }
 0x84e   : > { %v1337_v45 = vpop.xlane.xlu1 %1336  ;;  %v1420_v57 = vpop.permute.xlu0 %1419 }
 0x84f   : > { %3836 = vrcp.f32 %v1337_v45 }
 0x852   : > { %v1355_v46 = vpop.permute.xlu1 %1354 }
 0x853   : > { %3484 = vmatprep.subr.msk.bf16.mxu0 %vm1363_vm5, %v1355_v46  ;;  %v1365_v47 = vsel %vm1363_vm5, %v1355_v46, 0 }
 0x854   : > { %3358 = vmatpush3.bf16.msra.mxu0 %v1365_v47 }
 0x855   : > { %v3833_v48 = vpop.eup %3832 }
 0x856   : > { %v1424_v49 = vpop.permute.xlu1 %1423  ;;  %v3835_v50 = vpop.eup %3834  ;;  %v1349_v52 = vmul.f32 %v3833_v48, %v3829_v38 }
 0x857   : > { %3485 = vmatprep.subr.msk.bf16.mxu0 %vm1255_vm3, %v1424_v49  ;;  %v1348_v54 = vmul.f32 %v3835_v50, %v3827_v36  ;;  %v1434_v58 = vsel %vm1255_vm3, %v1424_v49, 0 }
 0x858   : > { %v1351_v56 = vpack.c.bf16 %v1349_v52, %v1349_v52 }
 0x859   : > { %v3837_v51 = vpop.eup %3836 }
 0x85a   : > { %v1347_v53 = vmul.f32 %v3837_v51, %v3831_v40  ;;  %v1426_v59 = vpop.permute.xlu1 %1425 }
 0x85b   : > { %v1437_v60 = vsel %vm1255_vm3, %v1426_v59, 0 }
 0x85c   : > { %v1350_v55 = vpack.c.bf16 %v1348_v54, %v1347_v53 }
 0x85e   : > { %3359 = vmatprep.mubr.msk.bf16.mxu0 %vm1316_vm4, %v1350_v55  ;;  %v1422_v61 = vpop.permute.xlu1 %1421 }
 0x85f   : > { %3360 = vmatmul.mubr.msk.bf16.vlgmr.msra.gmra.mrb[0].mxu0 %vm1316_vm4, %v1351_v56 }
 0x860   : > { %3364 = vmatpush3.bf16.xpose.msra.mxu0 %v1434_v58  ;;  %3367 = vmatprep.mubr.msk.bf16.mxu0 %vm1255_vm3, %v1420_v57 }
 0x861   : > { %3486 = vmatprep.subr.msk.bf16.mxu0 %vm1255_vm3, %v1426_v59 }
 0x868   : > { %3366 = vmatpush3.bf16.xpose.msra.mxu0 %v1437_v60 }
 0x869   : > { %3489 = vmatprep.subr.msk.bf16.mxu0 %vm1363_vm5, %v1238_v62 }
 0x86f   : > { %3368 = vmatmul.mubr.msk.bf16.vlgmr.msra.gmra.mrb[4].mxu0 %vm1255_vm3, %v1422_v61 }
 0x870   : > { %3386 = vmatpush3.bf16.msra.mxu0 %v1650_v63 }
 0x932   : > { %v3361_v0 = vpop.f32.mrb[0].mxu0 }
 0x933   : > { %v1401_v1 = vpop.f32.mrb[1].mxu0  ;;  %v1416_v6 = vpack.c.bf16 %v3361_v0, %v3361_v0 }
 0x934   : > { %v3362_v2 = vpop.f32.mrb[2].mxu0 }
 0x935   : > { %v1404_v3 = vpop.f32.mrb[3].mxu0 }
 0x936   : > { %v1415_v5 = vpack.c.bf16 %v1404_v3, %v1401_v1 }
 0x938   : > { %3387 = vmatprep.mubr.msk.bf16.mxu0 %vm1255_vm3, %v1415_v5 }
 0x939   : > { %3388 = vmatmul.mubr.msk.bf16.vlgmr.msra.gmra.mrb[8].mxu0 %vm1255_vm3, %v1416_v6 }
 0x942   : > { %v3369_v7 = vpop.f32.mrb[4].mxu0 }
 0x943   : > { %v1473_v8 = vpop.f32.mrb[5].mxu0  ;;  %v1493_v18 = vsel %vm1316_vm4, %v3369_v7, -inf }
 0x944   : > { %v3370_v11 = vpop.f32.mrb[6].mxu0  ;;  %v1487_v12 = vsel %vm1316_vm4, %v1473_v8, -inf }
 0x945   : > { %1488 = vmax.xlane.f32.xlu0 %v1487_v12  ;;  %v1476_v13 = vpop.f32.mrb[7].mxu0 }
 0x946   : > { %v1490_v17 = vsel %vm1316_vm4, %v1476_v13, -inf }
 0x947   : > { %1491 = vmax.xlane.f32.xlu1 %v1490_v17 }
 0x949   : > { %1494 = vmax.xlane.f32.xlu0 %v1493_v18 }
 0x9d2   : > { %v1489_v20 = vpop.xlane.xlu0 %1488 }
 0x9d3   : > { %v1496_v21 = vsub.f32 %v1473_v8, %v1489_v20 }
 0x9d4   : > { %v1492_v22 = vpop.xlane.xlu1 %1491 }
 0x9d5   : > { %v1499_v23 = vmul.f32 1.442695, %v1496_v21  ;;  %v1497_v24 = vsub.f32 %v1476_v13, %v1492_v22 }
 0x9d6   : > { %v1495_v25 = vpop.xlane.xlu0 %1494 }
 0x9d7   : > { %3838 = vpow2.f32 %v1499_v23  ;;  %v1501_v26 = vmul.f32 1.442695, %v1497_v24  ;;  %v1498_v27 = vsub.f32 %v3369_v7, %v1495_v25 }
 0x9d9   : > { %3840 = vpow2.f32 %v1501_v26  ;;  %v1503_v28 = vmul.f32 1.442695, %v1498_v27 }
 0x9db   : > { %3842 = vpow2.f32 %v1503_v28 }
 0x9e1   : > { %v3839_v29 = vpop.eup %3838 }
 0x9e2   : > { %v1505_v30 = vsel %vm1316_vm4, %v3839_v29, 0.0 }
 0x9e3   : > { %v3841_v31 = vpop.eup %3840  ;;  %1506 = vadd.xlane.f32.xlu0 %v1505_v30 }
 0x9e4   : > { %v1508_v34 = vsel %vm1316_vm4, %v3841_v31, 0.0 }
 0x9e5   : > { %v3843_v32 = vpop.eup %3842 }
 0x9e6   : > { %v1511_v33 = vsel %vm1316_vm4, %v3843_v32, 0.0 }
 0x9e7   : > { %1512 = vadd.xlane.f32.xlu1 %v1511_v33  ;;  %1509 = vadd.xlane.f32.xlu0 %v1508_v34 }
 0x9f8   : > { %1524 = vrot.lane.b32.xlu1 %v5509_v4, %s4708_s30 }
 0x9fc   : > { %1704 = vrot.lane.b32.xlu1 %v5512_v9, %s4709_s5 }
 0x9fd   : > { %1522 = vrot.lane.b32.xlu0 %v5512_v9, %s4708_s30  ;;  %s3260_s30 = sshll.u32 %s5926_s28, 5 }
 0xa00   : > { %1706 = vrot.lane.b32.xlu1 %v5509_v4, %s4709_s5  ;;  %s2396_s5 = scalar_lea.vmem [#allocation26], %s3260_s30 }
 0xa01   : > { %1700 = vrot.lane.b32.xlu0 %v5514_v10, %s4710_s6 }
 0xa04   : > { %1702 = vrot.lane.b32.xlu1 %v5523_v19, %s4710_s6  ;;  %s2237_s6 = scalar_lea.vmem [#allocation24], %s5926_s28 }
 0xa05   : > { %1931 = vrot.lane.b32.xlu0 %v5512_v9, %s4711_s29 }
 0xa08   : > { %1933 = vrot.lane.b32.xlu1 %v5509_v4, %s4711_s29  ;;  %s2487_s29 = scalar_lea.vmem [#allocation27], %s5926_s28 }
 0xa09   : > { %1927 = vrot.lane.b32.xlu0 %v5514_v10, %s4712_s2  ;;  %v1239_v10 = vld [vmem:[%s5550_s10 + $0x4] sm:$0xf] }
 0xa0a   : > { %v1593_v52 = vsel %vm1363_vm5, %v1239_v10, 0 }
 0xa0c   : > { %1929 = vrot.lane.b32.xlu1 %v5523_v19, %s4712_s2  ;;  %v5573_v35 = vpop.f32.mrb[8].mxu0 }
 0xa0d   : > { %v5575_v36 = vpop.f32.mrb[9].mxu0 }
 0xa0e   : > { %v3390_v37 = vpop.f32.mrb[10].mxu0 }
 0xa0f   : > { %v5577_v38 = vpop.f32.mrb[11].mxu0 }
 0xa70   : > { %v1507_v39 = vpop.xlane.xlu0 %1506 }
 0xa71   : > { %3844 = vrcp.f32 %v1507_v39 }
 0xa74   : > { %v1510_v40 = vpop.xlane.xlu0 %1509  ;;  %v1513_v41 = vpop.xlane.xlu1 %1512 }
 0xa75   : > { %3846 = vrcp.f32 %v1510_v40 }
 0xa76   : > { %3848 = vrcp.f32 %v1513_v41 }
 0xa78   : > { %v1523_v42 = vpop.permute.xlu0 %1522  ;;  %v1525_v43 = vpop.permute.xlu1 %1524 }
 0xa79   : > { %3371 = vmatprep.subr.bf16.mxu1 %v1523_v42  ;;  %v1534_v44 = vsel %vm1363_vm5, %v1525_v43, 0 }
 0xa7a   : > { %3372 = vmatpush3.bf16.msra.mxu1 %v1523_v42 }
 0xa7b   : > { %3487 = vmatprep.subr.msk.bf16.mxu1 %vm1363_vm5, %v1525_v43  ;;  %v3845_v19 = vpop.eup %3844 }
 0xa7c   : > { %v1517_v47 = vmul.f32 %v3845_v19, %v3839_v29  ;;  %v1705_v53 = vpop.permute.xlu1 %1704  ;;  %v1701_v60 = vpop.permute.xlu0 %1700 }
 0xa7d   : > { %v1715_v61 = vsel %vm1255_vm3, %v1705_v53, 0 }
 0xa7e   : > { %3374 = vmatpush3.bf16.msra.mxu1 %v1534_v44 }
 0xa7f   : > { %v3847_v45 = vpop.eup %3846  ;;  %3488 = vmatprep.subr.msk.bf16.mxu1 %vm1363_vm5, %v1239_v10 }
 0xa80   : > { %v3849_v46 = vpop.eup %3848  ;;  %v1518_v48 = vmul.f32 %v3847_v45, %v3841_v31  ;;  %v1707_v62 = vpop.permute.xlu1 %1706 }
 0xa81   : > { %v1519_v49 = vmul.f32 %v3849_v46, %v3843_v32  ;;  %v1718_v63 = vsel %vm1255_vm3, %v1707_v62, 0  ;;  %v1932_v0 = vpop.permute.xlu0 %1931 }
 0xa82   : > { %v1520_v50 = vpack.c.bf16 %v1518_v48, %v1517_v47  ;;  %v1942_v2 = vsel %vm1255_vm3, %v1932_v0, 0 }
 0xa83   : > { %v1521_v51 = vpack.c.bf16 %v1519_v49, %v1519_v49 }
 0xa84   : > { %3375 = vmatprep.mubr.msk.bf16.mxu1 %vm1316_vm4, %v1520_v50  ;;  %v1703_v1 = vpop.permute.xlu1 %1702 }
 0xa85   : > { %3376 = vmatmul.mubr.msk.bf16.vlgmr.msra.gmra.mrb[8].mxu1 %vm1316_vm4, %v1521_v51  ;;  %v1928_v3 = vpop.permute.xlu0 %1927 }
 0xa86   : > { %3380 = vmatpush3.bf16.msra.mxu1 %v1593_v52 }
 0xa87   : > { %3490 = vmatprep.subr.msk.bf16.mxu1 %vm1255_vm3, %v1705_v53 }
 0xa88   : > { %v1934_v5 = vpop.permute.xlu1 %1933 }
 0xa89   : > { %v1945_v6 = vsel %vm1255_vm3, %v1934_v5, 0 }
 0xa8c   : > { %v1930_v7 = vpop.permute.xlu1 %1929 }
 0xb58   : > { %v3377_v54 = vpop.f32.mrb[8].mxu1 }
 0xb59   : > { %v1570_v55 = vpop.f32.mrb[9].mxu1  ;;  %v1585_v59 = vpack.c.bf16 %v3377_v54, %v3377_v54 }
 0xb5a   : > { %v3378_v56 = vpop.f32.mrb[10].mxu1 }
 0xb5b   : > { %v1573_v57 = vpop.f32.mrb[11].mxu1 }
 0xb5c   : > { %v1584_v58 = vpack.c.bf16 %v1573_v57, %v1570_v55 }
 0xb5e   : > { %3381 = vmatprep.mubr.msk.bf16.mxu1 %vm1255_vm3, %v1584_v58 }
 0xb5f   : > { %3382 = vmatmul.mubr.msk.bf16.vlgmr.msra.gmra.mrb[12].mxu1 %vm1255_vm3, %v1585_v59 }
 0xb60   : > { %3392 = vmatpush3.bf16.xpose.msra.mxu1 %v1715_v61  ;;  %3395 = vmatprep.mubr.msk.bf16.mxu1 %vm1255_vm3, %v1701_v60 }
 0xb61   : > { %3491 = vmatprep.subr.msk.bf16.mxu1 %vm1255_vm3, %v1707_v62 }
 0xb68   : > { %3394 = vmatpush3.bf16.xpose.msra.mxu1 %v1718_v63 }
 0xb69   : > { %3494 = vmatprep.subr.msk.bf16.mxu1 %vm1255_vm3, %v1932_v0 }
 0xb6f   : > { %3396 = vmatmul.mubr.msk.bf16.vlgmr.msra.gmra.mrb[16].mxu1 %vm1255_vm3, %v1703_v1 }
 0xb70   : > { %3414 = vmatpush3.bf16.xpose.msra.mxu1 %v1942_v2  ;;  %3417 = vmatprep.mubr.msk.bf16.mxu1 %vm1255_vm3, %v1928_v3 }
 0xb71   : > { %3495 = vmatprep.subr.msk.bf16.mxu1 %vm1255_vm3, %v1934_v5 }
 0xb78   : > { %3416 = vmatpush3.bf16.xpose.msra.mxu1 %v1945_v6 }
 0xb7f   : > { %3418 = vmatmul.mubr.msk.bf16.vlgmr.msra.gmra.mrb[20].mxu1 %vm1255_vm3, %v1930_v7 }
 0xc32   : > { %v3383_v8 = vpop.f32.mrb[12].mxu1 }
 0xc33   : > { %v5601_v11 = vadd.f32 %v5573_v35, %v3383_v8  ;;  %v1629_v12 = vpop.f32.mrb[13].mxu1 }
 0xc34   : > { %v5604_v13 = vadd.f32 %v5575_v36, %v1629_v12  ;;  %v3384_v17 = vpop.f32.mrb[14].mxu1 }
 0xc35   : > { %v1632_v18 = vpop.f32.mrb[15].mxu1 }
 0xc36   : > { %v5607_v20 = vadd.f32 %v5577_v38, %v1632_v18 }
 0xc42   : > { %v3397_v21 = vpop.f32.mrb[16].mxu1 }
 0xc43   : > { %v1754_v22 = vpop.f32.mrb[17].mxu1  ;;  %v1774_v27 = vsel %vm1316_vm4, %v3397_v21, -inf }
 0xc44   : > { %v3398_v23 = vpop.f32.mrb[18].mxu1  ;;  %v1768_v24 = vsel %vm1316_vm4, %v1754_v22, -inf }
 0xc45   : > { %1769 = vmax.xlane.f32.xlu0 %v1768_v24  ;;  %v1757_v25 = vpop.f32.mrb[19].mxu1  ;;  %v1240_v23 = vld [vmem:[%s5550_s10 + $0x8] sm:$0xf] }
 0xc46   : > { %v1771_v26 = vsel %vm1316_vm4, %v1757_v25, -inf  ;;  %v1874_v24 = vsel %vm1363_vm5, %v1240_v23, 0 }
 0xc47   : > { %1772 = vmax.xlane.f32.xlu1 %v1771_v26 }
 0xc49   : > { %1775 = vmax.xlane.f32.xlu0 %v1774_v27 }
 0xc52   : > { %v5612_v28 = vpop.f32.mrb[20].mxu1 }
 0xc53   : > { %v5614_v29 = vpop.f32.mrb[21].mxu1  ;;  %v2001_v47 = vsel %vm1316_vm4, %v5612_v28, -inf }
 0xc54   : > { %v3420_v30 = vpop.f32.mrb[22].mxu1  ;;  %v1995_v45 = vsel %vm1316_vm4, %v5614_v29, -inf }
 0xc55   : > { %v1984_v31 = vpop.f32.mrb[23].mxu1 }
 0xc56   : > { %v1998_v46 = vsel %vm1316_vm4, %v1984_v31, -inf }
 0xcd2   : > { %v1770_v32 = vpop.xlane.xlu0 %1769 }
 0xcd3   : > { %v1777_v33 = vsub.f32 %v1754_v22, %v1770_v32 }
 0xcd4   : > { %v1773_v34 = vpop.xlane.xlu1 %1772 }
 0xcd5   : > { %v1780_v35 = vmul.f32 1.442695, %v1777_v33  ;;  %v1778_v36 = vsub.f32 %v1757_v25, %v1773_v34 }
 0xcd6   : > { %v1776_v37 = vpop.xlane.xlu0 %1775 }
 0xcd7   : > { %3850 = vpow2.f32 %v1780_v35  ;;  %v1782_v38 = vmul.f32 1.442695, %v1778_v36  ;;  %v1779_v39 = vsub.f32 %v3397_v21, %v1776_v37 }
 0xcd9   : > { %3852 = vpow2.f32 %v1782_v38  ;;  %v1784_v40 = vmul.f32 1.442695, %v1779_v39 }
 0xcdb   : > { %3854 = vpow2.f32 %v1784_v40 }
 0xce1   : > { %v3851_v41 = vpop.eup %3850 }
 0xce2   : > { %v1786_v42 = vsel %vm1316_vm4, %v3851_v41, 0.0 }
 0xce3   : > { %v3853_v43 = vpop.eup %3852  ;;  %1787 = vadd.xlane.f32.xlu0 %v1786_v42 }
 0xce4   : > { %v1789_v44 = vsel %vm1316_vm4, %v3853_v43, 0.0 }
 0xce5   : > { %v3855_v10 = vpop.eup %3854 }
 0xce6   : > { %v1792_v19 = vsel %vm1316_vm4, %v3855_v10, 0.0 }
 0xce7   : > { %1793 = vadd.xlane.f32.xlu1 %v1792_v19  ;;  %1790 = vadd.xlane.f32.xlu0 %v1789_v44 }
 0xcf8   : > { %1805 = vrot.lane.b32.xlu1 %v5509_v4, %s4713_s22 }
 0xcfd   : > { %1803 = vrot.lane.b32.xlu0 %v5512_v9, %s4713_s22 }
 0xd1c   : > { %1996 = vmax.xlane.f32.xlu1 %v1995_v45  ;;  %1999 = vmax.xlane.f32.xlu0 %v1998_v46 }
 0xd20   : > { %2002 = vmax.xlane.f32.xlu0 %v2001_v47 }
 0xd70   : > { %v1788_v48 = vpop.xlane.xlu0 %1787 }
 0xd71   : > { %3856 = vrcp.f32 %v1788_v48 }
 0xd74   : > { %v1791_v49 = vpop.xlane.xlu0 %1790  ;;  %v1794_v50 = vpop.xlane.xlu1 %1793 }
 0xd75   : > { %3858 = vrcp.f32 %v1791_v49 }
 0xd76   : > { %3860 = vrcp.f32 %v1794_v50 }
 0xd78   : > { %v1804_v51 = vpop.permute.xlu0 %1803  ;;  %v1806_v52 = vpop.permute.xlu1 %1805 }
 0xd79   : > { %3399 = vmatprep.subr.bf16.mxu0 %v1804_v51  ;;  %v1815_v54 = vsel %vm1363_vm5, %v1806_v52, 0 }
 0xd7a   : > { %3400 = vmatpush3.bf16.msra.mxu0 %v1804_v51 }
 0xd7b   : > { %3492 = vmatprep.subr.msk.bf16.mxu0 %vm1363_vm5, %v1806_v52  ;;  %v3857_v53 = vpop.eup %3856 }
 0xd7c   : > { %v1798_v57 = vmul.f32 %v3857_v53, %v3851_v41 }
 0xd7e   : > { %3402 = vmatpush3.bf16.msra.mxu0 %v1815_v54 }
 0xd7f   : > { %v3859_v55 = vpop.eup %3858  ;;  %3493 = vmatprep.subr.msk.bf16.mxu0 %vm1363_vm5, %v1240_v23 }
 0xd80   : > { %v3861_v56 = vpop.eup %3860  ;;  %v1799_v58 = vmul.f32 %v3859_v55, %v3853_v43  ;;  %v1241_v43 = vld [vmem:[%s5550_s10 + $0xc] sm:$0xf]  ;;  %s2170_s10 = scalar_lea.vmem [#allocation15], %s5926_s28 }
 0xd81   : > { %v1800_v59 = vmul.f32 %v3861_v56, %v3855_v10  ;;  %v2101_v10 = vsel %vm1363_vm5, %v1241_v43, 0 }
 0xd82   : > { %v1801_v60 = vpack.c.bf16 %v1799_v58, %v1798_v57 }
 0xd83   : > { %v1802_v61 = vpack.c.bf16 %v1800_v59, %v1800_v59  ;;  %v3222_v59 = vld [vmem:[%s2157_s3] ss:$0 sm:$0xff] }
 0xd84   : > { %3403 = vmatprep.mubr.msk.bf16.mxu0 %vm1316_vm4, %v1801_v60 }
 0xd85   : > { %3404 = vmatmul.mubr.msk.bf16.vlgmr.msra.gmra.mrb[12].mxu0 %vm1316_vm4, %v1802_v61 }
 0xd86   : > { %3408 = vmatpush3.bf16.msra.mxu0 %v1874_v24 }
 0xda9   : > { %v2000_v62 = vpop.xlane.xlu0 %1999  ;;  %v1997_v63 = vpop.xlane.xlu1 %1996 }
 0xdaa   : > { %v2005_v0 = vsub.f32 %v1984_v31, %v2000_v62  ;;  %v2004_v2 = vsub.f32 %v5614_v29, %v1997_v63 }
 0xdac   : > { %v2009_v1 = vmul.f32 1.442695, %v2005_v0  ;;  %v2007_v6 = vmul.f32 1.442695, %v2004_v2 }
 0xdad   : > { %v2003_v3 = vpop.xlane.xlu0 %2002 }
 0xdae   : > { %3862 = vpow2.f32 %v2009_v1  ;;  %v2006_v5 = vsub.f32 %v5612_v28, %v2003_v3 }
 0xdb0   : > { %v2011_v7 = vmul.f32 1.442695, %v2006_v5 }
 0xdb2   : > { %3864 = vpow2.f32 %v2011_v7 }
 0xdb3   : > { %3866 = vpow2.f32 %v2007_v6 }
 0xdb8   : > { %v3863_v8 = vpop.eup %3862 }
 0xdb9   : > { %v2016_v12 = vsel %vm1316_vm4, %v3863_v8, 0.0 }
 0xdba   : > { %2017 = vadd.xlane.f32.xlu0 %v2016_v12 }
 0xdbc   : > { %v3865_v17 = vpop.eup %3864 }
 0xdbd   : > { %v2019_v18 = vsel %vm1316_vm4, %v3865_v17, 0.0  ;;  %v3867_v21 = vpop.eup %3866 }
 0xdbe   : > { %2020 = vadd.xlane.f32.xlu1 %v2019_v18  ;;  %v2013_v22 = vsel %vm1316_vm4, %v3867_v21, 0.0 }
 0xdc2   : > { %2014 = vadd.xlane.f32.xlu1 %v2013_v22 }
 0xdd0   : > { %2030 = vrot.lane.b32.xlu0 %v5512_v9, %s4714_s0 }
 0xdd3   : > { %2032 = vrot.lane.b32.xlu1 %v5509_v4, %s4714_s0 }
 0xe47   : > { %v2018_v25 = vpop.xlane.xlu0 %2017 }
 0xe48   : > { %3868 = vrcp.f32 %v2018_v25 }
 0xe4b   : > { %v2031_v26 = vpop.permute.xlu0 %2030  ;;  %v2021_v27 = vpop.xlane.xlu1 %2020 }
 0xe4c   : > { %3421 = vmatprep.subr.bf16.mxu0 %v2031_v26 }
 0xe4f   : > { %v2015_v28 = vpop.xlane.xlu1 %2014 }
 0xe50   : > { %3870 = vrcp.f32 %v2015_v28  ;;  %v3814_v28 = vld [vmem:[%s2232_s7] sm:$0xff]  }
 0xe51   : > { %3872 = vrcp.f32 %v2021_v27  ;;  %3435 = vmatprep.subr.bf16.mxu1 %v3814_v28 }
 0xe52   : > { %v3869_v29 = vpop.eup %3868  ;;  %3436 = vmatpush3.bf16.msra.mxu1 %v3814_v28 }
 0xe53   : > { %v2026_v36 = vmul.f32 %v3869_v29, %v3863_v8  ;;  %v2033_v39 = vpop.permute.xlu1 %2032  ;;  %v3815_v29 = vld [vmem:[%s2232_s7 + $0x8] sm:$0xff]  }
 0xe54   : > { %v2042_v41 = vsel %vm1363_vm5, %v2033_v39, 0  ;;  %3437 = vmatprep.subr.bf16.mxu1 %v3815_v29 }
 0xe56   : > { %3438 = vmatpush3.bf16.msra.mxu1 %v3815_v29 }
 0xe58   : > { %v3405_v30 = vpop.f32.mrb[12].mxu0 }
 0xe59   : > { %v1851_v31 = vpop.f32.mrb[13].mxu0  ;;  %v1866_v37 = vpack.c.bf16 %v3405_v30, %v3405_v30 }
 0xe5a   : > { %v3871_v32 = vpop.eup %3870  ;;  %v3406_v33 = vpop.f32.mrb[14].mxu0 }
 0xe5b   : > { %v1854_v34 = vpop.f32.mrb[15].mxu0  ;;  %v2025_v35 = vmul.f32 %v3871_v32, %v3867_v21  ;;  %v3873_v38 = vpop.eup %3872 }
 0xe5c   : > { %v1865_v9 = vpack.c.bf16 %v1854_v34, %v1851_v31  ;;  %v2027_v40 = vmul.f32 %v3873_v38, %v3865_v17  ;;  %v3223_v38 = vld [vmem:[%s2168_s11] ss:$0 sm:$0xff] }
 0xe5d   : > { %v2028_v4 = vpack.c.bf16 %v2026_v36, %v2025_v35 }
 0xe5e   : > { %3409 = vmatprep.mubr.msk.bf16.mxu0 %vm1255_vm3, %v1865_v9  ;;  %v2029_v42 = vpack.c.bf16 %v2027_v40, %v2027_v40 }
 0xe5f   : > { %3410 = vmatmul.mubr.msk.bf16.vlgmr.msra.gmra.mrb[16].mxu0 %vm1255_vm3, %v1866_v37 }
 0xe60   : > { %3422 = vmatpush3.bf16.msra.mxu0 %v2031_v26  ;;  %3425 = vmatprep.mubr.msk.bf16.mxu0 %vm1316_vm4, %v2028_v4 }
 0xe61   : > { %3496 = vmatprep.subr.msk.bf16.mxu0 %vm1363_vm5, %v2033_v39 }
 0xe64   : > { %3424 = vmatpush3.bf16.msra.mxu0 %v2042_v41 }
 0xe65   : > { %3497 = vmatprep.subr.msk.bf16.mxu0 %vm1363_vm5, %v1241_v43  ;;  %v3224_v43 = vld [vmem:[%s2170_s10] ss:$0 sm:$0xff] }
 0xe67   : > { %3426 = vmatmul.mubr.msk.bf16.vlgmr.msra.gmra.mrb[20].mxu0 %vm1316_vm4, %v2029_v42 }
 0xe68   : > { %3430 = vmatpush3.bf16.msra.mxu0 %v2101_v10 }
 0xf32   : > { %v3411_v19 = vpop.f32.mrb[16].mxu0 }
 0xf33   : > { %v1926_v44 = vadd.f32 %v3411_v19, %v5601_v11  ;;  %v1910_v45 = vpop.f32.mrb[17].mxu0 }
 0xf34   : > { %v1924_v46 = vadd.f32 %v1910_v45, %v5604_v13  ;;  %v3412_v47 = vpop.f32.mrb[18].mxu0 }
 0xf35   : > { %v1913_v48 = vpop.f32.mrb[19].mxu0 }
 0xf36   : > { %v1925_v49 = vadd.f32 %v1913_v48, %v5607_v20 }
 0xf3a   : > { %v3427_v50 = vpop.f32.mrb[20].mxu0 }
 0xf3b   : > { %v2078_v51 = vpop.f32.mrb[21].mxu0  ;;  %v2093_v55 = vpack.c.bf16 %v3427_v50, %v3427_v50 }
 0xf3c   : > { %v3428_v52 = vpop.f32.mrb[22].mxu0 }
 0xf3d   : > { %v2081_v53 = vpop.f32.mrb[23].mxu0  ;;  %v3817_v52 = vld [vmem:[%s2396_s5 + $0x8] sm:$0xff]  }
 0xf3e   : > { %v2092_v54 = vpack.c.bf16 %v2081_v53, %v2078_v51  ;;  %v3816_v51 = vld [vmem:[%s2396_s5] sm:$0xff]   ;;  %v3818_v53 = vld [vmem:[%s2396_s5 + $0x10] sm:$0xff]  }
 0xf3f   : > { %3443 = vmatprep.subr.bf16.mxu0 %v3816_v51 }
 0xf40   : > { %3431 = vmatprep.mubr.msk.bf16.mxu0 %vm1255_vm3, %v2092_v54  ;;  %v3819_v54 = vld [vmem:[%s2396_s5 + $0x18] sm:$0xff]  }
 0xf41   : > { %3432 = vmatmul.mubr.msk.bf16.vlgmr.msra.gmra.mrb[24].mxu0 %vm1255_vm3, %v2093_v55  ;;  %v3226_v55 = vld [vmem:[%s2237_s6] ss:$0 sm:$0xff] }
 0xf42   : > { %3444 = vmatpush3.bf16.msra.mxu0 %v3816_v51 }
 0xf43   : > { %3445 = vmatprep.subr.bf16.mxu0 %v3817_v52 }
 0xf46   : > { %3446 = vmatpush3.bf16.msra.mxu0 %v3817_v52 }
 0xf47   : > { %3447 = vmatprep.subr.bf16.mxu0 %v3818_v53 }
 0xf4a   : > { %3448 = vmatpush3.bf16.msra.mxu0 %v3818_v53 }
 0xf4b   : > { %3449 = vmatprep.subr.bf16.mxu0 %v3819_v54 }
 0xf4e   : > { %3450 = vmatpush3.bf16.msra.mxu0 %v3819_v54 }
0x1014   : > { %v3433_v56 = vpop.f32.mrb[24].mxu0 }
0x1015   : > { %v2153_v11 = vadd.f32 %v3433_v56, %v1926_v44  ;;  %v2137_v57 = vpop.f32.mrb[25].mxu0 }
0x1016   : > { %v2151_v58 = vadd.f32 %v2137_v57, %v1924_v46  ;;  %v3434_v13 = vpop.f32.mrb[26].mxu0 }
0x1017   : > { %v2140_v60 = vpop.f32.mrb[27].mxu0  ;;  %v2156_v62 = vadd.f32 %v2153_v11, %v5484_v15 }
0x1018   : > { %v2154_v20 = vadd.f32 %v2151_v58, %v5482_v14  ;;  %v2152_v61 = vadd.f32 %v2140_v60, %v1925_v49 }
0x1019   : > { %v5664_v3 = vadd.f32 %v3222_v59, %v2156_v62 }
0x101a   : > { %v5657_v63 = vadd.f32 %v3222_v59, %v2154_v20  ;;  %v2155_v0 = vadd.f32 %v2152_v61, %v5486_v16 }
0x101b   : > { %v2178_v14 = vsel %vm1094_vm2, %v5664_v3, 0.0 }
0x101c   : > { %v5660_v1 = vadd.f32 %v3222_v59, %v2155_v0  ;;  %v2172_v2 = vsel %vm1094_vm2, %v5657_v63, 0.0 }
0x101d   : > { %2173 = vadd.xlane.f32.xlu1 %v2172_v2 }
0x101e   : > { %v2175_v5 = vsel %vm1094_vm2, %v5660_v1, 0.0 }
0x101f   : > { %2176 = vadd.xlane.f32.xlu0 %v2175_v5 }
0x1023   : > { %2179 = vadd.xlane.f32.xlu0 %v2178_v14 }
0x10aa   : > { %v2174_v15 = vpop.xlane.xlu1 %2173 }
0x10ab   : > { %v2181_v6 = vmul.f32 0.03125, %v2174_v15 }
0x10ac   : > { %v2177_v7 = vpop.xlane.xlu0 %2176 }
0x10ad   : > { %v2184_v16 = vsub.f32 %v5657_v63, %v2181_v6  ;;  %v2182_v8 = vmul.f32 0.03125, %v2177_v7 }
0x10af   : > { %v2185_v12 = vsub.f32 %v5660_v1, %v2182_v8  ;;  %v2187_v17 = vmul.f32 %v2184_v16, %v2184_v16 }
0x10b0   : > { %v2180_v18 = vpop.xlane.xlu0 %2179 }
0x10b1   : > { %v2183_v21 = vmul.f32 0.03125, %v2180_v18  ;;  %v2190_v22 = vsel %vm1094_vm2, %v2187_v17, 0.0  ;;  %v2188_v23 = vmul.f32 %v2185_v12, %v2185_v12 }
0x10b2   : > { %2191 = vadd.xlane.f32.xlu1 %v2190_v22 }
0x10b3   : > { %v2186_v24 = vsub.f32 %v5664_v3, %v2183_v21  ;;  %v2193_v25 = vsel %vm1094_vm2, %v2188_v23, 0.0 }
0x10b4   : > { %2194 = vadd.xlane.f32.xlu0 %v2193_v25 }
0x10b5   : > { %v2189_v26 = vmul.f32 %v2186_v24, %v2186_v24 }
0x10b7   : > { %v2196_v27 = vsel %vm1094_vm2, %v2189_v26, 0.0 }
0x10b8   : > { %2197 = vadd.xlane.f32.xlu1 %v2196_v27 }
0x113f   : > { %v2192_v30 = vpop.xlane.xlu1 %2191 }
0x1140   : > { %v2199_v31 = vmul.f32 0.03125, %v2192_v30 }
0x1141   : > { %v2195_v32 = vpop.xlane.xlu0 %2194 }
0x1142   : > { %v2202_v33 = vadd.f32 1e-05, %v2199_v31  ;;  %v2200_v34 = vmul.f32 0.03125, %v2195_v32 }
0x1144   : > { %3874 = vrsqrt.f32 %v2202_v33  ;;  %v2203_v35 = vadd.f32 1e-05, %v2200_v34 }
0x1145   : > { %v2198_v36 = vpop.xlane.xlu1 %2197 }
0x1146   : > { %3876 = vrsqrt.f32 %v2203_v35  ;;  %v2201_v9 = vmul.f32 0.03125, %v2198_v36 }
0x1148   : > { %v2204_v37 = vadd.f32 1e-05, %v2201_v9 }
0x114a   : > { %3878 = vrsqrt.f32 %v2204_v37 }
0x114e   : > { %v3875_v4 = vpop.eup %3874 }
0x114f   : > { %v2208_v39 = vmul.f32 %v3875_v4, %v2184_v16 }
0x1150   : > { %v3877_v40 = vpop.eup %3876 }
0x1151   : > { %v2209_v41 = vmul.f32 %v3877_v40, %v2185_v12  ;;  %v2217_v42 = vmul.f32 %v3223_v38, %v2208_v39 }
0x1153   : > { %v2218_v10 = vmul.f32 %v3223_v38, %v2209_v41  ;;  %v2226_v45 = vadd.f32 %v3224_v43, %v2217_v42 }
0x1154   : > { %v3879_v19 = vpop.eup %3878 }
0x1155   : > { %v2210_v44 = vmul.f32 %v3879_v19, %v2186_v24  ;;  %v2227_v46 = vadd.f32 %v3224_v43, %v2218_v10 }
0x1157   : > { %v2219_v47 = vmul.f32 %v3223_v38, %v2210_v44  ;;  %v2229_v48 = vpack.c.bf16 %v2227_v46, %v2226_v45 }
0x1159   : > { %3439 = vmatprep.mubr.msk.bf16.mxu1 %vm1094_vm2, %v2229_v48  ;;  %v2228_v49 = vadd.f32 %v3224_v43, %v2219_v47 }
0x115b   : > { %v2230_v50 = vpack.c.bf16 %v2228_v49, %v2228_v49 }
0x115d   : > { %3440 = vmatmul.mubr.msk.bf16.vlgmr.msra.gmra.mrb[24].mxu1 %vm1094_vm2, %v2230_v50 }
0x1230   : > { %v3441_v56 = vpop.f32.mrb[24].mxu1 }
0x1231   : > { %v5683_v11 = vadd.f32 %v3441_v56, %v3226_v55  ;;  %v2297_v57 = vpop.f32.mrb[25].mxu1 }
0x1232   : > { %v5685_v58 = vadd.f32 %v3226_v55, %v2297_v57  ;;  %v3442_v13 = vpop.f32.mrb[26].mxu1 }
0x1233   : > { %v5688_v59 = vmul.f32 0.70710677, %v5683_v11  ;;  %v2300_v60 = vpop.f32.mrb[27].mxu1 }
0x1234   : > { %v5691_v20 = vmul.f32 0.70710677, %v5685_v58  ;;  %v5693_v61 = vadd.f32 %v3226_v55, %v2300_v60 }
0x1235   : > { %v2319_v62 = vand.u32 2147483647, %v5688_v59  ;;  %vm2379_vm6 = vcmp.ge.f32.partialorder %v5688_v59, 0.0 }
0x1236   : > { %v2317_v0 = vand.u32 2147483647, %v5691_v20  ;;  %v5698_v2 = vmul.f32 0.70710677, %v5693_v61  ;;  %vm2377_vm7 = vcmp.ge.f32.partialorder %v5691_v20, 0.0 }
0x1237   : > { %v2322_v5 = vmul.f32 0.3275911, %v2319_v62  ;;  %v2361_v12 = vsub.f32 0.0, %v2319_v62 }
0x1238   : > { %v2320_v14 = vmul.f32 0.3275911, %v2317_v0  ;;  %v2318_v15 = vand.u32 2147483647, %v5698_v2  ;;  %v2359_v17 = vsub.f32 0.0, %v2317_v0  ;;  %vm2378_vm8 = vcmp.ge.f32.partialorder %v5698_v2, 0.0 }
0x1239   : > { %v2325_v6 = vadd.f32 1.0, %v2322_v5  ;;  %v2364_v21 = vmul.f32 %v2361_v12, %v2319_v62  ;;  %v2313_v12 = vmul.f32 0.5, %v5683_v11 }
0x123a   : > { %v2323_v7 = vadd.f32 1.0, %v2320_v14  ;;  %v2321_v16 = vmul.f32 0.3275911, %v2318_v15  ;;  %v2360_v22 = vsub.f32 0.0, %v2318_v15  ;;  %v2362_v25 = vmul.f32 %v2359_v17, %v2317_v0 }
0x123b   : > { %3880 = vrcp.f32 %v2325_v6  ;;  %v2369_v29 = vmul.f32 1.442695, %v2364_v21  ;;  %v2312_v21 = vmul.f32 0.5, %v5693_v61 }
0x123c   : > { %3882 = vrcp.f32 %v2323_v7  ;;  %v2324_v8 = vadd.f32 1.0, %v2321_v16  ;;  %v2363_v31 = vmul.f32 %v2360_v22, %v2318_v15  ;;  %v2365_v33 = vmul.f32 1.442695, %v2362_v25 }
0x123e   : > { %3884 = vrcp.f32 %v2324_v8  ;;  %v2367_v4 = vmul.f32 1.442695, %v2363_v31 }
0x123f   : > { %3886 = vpow2.f32 %v2369_v29 }
0x1240   : > { %3888 = vpow2.f32 %v2365_v33 }
0x1241   : > { %3890 = vpow2.f32 %v2367_v4 }
0x1245   : > { %v3881_v18 = vpop.eup %3880 }
0x1246   : > { %v3883_v23 = vpop.eup %3882  ;;  %v2334_v24 = vmul.f32 1.0614054, %v3881_v18 }
0x1247   : > { %v2332_v26 = vmul.f32 1.0614054, %v3883_v23 }
0x1248   : > { %v2337_v27 = vadd.f32 -1.4531521, %v2334_v24  ;;  %v3885_v28 = vpop.eup %3884 }
0x1249   : > { %v2335_v30 = vadd.f32 -1.4531521, %v2332_v26  ;;  %v2333_v34 = vmul.f32 1.0614054, %v3885_v28  ;;  %v3887_v50 = vpop.eup %3886 }
0x124a   : > { %v2340_v32 = vmul.f32 %v3881_v18, %v2337_v27  ;;  %v3889_v52 = vpop.eup %3888  ;;  %v3239_v27 = vld [vmem:[%s2487_s29] ss:$0 sm:$0xff] }
0x124b   : > { %v2338_v35 = vmul.f32 %v3883_v23, %v2335_v30  ;;  %v2336_v9 = vadd.f32 -1.4531521, %v2333_v34  ;;  %v3891_v13 = vpop.eup %3890 }
0x124c   : > { %v2343_v36 = vadd.f32 1.4214138, %v2340_v32 }
0x124d   : > { %v2341_v37 = vadd.f32 1.4214138, %v2338_v35  ;;  %v2339_v39 = vmul.f32 %v3885_v28, %v2336_v9 }
0x124e   : > { %v2346_v38 = vmul.f32 %v3881_v18, %v2343_v36 }
0x124f   : > { %v2344_v40 = vmul.f32 %v3883_v23, %v2341_v37  ;;  %v2342_v42 = vadd.f32 1.4214138, %v2339_v39 }
0x1250   : > { %v2349_v41 = vadd.f32 -0.28449672, %v2346_v38 }
0x1251   : > { %v2347_v43 = vadd.f32 -0.28449672, %v2344_v40  ;;  %v2345_v19 = vmul.f32 %v3885_v28, %v2342_v42 }
0x1252   : > { %v2352_v10 = vmul.f32 %v3881_v18, %v2349_v41 }
0x1253   : > { %v2350_v44 = vmul.f32 %v3883_v23, %v2347_v43  ;;  %v2348_v46 = vadd.f32 -0.28449672, %v2345_v19 }
0x1254   : > { %v2355_v45 = vadd.f32 0.2548296, %v2352_v10 }
0x1255   : > { %v2353_v47 = vadd.f32 0.2548296, %v2350_v44  ;;  %v2351_v49 = vmul.f32 %v3885_v28, %v2348_v46  ;;  %v3894_v44 = vld [vmem:[#allocation32] sm:$0xff] (!%p3240_p0)   ;;  %v4715_v46 = vmov (!%p3240_p0), 0.0  }
0x1256   : > { %v2358_v48 = vmul.f32 %v3881_v18, %v2355_v45  ;;  %v2311_v18 = vmul.f32 0.5, %v5685_v58  ;;  %v3895_v45 = vld [vmem:[#allocation33] sm:$0xff] (!%p3240_p0)   ;;  %3455 = vmatprep.subr.bf16.mxu0 (!%p3240_p0), %v4715_v46  ;;  %3463 = vmatprep.subr.bf16.mxu1 (!%p3240_p0), %v4715_v46 }
0x1257   : > { %v2356_v51 = vmul.f32 %v3883_v23, %v2353_v47  ;;  %v2354_v54 = vadd.f32 0.2548296, %v2351_v49  ;;  %3464 = vmatpush3.bf16.msra.mxu1 (!%p3240_p0), %v3895_v45  ;;  %v3896_v47 = vld [vmem:[#allocation32 + $0x8] sm:$0xff] (!%p3240_p0)   ;;  %3467 = vmatprep.mubr.msk.bf16.mxu1 (!%p3240_p0), %vm4716_vm10, %v4715_v46 }
0x1258   : > { %v2373_v53 = vmul.f32 %v3887_v50, %v2358_v48  ;;  %v3897_v48 = vld [vmem:[#allocation33 + $0x8] sm:$0xff] (!%p3240_p0)   ;;  %3465 = vmatprep.subr.bf16.mxu1 (!%p3240_p0), %v4715_v46 }
0x1259   : > { %v2371_v55 = vmul.f32 %v3889_v52, %v2356_v51  ;;  %v2357_v57 = vmul.f32 %v3885_v28, %v2354_v54 }
0x125a   : > { %v2376_v56 = vsub.f32 1.0, %v2373_v53 }
0x125b   : > { %v2374_v60 = vsub.f32 1.0, %v2371_v55  ;;  %v2372_v0 = vmul.f32 %v3891_v13, %v2357_v57  ;;  %3466 = vmatpush3.bf16.msra.mxu1 (!%p3240_p0), %v3897_v48 }
0x125c   : > { %v2382_v62 = vsub.f32 0.0, %v2376_v56 }
0x125d   : > { %v2380_v5 = vsub.f32 0.0, %v2374_v60  ;;  %v2375_v15 = vsub.f32 1.0, %v2372_v0 }
0x125e   : > { %v2385_v14 = vsel %vm2379_vm6, %v2376_v56, %v2382_v62  ;;  %v3241_v62 = vld [vmem:[#allocation29] ss:$0 sm:$0xff] (!%p3240_p0) }
0x125f   : > { %v2383_v6 = vsel %vm2377_vm7, %v2374_v60, %v2380_v5  ;;  %v2388_v7 = vadd.f32 1.0, %v2385_v14  ;;  %v2381_v16 = vsub.f32 0.0, %v2375_v15 }
0x1260   : > { %v2386_v8 = vadd.f32 1.0, %v2383_v6 }
0x1261   : > { %v2384_v17 = vsel %vm2378_vm8, %v2375_v15, %v2381_v16  ;;  %v2391_v22 = vmul.f32 %v2388_v7, %v2313_v12  ;;  %v3242_v7 = vld [vmem:[#allocation30] ss:$0 sm:$0xff] (!%p3240_p0) }
0x1262   : > { %v2387_v59 = vadd.f32 1.0, %v2384_v17  ;;  %v2389_v23 = vmul.f32 %v2386_v8, %v2311_v18 }
0x1263   : > { %v2393_v25 = vpack.c.bf16 %v2391_v22, %v2391_v22 }
0x1264   : > { %v2390_v24 = vmul.f32 %v2387_v59, %v2312_v21 }
0x1266   : > { %v2392_v20 = vpack.c.bf16 %v2390_v24, %v2389_v23 }
0x1268   : > { %3451 = vmatprep.mubr.msk.bf16.mxu0 %vm2429_vm9, %v2392_v20 }
0x1269   : > { %3452 = vmatmul.mubr.msk.bf16.vlgmr.msra.gmra.mrb[28].mxu0 %vm2429_vm9, %v2393_v25 }
0x126a   : > { %3456 = vmatpush3.bf16.msra.mxu0 (!%p3240_p0), %v3894_v44  ;;  %3459 = vmatprep.mubr.msk.bf16.mxu0 (!%p3240_p0), %vm4716_vm10, %v4715_v46 }
0x126b   : > { %3457 = vmatprep.subr.bf16.mxu0 (!%p3240_p0), %v4715_v46 }
0x126e   : > { %3458 = vmatpush3.bf16.msra.mxu0 (!%p3240_p0), %v3896_v47 }
0x133c   : > { %v3453_v26 = vpop.f32.mrb[28].mxu0 }
0x133d   : > { %v2486_v2 = vadd.f32 %v3453_v26, %v5664_v3  ;;  %v2470_v11 = vpop.f32.mrb[29].mxu0 }
0x133e   : > { %v2484_v28 = vadd.f32 %v2470_v11, %v5657_v63  ;;  %v3454_v58 = vpop.f32.mrb[30].mxu0  ;;  %2504 = sbr.rel (%p3240_p0) target bundleno = 5897 (0x1709), region = 204 }
0x133f   : > { %v2497_v29 = vadd.f32 %v3239_v27, %v2486_v2  ;;  %v2473_v61 = vpop.f32.mrb[31].mxu0 }
0x1340   : > { %v2495_v30 = vadd.f32 %v3239_v27, %v2484_v28  ;;  %v2485_v31 = vadd.f32 %v2473_v61, %v5660_v1 }
0x1341   : > { %2500 = vst.msk [vmem:[#allocation2 + $0x10] sm:$0xff] %vm1094_vm2, %v2497_v29  ;;  %v2513_v63 = vsel (!%p3240_p0), %vm1094_vm2, %v2497_v29, 0.0 }
0x1342   : > { %2498 = vst.msk [vmem:[#allocation2] sm:$0xff] %vm1094_vm2, %v2495_v30  ;;  %v2496_v32 = vadd.f32 %v3239_v27, %v2485_v31  ;;  %v2507_v3 = vsel (!%p3240_p0), %vm1094_vm2, %v2495_v30, 0.0  ;;  %2514 = vadd.xlane.f32.xlu1 (!%p3240_p0), %v2513_v63  ;;  %v4717_v31 = vmov (!%p3240_p0), 0.0|0.0   ;;  %v4718_v63 = vmov (!%p3240_p0), 0  }
0x1343   : > { %2508 = vadd.xlane.f32.xlu0 (!%p3240_p0), %v2507_v3  ;;  %3478 = vmatprep.subr.bf16.mxu0 (!%p3240_p0), %v4717_v31  ;;  %v2812_v3 = vld [vmem:[#allocation36] sm:$0xff] (!%p3240_p0) }
0x1344   : > { %2499 = vst.msk [vmem:[#allocation2 + $0x8] sm:$0xff] %vm1094_vm2, %v2496_v32  ;;  %v2510_v33 = vsel (!%p3240_p0), %vm1094_vm2, %v2496_v32, 0.0  ;;  %3892 = vset.pattern.permute.xlu1 (!%p3240_p0), %v4718_v63  ;;  %3893 = vset.pattern.permute.xlu0 (!%p3240_p0), %v4718_v63 }
0x1347   : > { %2511 = vadd.xlane.f32.xlu0 %v2510_v33 }
0x13cf   : > { %v2515_v34 = vpop.xlane.xlu1 %2514 }
0x13d0   : > { %v2509_v1 = vpop.xlane.xlu0 %2508  ;;  %v2518_v36 = vmul.f32 0.03125, %v2515_v34 }
0x13d1   : > { %v2516_v35 = vmul.f32 0.03125, %v2509_v1 }
0x13d2   : > { %v2521_v37 = vsub.f32 %v2497_v29, %v2518_v36 }
0x13d3   : > { %v2519_v9 = vsub.f32 %v2495_v30, %v2516_v35 }
0x13d4   : > { %v2512_v4 = vpop.xlane.xlu0 %2511  ;;  %v2524_v40 = vmul.f32 %v2521_v37, %v2521_v37 }
0x13d5   : > { %v2517_v38 = vmul.f32 0.03125, %v2512_v4  ;;  %v2522_v39 = vmul.f32 %v2519_v9, %v2519_v9 }
0x13d6   : > { %v2531_v43 = vsel %vm1094_vm2, %v2524_v40, 0.0 }
0x13d7   : > { %v2520_v41 = vsub.f32 %v2496_v32, %v2517_v38  ;;  %v2525_v42 = vsel %vm1094_vm2, %v2522_v39, 0.0  ;;  %v2805_v32 = vld [vmem:[#allocation35] sm:$0xff] }
0x13d8   : > { %2526 = vadd.xlane.f32.xlu1 %v2525_v42 }
0x13d9   : > { %v2523_v10 = vmul.f32 %v2520_v41, %v2520_v41 }
0x13db   : > { %v2528_v19 = vsel %vm1094_vm2, %v2523_v10, 0.0 }
0x13dc   : > { %2532 = vadd.xlane.f32.xlu1 %v2531_v43  ;;  %2529 = vadd.xlane.f32.xlu0 %v2528_v19 }
0x1465   : > { %v2527_v49 = vpop.xlane.xlu1 %2526 }
0x1466   : > { %v2534_v50 = vmul.f32 0.03125, %v2527_v49 }
0x1468   : > { %v2537_v51 = vadd.f32 1e-05, %v2534_v50 }
0x1469   : > { %v2533_v52 = vpop.xlane.xlu1 %2532  ;;  %v2530_v53 = vpop.xlane.xlu0 %2529 }
0x146a   : > { %3898 = vrsqrt.f32 %v2537_v51  ;;  %v2536_v54 = vmul.f32 0.03125, %v2533_v52  ;;  %v2535_v55 = vmul.f32 0.03125, %v2530_v53 }
0x146c   : > { %v2539_v56 = vadd.f32 1e-05, %v2536_v54  ;;  %v2538_v57 = vadd.f32 1e-05, %v2535_v55 }
0x146e   : > { %3900 = vrsqrt.f32 %v2539_v56 }
0x146f   : > { %3902 = vrsqrt.f32 %v2538_v57 }
0x1474   : > { %v3899_v13 = vpop.eup %3898 }
0x1475   : > { %v2543_v60 = vmul.f32 %v3899_v13, %v2519_v9 }
0x1477   : > { %v2552_v6 = vmul.f32 %v3241_v62, %v2543_v60 }
0x1478   : > { %v3901_v0 = vpop.eup %3900 }
0x1479   : > { %v3903_v5 = vpop.eup %3902  ;;  %v2545_v14 = vmul.f32 %v3901_v0, %v2521_v37  ;;  %v2561_v17 = vadd.f32 %v3242_v7, %v2552_v6 }
0x147a   : > { %v2544_v15 = vmul.f32 %v3903_v5, %v2520_v41 }
0x147b   : > { %v2554_v16 = vmul.f32 %v3241_v62, %v2545_v14 }
0x147c   : > { %v2553_v8 = vmul.f32 %v3241_v62, %v2544_v15 }
0x147d   : > { %v2563_v12 = vadd.f32 %v3242_v7, %v2554_v16 }
0x147e   : > { %v2562_v18 = vadd.f32 %v3242_v7, %v2553_v8 }
0x147f   : > { %v2625_v21 = vpack.c.bf16 %v2563_v12, %v2563_v12 }
0x1480   : > { %v2564_v59 = vpack.c.bf16 %v2562_v18, %v2561_v17 }
0x1481   : > { %3468 = vmatmul.mubr.msk.bf16.vlgmr.msra.gmra.mrb[0].mxu1 %vm1094_vm2, %v2625_v21 }
0x1482   : > { %3460 = vmatmul.mubr.msk.bf16.vlgmr.msra.gmra.mrb[0].mxu0 %vm1094_vm2, %v2564_v59 }
0x1483   : > { %3475 = vmatprep.mubr.msk.f32.mxu0 %vm4716_vm10, %v4715_v46 }
0x1554   : > { %v2679_v22 = vpop.f32.mrb[0].mxu1 }
0x1555   : > { %v2618_v23 = vpop.f32.mrb[0].mxu0  ;;  %v3469_v24 = vpop.f32.mrb[1].mxu1  ;;  %v2697_v29 = vmul.f32 %v2679_v22, %v2679_v22 }
0x1556   : > { %v3461_v20 = vpop.f32.mrb[1].mxu0  ;;  %v2682_v25 = vpop.f32.mrb[2].mxu1  ;;  %v2685_v26 = vmul.f32 %v2618_v23, %v2618_v23 }
0x1557   : > { %v2621_v27 = vpop.f32.mrb[2].mxu0  ;;  %v3470_v2 = vpop.f32.mrb[3].mxu1  ;;  %v2698_v30 = vsel %vm1094_vm2, %v2697_v29, 0.0 }
0x1558   : > { %v3462_v11 = vpop.f32.mrb[3].mxu0  ;;  %v2687_v28 = vsel %vm1094_vm2, %v2685_v26, 0.0  ;;  %v2686_v58 = vmul.f32 %v2621_v27, %v2621_v27 }
0x1559   : > { %2688 = vadd.xlane.f32.xlu0 %v2687_v28 }
0x155a   : > { %v2690_v61 = vsel %vm1094_vm2, %v2686_v58, 0.0 }
0x155b   : > { %2691 = vadd.xlane.f32.xlu1 %v2690_v61 }
0x155d   : > { %2699 = vadd.xlane.f32.xlu0 %v2698_v30 }
0x156c   : > { %2808 = vperm.xlu1 %3892, %v2805_v32  }
0x1573   : > { %2815 = vperm.xlu0 %3893, %v2812_v3  }
0x15e6   : > { %v2689_v33 = vpop.xlane.xlu0 %2688 }
0x15e7   : > { %3904 = vrsqrt.f32 %v2689_v33 }
0x15e8   : > { %v2692_v1 = vpop.xlane.xlu1 %2691 }
0x15e9   : > { %3906 = vrsqrt.f32 %v2692_v1 }
0x15ea   : > { %v2700_v34 = vpop.xlane.xlu0 %2699 }
0x15eb   : > { %3908 = vrsqrt.f32 %v2700_v34 }
0x15ec   : > { %v2809_v62 = vpop.permute.xlu1 %2808 }
0x15f1   : > { %v3905_v35 = vpop.eup %3904 }
0x15f2   : > { %v2695_v9 = vmul.f32 %v3905_v35, %v2618_v23  ;;  %v2816_v5 = vpop.permute.xlu0 %2815 }
0x15f3   : > { %v3907_v36 = vpop.eup %3906 }
0x15f4   : > { %v2696_v37 = vmul.f32 %v3907_v36, %v2621_v27 }
0x15f5   : > { %v3909_v38 = vpop.eup %3908 }
0x15f6   : > { %v3479_v4 = vpack.c.bf16 %v2696_v37, %v2695_v9  ;;  %v2702_v39 = vmul.f32 %v3909_v38, %v2679_v22 }
0x15f8   : > { %3481 = vmatpush3.bf16.xpose.msk.msra.mxu0 %vm3480_vm11, %v3479_v4 }
0x15ff   : > { %3476 = vmatmul.mubr.msk.f32.vlgmr.msra.gmra.mrb[4].mxu0 %vm1094_vm2, %v2702_v39 }
0x16d2   : > { %v2778_v40 = vpop.f32.mrb[4].mxu0 }
0x16d3   : > { %v2783_v41 = vsel %vm2782_vm12, %v2778_v40, 0.0  ;;  %v3477_v42 = vpop.f32.mrb[5].mxu0 }
0x16d4   : > { %v2784_v43 = vrot.slane %v2783_v41, 4 }
0x16d6   : > { %v2785_v10 = vadd.f32 %v2784_v43, %v2783_v41 }
0x16d8   : > { %v2786_v19 = vrot.slane %v2785_v10, 2 }
0x16da   : > { %v2787_v44 = vadd.f32 %v2786_v19, %v2785_v10 }
0x16dc   : > { %v2788_v45 = vrot.slane %v2787_v44, 1 }
0x16de   : > { %v2789_v46 = vadd.f32 %v2788_v45, %v2787_v44 }
0x16e0   : > { %v2791_v47 = vmul.f32 0.125, %v2789_v46 }
0x16e2   : > { %v2792_v48 = vsub.f32 %v2778_v40, %v2791_v47 }
0x16e4   : > { %v2793_v49 = vmul.f32 %v2792_v48, %v2792_v48 }
0x16e6   : > { %v2794_v50 = vsel %vm2782_vm12, %v2793_v49, 0.0 }
0x16e7   : > { %v2795_v51 = vrot.slane %v2794_v50, 4 }
0x16e9   : > { %v2796_v52 = vadd.f32 %v2795_v51, %v2794_v50 }
0x16eb   : > { %v2797_v53 = vrot.slane %v2796_v52, 2 }
0x16ed   : > { %v2798_v54 = vadd.f32 %v2797_v53, %v2796_v52 }
0x16ef   : > { %v2799_v55 = vrot.slane %v2798_v54, 1 }
0x16f1   : > { %v2800_v56 = vadd.f32 %v2799_v55, %v2798_v54 }
0x16f3   : > { %v2801_v57 = vmul.f32 0.125, %v2800_v56 }
0x16f5   : > { %v2802_v13 = vadd.f32 1e-05, %v2801_v57 }
0x16f7   : > { %3910 = vrsqrt.f32 %v2802_v13 }
0x1701   : > { %v3911_v60 = vpop.eup %3910 }
0x1702   : > { %v2804_v0 = vmul.f32 %v3911_v60, %v2792_v48 }
0x1704   : > { %v2811_v14 = vmul.f32 %v2809_v62, %v2804_v0 }
0x1706   : > { %v2818_v15 = vadd.f32 %v2816_v5, %v2811_v14 }
0x1708   : > { %2819 = vst.msk [vmem:[%s5477_s12] sm:$0xff] %vm2782_vm12, %v2818_v15 }
0x1709 PF: > { %s5927_s28 = sld [smem:[#allocation56_spill]]  ;;  %s5928_s3 = sld [smem:[#allocation78_spill]] }
0x170a   : > { %s2834_s10 = sshll.u32 %s5477_s12, 4  ;;  %s2821_s30 = scalar_lea.sflag [#allocation5], %s5422_s4  ;;  %s2835_s10 = int_to_ptr.vmem [resolvable:$true] %s2834_s10 }
0x170b   : > { %s4530_s5 = scalar_lea.vmem %s2835_s10, 128  ;;  %p5930_p1 = scmp.ne.s32.totalorder %s5916_s23, 0 }
0x170c   : > { %p4531_p7 = scmp.ne.s32.totalorder %s2835_s10, %s4530_s5  ;;  %s4719_s6 = smov [#allocation38]  }
0x170d   : > { %s4534_s29 = sshll.u32 %s4719_s6, 4  ;;  %s4535_s29 = int_to_ptr.vmem [resolvable:$false] %s4534_s29 }
0x170e   : > { %p4532_p12 = pnand %p4531_p7, %p5930_p1  ;;  %s4536_s9 = scalar_lea.vmem %s4535_s29, 256 }
0x170f   : > { %s3253_s2 = sshll.u32 %s5927_s28, 7  ;;  %s5929_s7 = smov %s5928_s3 }
0x1710   : > { %s5740_s11 = scalar_lea.hbm %s5928_s3, %s3253_s2  ;;  %p4533_p2 = pneg %p4532_p12 }
0x1711   : > { %p4537_p4 = scmp.lt.s32.totalorder %s2835_s10, %s4535_s29  ;;  %p4538_p6 = scmp.lt.s32.totalorder %s4536_s9, %s4530_s5 }
0x1713   : > { %p4539_p5 = por %p4538_p6, %p4537_p4 }
0x1715   : > { %p4540_p9 = pnand %p4539_p5, %p4533_p2 }
0x1717   : > { %4543 = shalt.err (!%p4540_p9)
}
0x1718   : > { %s4544_s4 = scalar_lea.hbm %s5740_s11, 128  ;;  %s4548_s2 = scalar_lea.hbm %s5929_s7, 256 }
0x1719   : > { %p4545_p3 = scmp.ne.s32.totalorder %s5740_s11, %s4544_s4  ;;  %p4549_p13 = scmp.lt.u32.totalorder %s5740_s11, %s5929_s7 }
0x171a   : > { %p4550_p11 = scmp.lt.u32.totalorder %s4548_s2, %s4544_s4  ;;  %p4552_p7 = scmp.lt.u32.totalorder %s4544_s4, %s5740_s11 }
0x171b   : > { %p4546_p10 = pnand %p4545_p3, %p5930_p1 }
0x171c   : > { %p4551_p0 = por %p4550_p11, %p4549_p13 }
0x171d   : > { %p4547_p8 = pneg %p4546_p10 }
0x171e   : > { %p4553_p12 = por %p4552_p7, %p4551_p0 }
0x1720   : > { %p4554_p2 = pnand %p4553_p12, %p4547_p8 }
0x1722   : > { %4557 = shalt.err (!%p4554_p2)
}
0x1723   : > { %3584 = dma.vmem_to_hbm [thread:$0]  (%p5930_p1), %s2835_s10, 128, %s5740_s11, %s2821_s30  }
0x1724 PF: > { %s5931_s9 = sld [smem:[#allocation59_spill]]  ;;  %s5932_s3 = sld [smem:[#allocation52_spill]] }
0x1725   : > { %p5933_p6 = scmp.ne.s32.totalorder %s5917_s21, 0 }
0x172a   : > { %p3701_p4 = scmp.ge.s32.totalorder %s5931_s9, 2  ;;  %s2846_s5 = sand.u32 1, %s5932_s3  }
0x172b   : > { %s2847_s6 = scalar_lea.sflag [#allocation5], %s2846_s5 }
0x172c   : > { %p3655_p5 = pnand %p3701_p4, %p5933_p6 }
0x172e   : > { %4639 = dma.done.wait (!%p3655_p5), %s2847_s6, 128  }
0x172f   : > { %4641 = vsyncadd (!%p3655_p5), %s2847_s6, 4294967168  ;;  %s49_s12 = sadd.s32 1, %s5931_s9   ;;  %s5934_s3 = sld [smem:[#allocation53_spill]] }
0x1730   : > { %p46_p9 = scmp.ge.s32.totalorder %s49_s12, 6   ;;  %s5935_s28 = sld [smem:[#allocation54_spill]] }
0x1731   : > { %s5936_s30 = sld [smem:[#allocation57_spill]]  ;;  %s5937_s4 = sld [smem:[#allocation58_spill]] }
0x1732   : > { %s5938_s29 = smov %s5949_s8  ;;  %s5939_s0 = smov %s5943_s26 }
0x1733   : > { %s5940_s23 = smov %s5947_s1  ;;  %s5941_s1 = smov %s49_s12 }
0x1734   :  { %48 = sbr.rel (!%p46_p9) target bundleno = 36 (0x24), region = 257 }
0x173b   :  { %2852 = vsyncpa [#allocation4], 1 }
0x173c   :  { %2854 = vsyncpa [#allocation4 + $0x1], 1 }
0x173d   :  { %2855 = vsyncpa [#allocation7], 1 }
0x173e   :  { %2856 = vsyncpa [#allocation10], 1 }
0x173f   :  { %2857 = vsyncpa [#allocation13], 1 }
0x1740   :  { %2858 = vsyncpa [#allocation16], 1 }
0x1741   :  { %2859 = vsyncpa [#allocation19], 1 }
0x1742   :  { %2860 = vsyncpa [#allocation22], 1 }
0x1743   :  { %2861 = vsyncpa [#allocation25], 1 }
0x1744   :  { %2862 = vsyncpa [#allocation28], 1 }
0x1745   :  { %2863 = vsyncpa [#allocation31], 1 }
0x1746   :  { %2864 = vsyncpa [#allocation34], 1 }
0x1747   :  { %2865 = vsyncpa [#allocation37], 1 }
0x1748   :  { %2866 = vsyncpa [#allocation5], 1 }
0x1749   :  { %2868 = vsyncpa [#allocation5 + $0x1], 1 }

</bundles_post_ra>
